<compile_context>
chip_gen: v7x
topology: tpu7x:2x2x1
jax: 0.10.0
libtpu: 0.0.40
codegen_flags: <defaults>
</compile_context>

<pallas_src>
import jax
import jax.numpy as jnp
from jax.experimental import pallas as pl
from jax.experimental.pallas import tpu as pltpu


def _lstm_cell(gates, c_prev, H):
    """Gate order (i, f, g, o), matching torch.nn.LSTMCell."""
    sg = jax.nn.sigmoid(gates)          # full-vreg EUP op
    tg = jnp.tanh(gates)                # full-vreg EUP op
    i_g = sg[:, 0 * H:1 * H]
    f_g = sg[:, 1 * H:2 * H]
    g_g = tg[:, 2 * H:3 * H]
    o_g = sg[:, 3 * H:4 * H]
    c_new = f_g * c_prev + i_g * g_g
    h_new = o_g * jnp.tanh(c_new)
    return h_new, c_new


def _decoder_kernel(feat_ref, te_ref, y0_ref,
                    wif_ref, wiy_ref, wie_ref, wh_eff_ref, b1_ref, b2_ref,
                    wy_ref, by_ref,
                    out_ref, hs_ref):
    B, T, F = feat_ref.shape
    M = y0_ref.shape[-1]
    H = wh_eff_ref.shape[0]

    # ---- one-shot prologue (off the serial critical path) -------------------
    # pre[b, t] = input_repr[b, t] @ W_if for all t, as ONE batched matmul.
    # reshape (B, T, F) -> (B*T, F) is layout-free (collapsing leading dims).
    pre = jnp.dot(feat_ref[...].reshape(B * T, F), wif_ref[...],
                  preferred_element_type=jnp.float32).reshape(B, T, 4 * H)

    # time_enc @ W_ie: loop-invariant, computed once.
    te_base = jnp.dot(te_ref[...], wie_ref[...],
                      preferred_element_type=jnp.float32)                 # (B, 4H)

    # base1: t == 1 term  (b_ih + b_hh) + te@Wie + y0@Wiy
    # base2: t >= 2 term  (b_ih + b_hh + by@Wiy) + te@Wie       (by@Wiy hoisted)
    base1 = te_base + b1_ref[...] + jnp.dot(y0_ref[...], wiy_ref[...],
                                            preferred_element_type=jnp.float32)
    base2 = te_base + b2_ref[...]

    # ---- serial recurrence: ONE (B,H)x(H,4H) dot per step --------------------
    # Step t = 1: h0 = c0 = 0, so there is no recurrent matmul at all.
    h, c = _lstm_cell(pre[:, 1, :] + base1, jnp.zeros((B, H), jnp.float32), H)
    hs_ref[pl.ds(0, B), :] = h
    for t in range(2, T):               # trace-time unroll (T is small & static)
        gates = (pre[:, t, :] + base2
                 + jnp.dot(h, wh_eff_ref[...], preferred_element_type=jnp.float32))
        h, c = _lstm_cell(gates, c, H)
        hs_ref[pl.ds((t - 1) * B, B), :] = h     # contiguous row-block store

    # ---- epilogue: one batched output projection + (B, T, M) writeback -------
    y_all = (jnp.dot(hs_ref[...], wy_ref[...],
                     preferred_element_type=jnp.float32)
             + by_ref[...])                                              # ((T-1)*B, M)

    out_ref[:, 0, :] = y0_ref[...]                                       # man[:, 0] = y0
    for t in range(1, T):
        out_ref[:, t, :] = y_all[(t - 1) * B:t * B, :]                   # man[:, t]


def precompute_params(params):
    """Parameter-only precompute (do once per weight update, not per call)."""
    wh_eff = params["wh"] + params["wy"] @ params["wiy"]                 # (H, 4H)
    b1 = params["b"].reshape(1, -1)                                      # (1, 4H)
    b2 = b1 + params["by"].reshape(1, -1) @ params["wiy"]                # (1, 4H)
    return {
        "wif": params["wif"], "wiy": params["wiy"], "wie": params["wie"],
        "wh_eff": wh_eff, "b1": b1, "b2": b2,
        "wy": params["wy"], "by": params["by"].reshape(1, -1),
    }


def decoder_forward(input_repr, time_enc, y0, pparams):
    """input_repr: (B, T, F), time_enc: (B, E), y0: (B, M) -> man: (B, T, M)."""
    B, T, F = input_repr.shape
    M = y0.shape[1]
    H = pparams["wh_eff"].shape[0]

    if T < 2:                           # static guard: kernel assumes T >= 2
        return y0[:, None, :]

    vmem = pl.BlockSpec(memory_space=pltpu.MemorySpace.VMEM)

    # Single pallas_call, no grid, no wrapper-side transposes.
    # (v7x note: only worth adding a "parallel" grid axis over B once B >= 16.)
    return pl.pallas_call(
        _decoder_kernel,
        out_shape=jax.ShapeDtypeStruct((B, T, M), jnp.float32),
        in_specs=[vmem] * 11,
        out_specs=vmem,
        scratch_shapes=[pltpu.VMEM(((T - 1) * B, H), jnp.float32)],
    )(input_repr, time_enc, y0,
      pparams["wif"], pparams["wiy"], pparams["wie"],
      pparams["wh_eff"], pparams["b1"], pparams["b2"],
      pparams["wy"], pparams["by"])


def decoder_reference(input_repr, time_enc, y0, params):
    """Pure-JAX reference of the PyTorch forward (original summation order)."""
    B, T, F = input_repr.shape
    H = params["wh"].shape[0]
    b = params["b"]

    def step(carry, x_t):
        h, c, y = carry
        gates = (x_t @ params["wif"] + y @ params["wiy"]
                 + time_enc @ params["wie"] + h @ params["wh"] + b)
        i_g = jax.nn.sigmoid(gates[:, 0 * H:1 * H])
        f_g = jax.nn.sigmoid(gates[:, 1 * H:2 * H])
        g_g = jnp.tanh(gates[:, 2 * H:3 * H])
        o_g = jax.nn.sigmoid(gates[:, 3 * H:4 * H])
        c_new = f_g * c + i_g * g_g
        h_new = o_g * jnp.tanh(c_new)
        y_new = h_new @ params["wy"] + params["by"]
        return (h_new, c_new, y_new), y_new

    h0 = jnp.zeros((B, H), jnp.float32)
    c0 = jnp.zeros((B, H), jnp.float32)
    feat_tm = jnp.transpose(input_repr, (1, 0, 2))[1:]   # steps 1..T-1
    _, ys = jax.lax.scan(step, (h0, c0, y0), feat_tm)
    return jnp.concatenate([y0[:, None, :], jnp.transpose(ys, (1, 0, 2))], axis=1)


def make_params(key, F, E, M, H):
    """Deterministic synthetic parameters (PyTorch-style uniform init scale)."""
    ks = jax.random.split(key, 8)
    stdv = 1.0 / jnp.sqrt(jnp.float32(H))
    u = lambda k, shape, s: jax.random.uniform(k, shape, jnp.float32, -s, s)
    return {
        # W_ih^T split along the concat order [feat, y, time_enc]
        "wif": u(ks[0], (F, 4 * H), stdv),
        "wiy": u(ks[1], (M, 4 * H), stdv),
        "wie": u(ks[2], (E, 4 * H), stdv),
        "wh":  u(ks[3], (H, 4 * H), stdv),
        "b":   u(ks[4], (4 * H,), stdv) + u(ks[5], (4 * H,), stdv),  # b_ih + b_hh
        "wy":  u(ks[6], (H, M), stdv),
        "by":  u(ks[7], (M,), stdv),
    }


if __name__ == "__main__":
    # Small shapes consistent with the module's forward.
    B, T = 8, 8                   # batch, n_frames_input
    F, E, M, H = 32, 16, 8, 32    # feat_latent, time_enc, manifold, trans_rnn_hidden

    key = jax.random.PRNGKey(0)
    k_in, k_te, k_y0, k_p = jax.random.split(key, 4)

    input_repr = jax.random.normal(k_in, (B, T, F), jnp.float32)
    time_enc = jax.random.normal(k_te, (B, E), jnp.float32)
    y0 = jax.random.normal(k_y0, (B, M), jnp.float32)
    params = make_params(k_p, F, E, M, H)
    pparams = precompute_params(params)   # parameter-only precompute, done once

    man = jax.block_until_ready(decoder_forward(input_repr, time_enc, y0, pparams))
    ref = jax.block_until_ready(decoder_reference(input_repr, time_enc, y0, params))

    assert man.shape == (B, T, M), man.shape
    # Folding Wy@Wiy / by@Wiy into the recurrence changes float summation order
    # slightly vs. the reference -> allow ~1e-5-level differences.
    err = float(jnp.abs(man - ref).max())
    assert jnp.allclose(man, ref, atol=1e-4, rtol=1e-4), err
    print("KERNEL_OK")
</pallas_src>

<mosaic_0001>
module attributes {stable_mosaic.version = 11 : i64} {
  func.func @_decoder_kernel(%arg0: memref<8x8x32xf32, #tpu.memory_space<vmem>>, %arg1: memref<8x16xf32, #tpu.memory_space<vmem>>, %arg2: memref<8x8xf32, #tpu.memory_space<vmem>>, %arg3: memref<32x128xf32, #tpu.memory_space<vmem>>, %arg4: memref<8x128xf32, #tpu.memory_space<vmem>>, %arg5: memref<16x128xf32, #tpu.memory_space<vmem>>, %arg6: memref<32x128xf32, #tpu.memory_space<vmem>>, %arg7: memref<1x128xf32, #tpu.memory_space<vmem>>, %arg8: memref<1x128xf32, #tpu.memory_space<vmem>>, %arg9: memref<32x8xf32, #tpu.memory_space<vmem>>, %arg10: memref<1x8xf32, #tpu.memory_space<vmem>>, %arg11: memref<8x8x8xf32, #tpu.memory_space<vmem>>, %arg12: memref<56x32xf32, #tpu.memory_space<vmem>>) attributes {dimension_semantics = [], scalar_prefetch = 0 : i64, scratch_operands = 1 : i64, tpu.core_type = #tpu.core_type<tc>} {
    %c0 = arith.constant 0 : index
    %c0_0 = arith.constant 0 : index
    %c0_1 = arith.constant 0 : index
    %0 = vector.load %arg0[%c0, %c0_0, %c0_1] : memref<8x8x32xf32, #tpu.memory_space<vmem>>, vector<8x8x32xf32>
    %1 = vector.shape_cast %0 : vector<8x8x32xf32> to vector<64x32xf32>
    %c0_2 = arith.constant 0 : index
    %c0_3 = arith.constant 0 : index
    %2 = vector.load %arg3[%c0_2, %c0_3] : memref<32x128xf32, #tpu.memory_space<vmem>>, vector<32x128xf32>
    %cst = arith.constant dense<0.000000e+00> : vector<64x128xf32>
    %3 = tpu.matmul %1, %2, %cst {dimension_numbers = #tpu.dot_dimension_numbers<[1], [0], [0], [1], [0, 0, 1, 1], [], []>} : vector<64x32xf32>, vector<32x128xf32>, vector<64x128xf32> -> vector<64x128xf32>
    %4 = vector.shape_cast %3 : vector<64x128xf32> to vector<8x8x128xf32>
    %c0_4 = arith.constant 0 : index
    %c0_5 = arith.constant 0 : index
    %5 = vector.load %arg1[%c0_4, %c0_5] : memref<8x16xf32, #tpu.memory_space<vmem>>, vector<8x16xf32>
    %c0_6 = arith.constant 0 : index
    %c0_7 = arith.constant 0 : index
    %6 = vector.load %arg5[%c0_6, %c0_7] : memref<16x128xf32, #tpu.memory_space<vmem>>, vector<16x128xf32>
    %cst_8 = arith.constant dense<0.000000e+00> : vector<8x128xf32>
    %7 = tpu.matmul %5, %6, %cst_8 {dimension_numbers = #tpu.dot_dimension_numbers<[1], [0], [0], [1], [0, 0, 1, 1], [], []>} : vector<8x16xf32>, vector<16x128xf32>, vector<8x128xf32> -> vector<8x128xf32>
    %c0_9 = arith.constant 0 : index
    %c0_10 = arith.constant 0 : index
    %8 = vector.load %arg7[%c0_9, %c0_10] : memref<1x128xf32, #tpu.memory_space<vmem>>, vector<1x128xf32>
    %9 = vector.broadcast %8 : vector<1x128xf32> to vector<8x128xf32>
    %10 = arith.addf %7, %9 : vector<8x128xf32>
    %c0_11 = arith.constant 0 : index
    %c0_12 = arith.constant 0 : index
    %11 = vector.load %arg2[%c0_11, %c0_12] : memref<8x8xf32, #tpu.memory_space<vmem>>, vector<8x8xf32>
    %c0_13 = arith.constant 0 : index
    %c0_14 = arith.constant 0 : index
    %12 = vector.load %arg4[%c0_13, %c0_14] : memref<8x128xf32, #tpu.memory_space<vmem>>, vector<8x128xf32>
    %cst_15 = arith.constant dense<0.000000e+00> : vector<8x128xf32>
    %13 = tpu.matmul %11, %12, %cst_15 {dimension_numbers = #tpu.dot_dimension_numbers<[1], [0], [0], [1], [0, 0, 1, 1], [], []>} : vector<8x8xf32>, vector<8x128xf32>, vector<8x128xf32> -> vector<8x128xf32>
    %14 = arith.addf %10, %13 : vector<8x128xf32>
    %c0_16 = arith.constant 0 : index
    %c0_17 = arith.constant 0 : index
    %15 = vector.load %arg8[%c0_16, %c0_17] : memref<1x128xf32, #tpu.memory_space<vmem>>, vector<1x128xf32>
    %16 = vector.broadcast %15 : vector<1x128xf32> to vector<8x128xf32>
    %17 = arith.addf %7, %16 : vector<8x128xf32>
    %18 = vector.extract_strided_slice %4 {offsets = [0, 1, 0], sizes = [8, 1, 128], strides = [1, 1, 1]} : vector<8x8x128xf32> to vector<8x1x128xf32>
    %19 = vector.shape_cast %18 : vector<8x1x128xf32> to vector<8x128xf32>
    %20 = arith.addf %19, %14 : vector<8x128xf32>
    %cst_18 = arith.constant 0.000000e+00 : f32
    %21 = vector.broadcast %cst_18 : f32 to vector<8x32xf32>
    %22 = arith.negf %20 : vector<8x128xf32>
    %23 = math.exp %22 : vector<8x128xf32>
    %cst_19 = arith.constant 1.000000e+00 : f32
    %24 = vector.broadcast %cst_19 : f32 to vector<8x128xf32>
    %25 = arith.addf %24, %23 : vector<8x128xf32>
    %26 = arith.divf %24, %25 : vector<8x128xf32>
    %27 = math.tanh %20 : vector<8x128xf32>
    %28 = vector.extract_strided_slice %26 {offsets = [0, 0], sizes = [8, 32], strides = [1, 1]} : vector<8x128xf32> to vector<8x32xf32>
    %29 = vector.extract_strided_slice %26 {offsets = [0, 32], sizes = [8, 32], strides = [1, 1]} : vector<8x128xf32> to vector<8x32xf32>
    %30 = vector.extract_strided_slice %27 {offsets = [0, 64], sizes = [8, 32], strides = [1, 1]} : vector<8x128xf32> to vector<8x32xf32>
    %31 = vector.extract_strided_slice %26 {offsets = [0, 96], sizes = [8, 32], strides = [1, 1]} : vector<8x128xf32> to vector<8x32xf32>
    %32 = arith.mulf %29, %21 : vector<8x32xf32>
    %33 = arith.mulf %28, %30 : vector<8x32xf32>
    %34 = arith.addf %32, %33 : vector<8x32xf32>
    %35 = math.tanh %34 : vector<8x32xf32>
    %36 = arith.mulf %31, %35 : vector<8x32xf32>
    %c0_20 = arith.constant 0 : index
    %c0_21 = arith.constant 0 : index
    %37 = vector.load %arg12[%c0_20, %c0_21] : memref<56x32xf32, #tpu.memory_space<vmem>>, vector<8x32xf32>
    tpu.vector_store %arg12[%c0_20, %c0_21], %36 {strides = array<i32>} : memref<56x32xf32, #tpu.memory_space<vmem>>, vector<8x32xf32>,
    %38 = vector.extract_strided_slice %4 {offsets = [0, 2, 0], sizes = [8, 1, 128], strides = [1, 1, 1]} : vector<8x8x128xf32> to vector<8x1x128xf32>
    %39 = vector.shape_cast %38 : vector<8x1x128xf32> to vector<8x128xf32>
    %40 = arith.addf %39, %17 : vector<8x128xf32>
    %c0_22 = arith.constant 0 : index
    %c0_23 = arith.constant 0 : index
    %41 = vector.load %arg6[%c0_22, %c0_23] : memref<32x128xf32, #tpu.memory_space<vmem>>, vector<32x128xf32>
    %cst_24 = arith.constant dense<0.000000e+00> : vector<8x128xf32>
    %42 = tpu.matmul %36, %41, %cst_24 {dimension_numbers = #tpu.dot_dimension_numbers<[1], [0], [0], [1], [0, 0, 1, 1], [], []>} : vector<8x32xf32>, vector<32x128xf32>, vector<8x128xf32> -> vector<8x128xf32>
    %43 = arith.addf %40, %42 : vector<8x128xf32>
    %44 = arith.negf %43 : vector<8x128xf32>
    %45 = math.exp %44 : vector<8x128xf32>
    %cst_25 = arith.constant 1.000000e+00 : f32
    %46 = vector.broadcast %cst_25 : f32 to vector<8x128xf32>
    %47 = arith.addf %46, %45 : vector<8x128xf32>
    %48 = arith.divf %46, %47 : vector<8x128xf32>
    %49 = math.tanh %43 : vector<8x128xf32>
    %50 = vector.extract_strided_slice %48 {offsets = [0, 0], sizes = [8, 32], strides = [1, 1]} : vector<8x128xf32> to vector<8x32xf32>
    %51 = vector.extract_strided_slice %48 {offsets = [0, 32], sizes = [8, 32], strides = [1, 1]} : vector<8x128xf32> to vector<8x32xf32>
    %52 = vector.extract_strided_slice %49 {offsets = [0, 64], sizes = [8, 32], strides = [1, 1]} : vector<8x128xf32> to vector<8x32xf32>
    %53 = vector.extract_strided_slice %48 {offsets = [0, 96], sizes = [8, 32], strides = [1, 1]} : vector<8x128xf32> to vector<8x32xf32>
    %54 = arith.mulf %51, %34 : vector<8x32xf32>
    %55 = arith.mulf %50, %52 : vector<8x32xf32>
    %56 = arith.addf %54, %55 : vector<8x32xf32>
    %57 = math.tanh %56 : vector<8x32xf32>
    %58 = arith.mulf %53, %57 : vector<8x32xf32>
    %c8 = arith.constant 8 : index
    %c0_26 = arith.constant 0 : index
    %59 = vector.load %arg12[%c8, %c0_26] : memref<56x32xf32, #tpu.memory_space<vmem>>, vector<8x32xf32>
    tpu.vector_store %arg12[%c8, %c0_26], %58 {strides = array<i32>} : memref<56x32xf32, #tpu.memory_space<vmem>>, vector<8x32xf32>,
    %60 = vector.extract_strided_slice %4 {offsets = [0, 3, 0], sizes = [8, 1, 128], strides = [1, 1, 1]} : vector<8x8x128xf32> to vector<8x1x128xf32>
    %61 = vector.shape_cast %60 : vector<8x1x128xf32> to vector<8x128xf32>
    %62 = arith.addf %61, %17 : vector<8x128xf32>
    %c0_27 = arith.constant 0 : index
    %c0_28 = arith.constant 0 : index
    %63 = vector.load %arg6[%c0_27, %c0_28] : memref<32x128xf32, #tpu.memory_space<vmem>>, vector<32x128xf32>
    %cst_29 = arith.constant dense<0.000000e+00> : vector<8x128xf32>
    %64 = tpu.matmul %58, %63, %cst_29 {dimension_numbers = #tpu.dot_dimension_numbers<[1], [0], [0], [1], [0, 0, 1, 1], [], []>} : vector<8x32xf32>, vector<32x128xf32>, vector<8x128xf32> -> vector<8x128xf32>
    %65 = arith.addf %62, %64 : vector<8x128xf32>
    %66 = arith.negf %65 : vector<8x128xf32>
    %67 = math.exp %66 : vector<8x128xf32>
    %cst_30 = arith.constant 1.000000e+00 : f32
    %68 = vector.broadcast %cst_30 : f32 to vector<8x128xf32>
    %69 = arith.addf %68, %67 : vector<8x128xf32>
    %70 = arith.divf %68, %69 : vector<8x128xf32>
    %71 = math.tanh %65 : vector<8x128xf32>
    %72 = vector.extract_strided_slice %70 {offsets = [0, 0], sizes = [8, 32], strides = [1, 1]} : vector<8x128xf32> to vector<8x32xf32>
    %73 = vector.extract_strided_slice %70 {offsets = [0, 32], sizes = [8, 32], strides = [1, 1]} : vector<8x128xf32> to vector<8x32xf32>
    %74 = vector.extract_strided_slice %71 {offsets = [0, 64], sizes = [8, 32], strides = [1, 1]} : vector<8x128xf32> to vector<8x32xf32>
    %75 = vector.extract_strided_slice %70 {offsets = [0, 96], sizes = [8, 32], strides = [1, 1]} : vector<8x128xf32> to vector<8x32xf32>
    %76 = arith.mulf %73, %56 : vector<8x32xf32>
    %77 = arith.mulf %72, %74 : vector<8x32xf32>
    %78 = arith.addf %76, %77 : vector<8x32xf32>
    %79 = math.tanh %78 : vector<8x32xf32>
    %80 = arith.mulf %75, %79 : vector<8x32xf32>
    %c16 = arith.constant 16 : index
    %c0_31 = arith.constant 0 : index
    %81 = vector.load %arg12[%c16, %c0_31] : memref<56x32xf32, #tpu.memory_space<vmem>>, vector<8x32xf32>
    tpu.vector_store %arg12[%c16, %c0_31], %80 {strides = array<i32>} : memref<56x32xf32, #tpu.memory_space<vmem>>, vector<8x32xf32>,
    %82 = vector.extract_strided_slice %4 {offsets = [0, 4, 0], sizes = [8, 1, 128], strides = [1, 1, 1]} : vector<8x8x128xf32> to vector<8x1x128xf32>
    %83 = vector.shape_cast %82 : vector<8x1x128xf32> to vector<8x128xf32>
    %84 = arith.addf %83, %17 : vector<8x128xf32>
    %c0_32 = arith.constant 0 : index
    %c0_33 = arith.constant 0 : index
    %85 = vector.load %arg6[%c0_32, %c0_33] : memref<32x128xf32, #tpu.memory_space<vmem>>, vector<32x128xf32>
    %cst_34 = arith.constant dense<0.000000e+00> : vector<8x128xf32>
    %86 = tpu.matmul %80, %85, %cst_34 {dimension_numbers = #tpu.dot_dimension_numbers<[1], [0], [0], [1], [0, 0, 1, 1], [], []>} : vector<8x32xf32>, vector<32x128xf32>, vector<8x128xf32> -> vector<8x128xf32>
    %87 = arith.addf %84, %86 : vector<8x128xf32>
    %88 = arith.negf %87 : vector<8x128xf32>
    %89 = math.exp %88 : vector<8x128xf32>
    %cst_35 = arith.constant 1.000000e+00 : f32
    %90 = vector.broadcast %cst_35 : f32 to vector<8x128xf32>
    %91 = arith.addf %90, %89 : vector<8x128xf32>
    %92 = arith.divf %90, %91 : vector<8x128xf32>
    %93 = math.tanh %87 : vector<8x128xf32>
    %94 = vector.extract_strided_slice %92 {offsets = [0, 0], sizes = [8, 32], strides = [1, 1]} : vector<8x128xf32> to vector<8x32xf32>
    %95 = vector.extract_strided_slice %92 {offsets = [0, 32], sizes = [8, 32], strides = [1, 1]} : vector<8x128xf32> to vector<8x32xf32>
    %96 = vector.extract_strided_slice %93 {offsets = [0, 64], sizes = [8, 32], strides = [1, 1]} : vector<8x128xf32> to vector<8x32xf32>
    %97 = vector.extract_strided_slice %92 {offsets = [0, 96], sizes = [8, 32], strides = [1, 1]} : vector<8x128xf32> to vector<8x32xf32>
    %98 = arith.mulf %95, %78 : vector<8x32xf32>
    %99 = arith.mulf %94, %96 : vector<8x32xf32>
    %100 = arith.addf %98, %99 : vector<8x32xf32>
    %101 = math.tanh %100 : vector<8x32xf32>
    %102 = arith.mulf %97, %101 : vector<8x32xf32>
    %c24 = arith.constant 24 : index
    %c0_36 = arith.constant 0 : index
    %103 = vector.load %arg12[%c24, %c0_36] : memref<56x32xf32, #tpu.memory_space<vmem>>, vector<8x32xf32>
    tpu.vector_store %arg12[%c24, %c0_36], %102 {strides = array<i32>} : memref<56x32xf32, #tpu.memory_space<vmem>>, vector<8x32xf32>,
    %104 = vector.extract_strided_slice %4 {offsets = [0, 5, 0], sizes = [8, 1, 128], strides = [1, 1, 1]} : vector<8x8x128xf32> to vector<8x1x128xf32>
    %105 = vector.shape_cast %104 : vector<8x1x128xf32> to vector<8x128xf32>
    %106 = arith.addf %105, %17 : vector<8x128xf32>
    %c0_37 = arith.constant 0 : index
    %c0_38 = arith.constant 0 : index
    %107 = vector.load %arg6[%c0_37, %c0_38] : memref<32x128xf32, #tpu.memory_space<vmem>>, vector<32x128xf32>
    %cst_39 = arith.constant dense<0.000000e+00> : vector<8x128xf32>
    %108 = tpu.matmul %102, %107, %cst_39 {dimension_numbers = #tpu.dot_dimension_numbers<[1], [0], [0], [1], [0, 0, 1, 1], [], []>} : vector<8x32xf32>, vector<32x128xf32>, vector<8x128xf32> -> vector<8x128xf32>
    %109 = arith.addf %106, %108 : vector<8x128xf32>
    %110 = arith.negf %109 : vector<8x128xf32>
    %111 = math.exp %110 : vector<8x128xf32>
    %cst_40 = arith.constant 1.000000e+00 : f32
    %112 = vector.broadcast %cst_40 : f32 to vector<8x128xf32>
    %113 = arith.addf %112, %111 : vector<8x128xf32>
    %114 = arith.divf %112, %113 : vector<8x128xf32>
    %115 = math.tanh %109 : vector<8x128xf32>
    %116 = vector.extract_strided_slice %114 {offsets = [0, 0], sizes = [8, 32], strides = [1, 1]} : vector<8x128xf32> to vector<8x32xf32>
    %117 = vector.extract_strided_slice %114 {offsets = [0, 32], sizes = [8, 32], strides = [1, 1]} : vector<8x128xf32> to vector<8x32xf32>
    %118 = vector.extract_strided_slice %115 {offsets = [0, 64], sizes = [8, 32], strides = [1, 1]} : vector<8x128xf32> to vector<8x32xf32>
    %119 = vector.extract_strided_slice %114 {offsets = [0, 96], sizes = [8, 32], strides = [1, 1]} : vector<8x128xf32> to vector<8x32xf32>
    %120 = arith.mulf %117, %100 : vector<8x32xf32>
    %121 = arith.mulf %116, %118 : vector<8x32xf32>
    %122 = arith.addf %120, %121 : vector<8x32xf32>
    %123 = math.tanh %122 : vector<8x32xf32>
    %124 = arith.mulf %119, %123 : vector<8x32xf32>
    %c32 = arith.constant 32 : index
    %c0_41 = arith.constant 0 : index
    %125 = vector.load %arg12[%c32, %c0_41] : memref<56x32xf32, #tpu.memory_space<vmem>>, vector<8x32xf32>
    tpu.vector_store %arg12[%c32, %c0_41], %124 {strides = array<i32>} : memref<56x32xf32, #tpu.memory_space<vmem>>, vector<8x32xf32>,
    %126 = vector.extract_strided_slice %4 {offsets = [0, 6, 0], sizes = [8, 1, 128], strides = [1, 1, 1]} : vector<8x8x128xf32> to vector<8x1x128xf32>
    %127 = vector.shape_cast %126 : vector<8x1x128xf32> to vector<8x128xf32>
    %128 = arith.addf %127, %17 : vector<8x128xf32>
    %c0_42 = arith.constant 0 : index
    %c0_43 = arith.constant 0 : index
    %129 = vector.load %arg6[%c0_42, %c0_43] : memref<32x128xf32, #tpu.memory_space<vmem>>, vector<32x128xf32>
    %cst_44 = arith.constant dense<0.000000e+00> : vector<8x128xf32>
    %130 = tpu.matmul %124, %129, %cst_44 {dimension_numbers = #tpu.dot_dimension_numbers<[1], [0], [0], [1], [0, 0, 1, 1], [], []>} : vector<8x32xf32>, vector<32x128xf32>, vector<8x128xf32> -> vector<8x128xf32>
    %131 = arith.addf %128, %130 : vector<8x128xf32>
    %132 = arith.negf %131 : vector<8x128xf32>
    %133 = math.exp %132 : vector<8x128xf32>
    %cst_45 = arith.constant 1.000000e+00 : f32
    %134 = vector.broadcast %cst_45 : f32 to vector<8x128xf32>
    %135 = arith.addf %134, %133 : vector<8x128xf32>
    %136 = arith.divf %134, %135 : vector<8x128xf32>
    %137 = math.tanh %131 : vector<8x128xf32>
    %138 = vector.extract_strided_slice %136 {offsets = [0, 0], sizes = [8, 32], strides = [1, 1]} : vector<8x128xf32> to vector<8x32xf32>
    %139 = vector.extract_strided_slice %136 {offsets = [0, 32], sizes = [8, 32], strides = [1, 1]} : vector<8x128xf32> to vector<8x32xf32>
    %140 = vector.extract_strided_slice %137 {offsets = [0, 64], sizes = [8, 32], strides = [1, 1]} : vector<8x128xf32> to vector<8x32xf32>
    %141 = vector.extract_strided_slice %136 {offsets = [0, 96], sizes = [8, 32], strides = [1, 1]} : vector<8x128xf32> to vector<8x32xf32>
    %142 = arith.mulf %139, %122 : vector<8x32xf32>
    %143 = arith.mulf %138, %140 : vector<8x32xf32>
    %144 = arith.addf %142, %143 : vector<8x32xf32>
    %145 = math.tanh %144 : vector<8x32xf32>
    %146 = arith.mulf %141, %145 : vector<8x32xf32>
    %c40 = arith.constant 40 : index
    %c0_46 = arith.constant 0 : index
    %147 = vector.load %arg12[%c40, %c0_46] : memref<56x32xf32, #tpu.memory_space<vmem>>, vector<8x32xf32>
    tpu.vector_store %arg12[%c40, %c0_46], %146 {strides = array<i32>} : memref<56x32xf32, #tpu.memory_space<vmem>>, vector<8x32xf32>,
    %148 = vector.extract_strided_slice %4 {offsets = [0, 7, 0], sizes = [8, 1, 128], strides = [1, 1, 1]} : vector<8x8x128xf32> to vector<8x1x128xf32>
    %149 = vector.shape_cast %148 : vector<8x1x128xf32> to vector<8x128xf32>
    %150 = arith.addf %149, %17 : vector<8x128xf32>
    %c0_47 = arith.constant 0 : index
    %c0_48 = arith.constant 0 : index
    %151 = vector.load %arg6[%c0_47, %c0_48] : memref<32x128xf32, #tpu.memory_space<vmem>>, vector<32x128xf32>
    %cst_49 = arith.constant dense<0.000000e+00> : vector<8x128xf32>
    %152 = tpu.matmul %146, %151, %cst_49 {dimension_numbers = #tpu.dot_dimension_numbers<[1], [0], [0], [1], [0, 0, 1, 1], [], []>} : vector<8x32xf32>, vector<32x128xf32>, vector<8x128xf32> -> vector<8x128xf32>
    %153 = arith.addf %150, %152 : vector<8x128xf32>
    %154 = arith.negf %153 : vector<8x128xf32>
    %155 = math.exp %154 : vector<8x128xf32>
    %cst_50 = arith.constant 1.000000e+00 : f32
    %156 = vector.broadcast %cst_50 : f32 to vector<8x128xf32>
    %157 = arith.addf %156, %155 : vector<8x128xf32>
    %158 = arith.divf %156, %157 : vector<8x128xf32>
    %159 = math.tanh %153 : vector<8x128xf32>
    %160 = vector.extract_strided_slice %158 {offsets = [0, 0], sizes = [8, 32], strides = [1, 1]} : vector<8x128xf32> to vector<8x32xf32>
    %161 = vector.extract_strided_slice %158 {offsets = [0, 32], sizes = [8, 32], strides = [1, 1]} : vector<8x128xf32> to vector<8x32xf32>
    %162 = vector.extract_strided_slice %159 {offsets = [0, 64], sizes = [8, 32], strides = [1, 1]} : vector<8x128xf32> to vector<8x32xf32>
    %163 = vector.extract_strided_slice %158 {offsets = [0, 96], sizes = [8, 32], strides = [1, 1]} : vector<8x128xf32> to vector<8x32xf32>
    %164 = arith.mulf %161, %144 : vector<8x32xf32>
    %165 = arith.mulf %160, %162 : vector<8x32xf32>
    %166 = arith.addf %164, %165 : vector<8x32xf32>
    %167 = math.tanh %166 : vector<8x32xf32>
    %168 = arith.mulf %163, %167 : vector<8x32xf32>
    %c48 = arith.constant 48 : index
    %c0_51 = arith.constant 0 : index
    %169 = vector.load %arg12[%c48, %c0_51] : memref<56x32xf32, #tpu.memory_space<vmem>>, vector<8x32xf32>
    tpu.vector_store %arg12[%c48, %c0_51], %168 {strides = array<i32>} : memref<56x32xf32, #tpu.memory_space<vmem>>, vector<8x32xf32>,
    %c0_52 = arith.constant 0 : index
    %c0_53 = arith.constant 0 : index
    %170 = vector.load %arg12[%c0_52, %c0_53] : memref<56x32xf32, #tpu.memory_space<vmem>>, vector<56x32xf32>
    %c0_54 = arith.constant 0 : index
    %c0_55 = arith.constant 0 : index
    %171 = vector.load %arg9[%c0_54, %c0_55] : memref<32x8xf32, #tpu.memory_space<vmem>>, vector<32x8xf32>
    %cst_56 = arith.constant dense<0.000000e+00> : vector<56x8xf32>
    %172 = tpu.matmul %170, %171, %cst_56 {dimension_numbers = #tpu.dot_dimension_numbers<[1], [0], [0], [1], [0, 0, 1, 1], [], []>} : vector<56x32xf32>, vector<32x8xf32>, vector<56x8xf32> -> vector<56x8xf32>
    %c0_57 = arith.constant 0 : index
    %c0_58 = arith.constant 0 : index
    %173 = vector.load %arg10[%c0_57, %c0_58] : memref<1x8xf32, #tpu.memory_space<vmem>>, vector<1x8xf32>
    %174 = vector.broadcast %173 : vector<1x8xf32> to vector<56x8xf32>
    %175 = arith.addf %172, %174 : vector<56x8xf32>
    %c0_59 = arith.constant 0 : index
    %c0_60 = arith.constant 0 : index
    %176 = vector.load %arg2[%c0_59, %c0_60] : memref<8x8xf32, #tpu.memory_space<vmem>>, vector<8x8xf32>
    %c0_61 = arith.constant 0 : index
    %c0_62 = arith.constant 0 : index
    %c0_63 = arith.constant 0 : index
    %177 = vector.load %arg11[%c0_61, %c0_62, %c0_63] : memref<8x8x8xf32, #tpu.memory_space<vmem>>, vector<8x1x8xf32>
    %178 = vector.shape_cast %177 : vector<8x1x8xf32> to vector<8x8xf32>
    %179 = vector.shape_cast %176 : vector<8x8xf32> to vector<8x1x8xf32>
    tpu.vector_store %arg11[%c0_61, %c0_62, %c0_63], %179 {strides = array<i32>} : memref<8x8x8xf32, #tpu.memory_space<vmem>>, vector<8x1x8xf32>,
    %180 = vector.extract_strided_slice %175 {offsets = [0, 0], sizes = [8, 8], strides = [1, 1]} : vector<56x8xf32> to vector<8x8xf32>
    %c0_64 = arith.constant 0 : index
    %c1 = arith.constant 1 : index
    %c0_65 = arith.constant 0 : index
    %181 = vector.load %arg11[%c0_64, %c1, %c0_65] : memref<8x8x8xf32, #tpu.memory_space<vmem>>, vector<8x1x8xf32>
    %182 = vector.shape_cast %181 : vector<8x1x8xf32> to vector<8x8xf32>
    %183 = vector.shape_cast %180 : vector<8x8xf32> to vector<8x1x8xf32>
    tpu.vector_store %arg11[%c0_64, %c1, %c0_65], %183 {strides = array<i32>} : memref<8x8x8xf32, #tpu.memory_space<vmem>>, vector<8x1x8xf32>,
    %184 = vector.extract_strided_slice %175 {offsets = [8, 0], sizes = [8, 8], strides = [1, 1]} : vector<56x8xf32> to vector<8x8xf32>
    %c0_66 = arith.constant 0 : index
    %c2 = arith.constant 2 : index
    %c0_67 = arith.constant 0 : index
    %185 = vector.load %arg11[%c0_66, %c2, %c0_67] : memref<8x8x8xf32, #tpu.memory_space<vmem>>, vector<8x1x8xf32>
    %186 = vector.shape_cast %185 : vector<8x1x8xf32> to vector<8x8xf32>
    %187 = vector.shape_cast %184 : vector<8x8xf32> to vector<8x1x8xf32>
    tpu.vector_store %arg11[%c0_66, %c2, %c0_67], %187 {strides = array<i32>} : memref<8x8x8xf32, #tpu.memory_space<vmem>>, vector<8x1x8xf32>,
    %188 = vector.extract_strided_slice %175 {offsets = [16, 0], sizes = [8, 8], strides = [1, 1]} : vector<56x8xf32> to vector<8x8xf32>
    %c0_68 = arith.constant 0 : index
    %c3 = arith.constant 3 : index
    %c0_69 = arith.constant 0 : index
    %189 = vector.load %arg11[%c0_68, %c3, %c0_69] : memref<8x8x8xf32, #tpu.memory_space<vmem>>, vector<8x1x8xf32>
    %190 = vector.shape_cast %189 : vector<8x1x8xf32> to vector<8x8xf32>
    %191 = vector.shape_cast %188 : vector<8x8xf32> to vector<8x1x8xf32>
    tpu.vector_store %arg11[%c0_68, %c3, %c0_69], %191 {strides = array<i32>} : memref<8x8x8xf32, #tpu.memory_space<vmem>>, vector<8x1x8xf32>,
    %192 = vector.extract_strided_slice %175 {offsets = [24, 0], sizes = [8, 8], strides = [1, 1]} : vector<56x8xf32> to vector<8x8xf32>
    %c0_70 = arith.constant 0 : index
    %c4 = arith.constant 4 : index
    %c0_71 = arith.constant 0 : index
    %193 = vector.load %arg11[%c0_70, %c4, %c0_71] : memref<8x8x8xf32, #tpu.memory_space<vmem>>, vector<8x1x8xf32>
    %194 = vector.shape_cast %193 : vector<8x1x8xf32> to vector<8x8xf32>
    %195 = vector.shape_cast %192 : vector<8x8xf32> to vector<8x1x8xf32>
    tpu.vector_store %arg11[%c0_70, %c4, %c0_71], %195 {strides = array<i32>} : memref<8x8x8xf32, #tpu.memory_space<vmem>>, vector<8x1x8xf32>,
    %196 = vector.extract_strided_slice %175 {offsets = [32, 0], sizes = [8, 8], strides = [1, 1]} : vector<56x8xf32> to vector<8x8xf32>
    %c0_72 = arith.constant 0 : index
    %c5 = arith.constant 5 : index
    %c0_73 = arith.constant 0 : index
    %197 = vector.load %arg11[%c0_72, %c5, %c0_73] : memref<8x8x8xf32, #tpu.memory_space<vmem>>, vector<8x1x8xf32>
    %198 = vector.shape_cast %197 : vector<8x1x8xf32> to vector<8x8xf32>
    %199 = vector.shape_cast %196 : vector<8x8xf32> to vector<8x1x8xf32>
    tpu.vector_store %arg11[%c0_72, %c5, %c0_73], %199 {strides = array<i32>} : memref<8x8x8xf32, #tpu.memory_space<vmem>>, vector<8x1x8xf32>,
    %200 = vector.extract_strided_slice %175 {offsets = [40, 0], sizes = [8, 8], strides = [1, 1]} : vector<56x8xf32> to vector<8x8xf32>
    %c0_74 = arith.constant 0 : index
    %c6 = arith.constant 6 : index
    %c0_75 = arith.constant 0 : index
    %201 = vector.load %arg11[%c0_74, %c6, %c0_75] : memref<8x8x8xf32, #tpu.memory_space<vmem>>, vector<8x1x8xf32>
    %202 = vector.shape_cast %201 : vector<8x1x8xf32> to vector<8x8xf32>
    %203 = vector.shape_cast %200 : vector<8x8xf32> to vector<8x1x8xf32>
    tpu.vector_store %arg11[%c0_74, %c6, %c0_75], %203 {strides = array<i32>} : memref<8x8x8xf32, #tpu.memory_space<vmem>>, vector<8x1x8xf32>,
    %204 = vector.extract_strided_slice %175 {offsets = [48, 0], sizes = [8, 8], strides = [1, 1]} : vector<56x8xf32> to vector<8x8xf32>
    %c0_76 = arith.constant 0 : index
    %c7 = arith.constant 7 : index
    %c0_77 = arith.constant 0 : index
    %205 = vector.load %arg11[%c0_76, %c7, %c0_77] : memref<8x8x8xf32, #tpu.memory_space<vmem>>, vector<8x1x8xf32>
    %206 = vector.shape_cast %205 : vector<8x1x8xf32> to vector<8x8xf32>
    %207 = vector.shape_cast %204 : vector<8x8xf32> to vector<8x1x8xf32>
    tpu.vector_store %arg11[%c0_76, %c7, %c0_77], %207 {strides = array<i32>} : memref<8x8x8xf32, #tpu.memory_space<vmem>>, vector<8x1x8xf32>,
    return
  }
}

</mosaic_0001>

<bundles_post_ra>
// kernel: tpu_custom_call.1
= control target key start
LH: loop header
LB: loop body
LE: loop exit
PB: predicated region body
PF: predicated region fallthrough
CT: control target
= control target key end

     0   :  { %16 = vsyncpa [#allocation4], 0  ;;  %s5934_s0 = inlined_call_operand.hbm [shape: f32[8,8,32], index: 0, kind: input, shape index: {}]   ;;  %s5935_s1 = inlined_call_operand.hbm [shape: f32[8,16], index: 1, kind: input, shape index: {}]   ;;  %s5936_s2 = inlined_call_operand.hbm [shape: f32[8,8], index: 2, kind: input, shape index: {}]   ;;  %s5937_s3 = inlined_call_operand.vmem [shape: f32[32,128], index: 3, kind: input, shape index: {}]   ;;  %s5938_s4 = inlined_call_operand.hbm [shape: f32[8,128], index: 4, kind: input, shape index: {}]   ;;  %s5939_s5 = inlined_call_operand.vmem [shape: f32[16,128], index: 5, kind: input, shape index: {}]   ;;  %s5940_s6 = inlined_call_operand.hbm [shape: f32[32,128], index: 6, kind: input, shape index: {}]   ;;  %s5941_s7 = inlined_call_operand.vmem [shape: f32[1,128], index: 7, kind: input, shape index: {}]   ;;  %s5942_s8 = inlined_call_operand.vmem [shape: f32[1,128], index: 8, kind: input, shape index: {}]   ;;  %s5943_s9 = inlined_call_operand.vmem [shape: f32[32,8], index: 9, kind: input, shape index: {}]   ;;  %s5944_s10 = inlined_call_operand.vmem [shape: f32[1,8], index: 10, kind: input, shape index: {}]   ;;  %s5945_s11 = inlined_call_operand.hbm [shape: f32[8,8,8], index: 11, kind: output, shape index: {}]  }
   0x1   :  { %17 = vsyncpa [#allocation7], 0 }
   0x2   :  { %18 = vsyncpa [#allocation10], 0 }
   0x3   :  { %19 = vsyncpa [#allocation5], 0  ;;  %s4520_s17 = smov [#allocation6]   ;;  %s4521_s19 = smov [#allocation9]  }
   0x4   :  { %s38_s18 = sshll.u32 %s4520_s17, 4  ;;  %s60_s20 = sshll.u32 %s4521_s19, 4  ;;  %s39_s18 = int_to_ptr.vmem [resolvable:$true] %s38_s18  ;;  %s61_s20 = int_to_ptr.vmem [resolvable:$true] %s60_s20 }
   0x5   :  { %s4380_s23 = scalar_lea.hbm %s5935_s1, 128 }
   0x6   :  { %p4381_p0 = scmp.ne.s32.totalorder %s5935_s1, %s4380_s23  ;;  %p4384_p1 = scmp.lt.u32.totalorder %s4380_s23, %s5935_s1 }
   0x8   :  { %p4386_p2 = pnand %p4384_p1, %p4381_p0 }
   0xa   :  { %4389 = shalt.err (!%p4386_p2)
}
   0xb   :  { %s4390_s28 = scalar_lea.vmem %s39_s18, 128  ;;  %p4395_p4 = scmp.lt.s32.totalorder %s39_s18, %s39_s18 }
   0xc   :  { %p4391_p3 = scmp.ne.s32.totalorder %s39_s18, %s4390_s28  ;;  %p4396_p5 = scmp.lt.s32.totalorder %s4390_s28, %s4390_s28 }
   0xe   :  { %p4397_p6 = por %p4396_p5, %p4395_p4 }
  0x10   :  { %p4398_p7 = pnand %p4397_p6, %p4391_p3 }
  0x12   :  { %4401 = shalt.err (!%p4398_p7)
}
  0x13   :  { %41 = dma.hbm_to_vmem [thread:$0]  %s5935_s1, 128, %s39_s18, [#allocation7]  }
  0x14   :  { %s4402_s14 = scalar_lea.hbm %s5938_s4, 128 }
  0x15   :  { %p4403_p8 = scmp.ne.s32.totalorder %s5938_s4, %s4402_s14  ;;  %p4406_p9 = scmp.lt.u32.totalorder %s4402_s14, %s5938_s4 }
  0x17   :  { %p4408_p10 = pnand %p4406_p9, %p4403_p8 }
  0x19   :  { %4411 = shalt.err (!%p4408_p10)
}
  0x1a   :  { %s4412_s21 = scalar_lea.vmem %s61_s20, 128  ;;  %p4417_p12 = scmp.lt.s32.totalorder %s61_s20, %s61_s20 }
  0x1b   :  { %p4413_p11 = scmp.ne.s32.totalorder %s61_s20, %s4412_s21  ;;  %p4418_p13 = scmp.lt.s32.totalorder %s4412_s21, %s4412_s21 }
  0x1d   :  { %p4419_p0 = por %p4418_p13, %p4417_p12 }
  0x1f   :  { %p4420_p1 = pnand %p4419_p0, %p4413_p11 }
  0x21   :  { %4423 = shalt.err (!%p4420_p1)
}
  0x22   :  { %63 = dma.hbm_to_vmem [thread:$0]  %s5938_s4, 128, %s61_s20, [#allocation10]  }
  0x23   :  { %s4522_s22 = smov [#allocation3]   ;;  %s4424_s26 = scalar_lea.hbm %s5934_s0, 1024 }
  0x24   :  { %s25_s23 = sshll.u32 %s4522_s22, 4  ;;  %p4425_p2 = scmp.ne.s32.totalorder %s5934_s0, %s4424_s26  ;;  %s26_s23 = int_to_ptr.vmem [resolvable:$true] %s25_s23 }
  0x25   :  { %p4428_p3 = scmp.lt.u32.totalorder %s4424_s26, %s5934_s0 }
  0x27   :  { %p4430_p4 = pnand %p4428_p3, %p4425_p2 }
  0x29   :  { %4433 = shalt.err (!%p4430_p4)
}
  0x2a   :  { %s4434_s12 = scalar_lea.vmem %s26_s23, 1024  ;;  %p4439_p6 = scmp.lt.s32.totalorder %s26_s23, %s26_s23 }
  0x2b   :  { %p4435_p5 = scmp.ne.s32.totalorder %s26_s23, %s4434_s12  ;;  %p4440_p7 = scmp.lt.s32.totalorder %s4434_s12, %s4434_s12 }
  0x2d   :  { %p4441_p8 = por %p4440_p7, %p4439_p6 }
  0x2f   :  { %p4442_p9 = pnand %p4441_p8, %p4435_p5 }
  0x31   :  { %4445 = shalt.err (!%p4442_p9)
}
  0x32   :  { %s4523_s4 = smov 128   ;;  %s4524_s20 = smov 8  }
  0x33   :  { %31 = dma.hbm_to_vmem [thread:$0]  %s5934_s0, 1024, %s26_s23, [#allocation4], %s4523_s4, %s4523_s4, %s4524_s20  }
  0x34   :  { %s4525_s15 = smov [#allocation8]   ;;  %s4526_s17 = smov [#allocation11]  }
  0x35   :  { %s48_s16 = sshll.u32 %s4525_s15, 4  ;;  %s71_s19 = sshll.u32 %s4526_s17, 4  ;;  %s49_s16 = int_to_ptr.vmem [resolvable:$true] %s48_s16  ;;  %s72_s19 = int_to_ptr.vmem [resolvable:$true] %s71_s19 }
  0x36   :  { %s4446_s18 = scalar_lea.hbm %s5936_s2, 128 }
  0x37   :  { %p4447_p10 = scmp.ne.s32.totalorder %s5936_s2, %s4446_s18  ;;  %p4450_p11 = scmp.lt.u32.totalorder %s4446_s18, %s5936_s2 }
  0x39   :  { %p4452_p12 = pnand %p4450_p11, %p4447_p10 }
  0x3b   :  { %4455 = shalt.err (!%p4452_p12)
}
  0x3c   :  { %s4456_s0 = scalar_lea.vmem %s49_s16, 128  ;;  %p4461_p0 = scmp.lt.s32.totalorder %s49_s16, %s49_s16 }
  0x3d   :  { %p4457_p13 = scmp.ne.s32.totalorder %s49_s16, %s4456_s0  ;;  %p4462_p1 = scmp.lt.s32.totalorder %s4456_s0, %s4456_s0 }
  0x3f   :  { %p4463_p2 = por %p4462_p1, %p4461_p0 }
  0x41   :  { %p4464_p3 = pnand %p4463_p2, %p4457_p13 }
  0x43   :  { %4467 = shalt.err (!%p4464_p3)
}
  0x44   :  { %51 = dma.hbm_to_vmem [thread:$0]  %s5936_s2, 128, %s49_s16, [#allocation7]  }
  0x45   :  { %s4468_s30 = scalar_lea.hbm %s5940_s6, 512 }
  0x46   :  { %p4469_p4 = scmp.ne.s32.totalorder %s5940_s6, %s4468_s30  ;;  %p4472_p5 = scmp.lt.u32.totalorder %s4468_s30, %s5940_s6 }
  0x48   :  { %p4474_p6 = pnand %p4472_p5, %p4469_p4 }
  0x4a   :  { %4477 = shalt.err (!%p4474_p6)
}
  0x4b   :  { %s4478_s17 = scalar_lea.vmem %s72_s19, 512  ;;  %p4483_p8 = scmp.lt.s32.totalorder %s72_s19, %s72_s19 }
  0x4c   :  { %p4479_p7 = scmp.ne.s32.totalorder %s72_s19, %s4478_s17  ;;  %p4484_p9 = scmp.lt.s32.totalorder %s4478_s17, %s4478_s17 }
  0x4e   :  { %p4485_p10 = por %p4484_p9, %p4483_p8 }
  0x50   :  { %p4486_p11 = pnand %p4485_p10, %p4479_p7 }
  0x52   :  { %4489 = shalt.err (!%p4486_p11)
}
  0x53   :  { %77 = dma.hbm_to_vmem [thread:$0]  %s5940_s6, 512, %s72_s19, [#allocation10], %s4523_s4, %s4523_s4, %s4524_s20  }
  0x54   :  { %4512 = dma.done.wait [#allocation4], 1024  }
  0x55   :  { %4513 = vsyncadd [#allocation4], 4294966272 }
  0x56   :  { %4514 = dma.done.wait [#allocation7], 256  }
  0x57   :  { %4515 = vsyncadd [#allocation7], 4294967040 }
  0x58   :  { %4516 = dma.done.wait [#allocation10], 640  }
  0x59   :  { %4517 = vsyncadd [#allocation10], 4294966656  ;;  %v5948_v0 = vmov 0.0|0.0   ;;  %vm4528_vm0 = vmmov 0   ;;  %v5946_v1 = vmov 0.0   ;;  %v109_v2 = vld [vmem:[%s5937_s3] sm:$0xff] }
  0x5a   :  { %3872 = vmatprep.subr.bf16.mxu1 %v5948_v0  ;;  %3761 = vmatprep.mubr.msk.f32.mxu1 %vm4528_vm0, %v5946_v1  ;;  %v110_v3 = vld [vmem:[%s5937_s3 + $0x8] sm:$0xff]  ;;  %v244_v4 = vld [vmem:[%s5939_s5] sm:$0xff]  ;;  %vm113_vm1 = vcmask 261120   ;;  %v111_v7 = vld [vmem:[%s5937_s3 + $0x10] sm:$0xff]  ;;  %vm246_vm2 = vcmask 130048   ;;  %vm330_vm3 = vcmask 64512  }
  0x5b   :  { %v3864_v5 = vpack.c.bf16 %v110_v3, %v109_v2  ;;  %v245_v6 = vld [vmem:[%s5939_s5 + $0x8] sm:$0xff]  ;;  %v112_v9 = vld [vmem:[%s5937_s3 + $0x18] sm:$0xff]  ;;  %v328_v14 = vld [vmem:[#allocation8] sm:$0xff]  ;;  %vm638_vm4 = vcmask 1042434   ;;  %vm695_vm5 = vcmask 1041409   ;;  %vm641_vm6 = vcmask 1043459  }
  0x5c   :  { %v3873_v8 = vpack.c.bf16 %v245_v6, %v244_v4  ;;  %v101_v10 = vld [vmem:[#allocation3] sm:$0xff]  ;;  %v3868_v11 = vpack.c.bf16 %v112_v9, %v111_v7  ;;  %v329_v13 = vld [vmem:[#allocation9] sm:$0xff]  ;;  %v102_v15 = vld [vmem:[#allocation3 + $0x8] sm:$0xff]  ;;  %vm644_vm7 = vcmask 1044484   ;;  %vm647_vm8 = vcmask 1045509  }
  0x5d   :  { %3865 = vmatprep.subr.bf16.mxu0 %v3864_v5  ;;  %3745 = vmatprep.mubr.msk.f32.mxu0 %vm113_vm1, %v101_v10  ;;  %v243_v12 = vld [vmem:[#allocation6] sm:$0xff]  ;;  %v103_v16 = vld [vmem:[#allocation3 + $0x10] sm:$0xff]  ;;  %v104_v17 = vld [vmem:[#allocation3 + $0x18] sm:$0xff]  ;;  %vm650_vm9 = vcmask 1046534   ;;  %vm653_vm10 = vcmask 1047559   ;;  %vm662_vm11 = vcmask 261121  }
  0x5e   :  { %3874 = vmatpush3.bf16.msra.mxu1 %v3873_v8  ;;  %3867 = vmatpush3.bf16.msra.mxu0 %v3864_v5  ;;  %v105_v18 = vld [vmem:[#allocation3 + $0x20] sm:$0xff]  ;;  %v106_v19 = vld [vmem:[#allocation3 + $0x28] sm:$0xff]  ;;  %v107_v20 = vld [vmem:[#allocation3 + $0x30] sm:$0xff]  ;;  %vm664_vm12 = vcmask 253952   ;;  %vm1050_vm13 = vcmask 261122   ;;  %vm1052_vm14 = vcmask 254976  }
  0x5f   :  { %3764 = vmatprep.subr.mxu1 %v5946_v1  ;;  %3869 = vmatprep.subr.bf16.mxu0 %v3868_v11  ;;  %v108_v21 = vld [vmem:[#allocation3 + $0x38] sm:$0xff]  ;;  %v3608_v22 = vld [vmem:[%s5942_s8] ss:$0 sm:$0xff]  ;;  %s4531_s8 = smov 32   ;;  %vm1421_vm15 = vcmask 261123  }
  0x60   :  { %v3606_v23 = vld [vmem:[%s5941_s7] ss:$0 sm:$0xff]  ;;  %s4530_s7 = smov 64  }
  0x61   :  { %3762 = vmatmul.mubr.msk.f32.vlgmr.msra.gmra.mrb[0].mxu1 %vm246_vm2, %v243_v12  ;;  %vm1423_vm2 = vcmask 256000  }
  0x62   :  { %3765 = vmatpush3.msra.mxu1 %v329_v13  ;;  %3871 = vmatpush3.bf16.msra.mxu0 %v3868_v11 }
  0x63   :  { %3766 = vmatprep.mubr.msk.f32.mxu1 %vm4528_vm0, %v5946_v1  ;;  %3875 = vmatprep.subr.bf16.mxu0 %v5948_v0 }
  0x64   :  { %3887 = vmatprep.subr.bf16.mxu1 %v5948_v0 }
  0x65   :  { %3767 = vmatmul.mubr.msk.f32.vlgmr.msra.gmra.mrb[2].mxu1 %vm330_vm3, %v328_v14  ;;  %3746 = vmatmul.mubr.msk.f32.vlgmr.msra.gmra.mrb[0].mxu0 %vm113_vm1, %v102_v15  ;;  %vm1792_vm3 = vcmask 261124  }
  0x66   :  { %3748 = vmatprep.mubr.msk.f32.mxu0 %vm113_vm1, %v103_v16  ;;  %3799 = vmatprep.mubr.msk.f32.mxu1 %vm4528_vm0, %v5946_v1 }
  0x69   :  { %3749 = vmatmul.mubr.msk.f32.gmra.mrb[2].mxu0 %vm113_vm1, %v104_v17 }
  0x6a   :  { %3751 = vmatprep.mubr.msk.f32.mxu0 %vm113_vm1, %v105_v18 }
  0x6d   :  { %3752 = vmatmul.mubr.msk.f32.gmra.mrb[4].mxu0 %vm113_vm1, %v106_v19 }
  0x6e   :  { %3754 = vmatprep.mubr.msk.f32.mxu0 %vm113_vm1, %v107_v20 }
  0x71   :  { %3755 = vmatmul.mubr.msk.f32.gmra.mrb[6].mxu0 %vm113_vm1, %v108_v21 }
  0x72   :  { %3777 = vmatprep.mubr.msk.f32.mxu0 %vm4528_vm0, %v5946_v1 }
 0x134   :  { %v316_v24 = vpop.f32.mrb[0].mxu1 }
 0x135   :  { %v4704_v25 = vadd.f32 %v3608_v22, %v316_v24  ;;  %v3763_v26 = vpop.f32.mrb[1].mxu1  ;;  %v327_v27 = vadd.f32 %v3606_v23, %v316_v24 }
 0x137   :  { %v667_v28 = vrot.slane %v4704_v25, 6  ;;  %v4708_v29 = vrot.slane %v4704_v25, 7  ;;  %v4711_v30 = vrot.slane %v4704_v25, 2  ;;  %v4714_v31 = vrot.slane %v4704_v25, 3 }
 0x138   :  { %v400_v32 = vpop.f32.mrb[2].mxu1  ;;  %v4716_v33 = vpop.f32.mrb[0].mxu0  ;;  %v4719_v34 = vrot.slane %v4704_v25, 4  ;;  %v673_v35 = vrot.slane %v4704_v25, 5  ;;  %v4723_v36 = vrot.slane %v4704_v25, 1 }
 0x139   :  { %v4725_v37 = vadd.f32 %v400_v32, %v327_v27  ;;  %v4729_v38 = vadd.f32 %v4716_v33, %v4708_v29  ;;  %v4732_v39 = vadd.f32 %v4716_v33, %v667_v28  ;;  %v4736_v40 = vadd.f32 %v4716_v33, %v4714_v31  ;;  %v3768_v41 = vpop.f32.mrb[3].mxu1  ;;  %v4738_v42 = vpop.f32.mrb[1].mxu0 }
 0x13a   :  { %v4741_v43 = vadd.f32 %v4716_v33, %v673_v35  ;;  %v4745_v44 = vadd.f32 %v4716_v33, %v4719_v34  ;;  %v4749_v45 = vadd.f32 %v4716_v33, %v4711_v30  ;;  %v4752_v46 = vadd.f32 %v667_v28, %v4738_v42 }
 0x13b   :  { %5950 = vst [vmem:[#allocation17_spill] sm:$0xff] %v4736_v40  ;;  %v4755_v47 = vadd.f32 %v673_v35, %v4738_v42  ;;  %v4759_v48 = vadd.f32 %v4719_v34, %v4738_v42  ;;  %v4763_v49 = vadd.f32 %v4714_v31, %v4738_v42  ;;  %v4767_v50 = vadd.f32 %v4711_v30, %v4738_v42 }
 0x13c   :  { %5951 = vst [vmem:[#allocation18_spill] sm:$0xff] %v4749_v45  ;;  %v4771_v51 = vadd.f32 %v4723_v36, %v4738_v42  ;;  %v3750_v52 = vpop.f32.mrb[2].mxu0  ;;  %v416_v53 = vrot.slane %v4725_v37, 2  ;;  %v415_v54 = vrot.slane %v4725_v37, 1  ;;  %v418_v55 = vrot.slane %v4725_v37, 4 }
 0x13d   :  { %5952 = vst [vmem:[#allocation19_spill] sm:$0xff] %v4767_v50  ;;  %v4777_v56 = vadd.f32 %v3750_v52, %v4723_v36  ;;  %v4780_v57 = vadd.f32 %v3750_v52, %v4704_v25  ;;  %v4783_v58 = vadd.f32 %v3750_v52, %v4708_v29  ;;  %v4785_v59 = vadd.f32 %v3750_v52, %v667_v28  ;;  %v214_v60 = vpop.f32.mrb[3].mxu0 }
 0x13e   :  { %5953 = vst [vmem:[#allocation20_spill] sm:$0xff] %v4771_v51  ;;  %v4787_v61 = vadd.f32 %v3750_v52, %v416_v53  ;;  %v4789_v62 = vadd.f32 %v3750_v52, %v673_v35  ;;  %v4792_v63 = vadd.f32 %v3750_v52, %v4719_v34  ;;  %v4794_v2 = vadd.f32 %v415_v54, %v214_v60 }
 0x13f   :  { %v4797_v3 = vadd.f32 %v4704_v25, %v214_v60  ;;  %v4800_v4 = vadd.f32 %v4708_v29, %v214_v60  ;;  %v4802_v5 = vadd.f32 %v667_v28, %v214_v60  ;;  %v4804_v6 = vadd.f32 %v673_v35, %v214_v60 }
 0x140   :  { %5954 = vst [vmem:[#allocation21_spill] sm:$0xff] %v4789_v62  ;;  %5955 = vst [vmem:[#allocation22_spill] sm:$0xff] %v4792_v63  ;;  %v4807_v7 = vadd.f32 %v4719_v34, %v214_v60  ;;  %v3753_v8 = vpop.f32.mrb[4].mxu0  ;;  %v4810_v9 = vadd.f32 %v4714_v31, %v214_v60  ;;  %v417_v18 = vrot.slane %v4725_v37, 3  ;;  %v420_v41 = vrot.slane %v4725_v37, 6 }
 0x141   :  { %v4812_v10 = vadd.f32 %v3753_v8, %v418_v55  ;;  %v4815_v11 = vadd.f32 %v3753_v8, %v4714_v31  ;;  %v224_v12 = vpop.f32.mrb[5].mxu0  ;;  %v4818_v13 = vadd.f32 %v3753_v8, %v4711_v30  ;;  %v4821_v14 = vadd.f32 %v3753_v8, %v4723_v36 }
 0x142   :  { %5956 = vst [vmem:[#allocation23_spill] sm:$0xff] %v4807_v7  ;;  %5957 = vst [vmem:[#allocation24_spill] sm:$0xff] %v4810_v9  ;;  %v4824_v15 = vadd.f32 %v3753_v8, %v4704_v25  ;;  %v4827_v16 = vadd.f32 %v3753_v8, %v4708_v29  ;;  %v4829_v17 = vadd.f32 %v3753_v8, %v667_v28 }
 0x143   :  { %v4833_v19 = vadd.f32 %v4711_v30, %v224_v12  ;;  %v4836_v20 = vadd.f32 %v4723_v36, %v224_v12  ;;  %v4839_v22 = vadd.f32 %v4704_v25, %v224_v12  ;;  %v4842_v23 = vadd.f32 %v4708_v29, %v224_v12 }
 0x144   :  { %5958 = vst [vmem:[#allocation25_spill] sm:$0xff] %v4827_v16  ;;  %5959 = vst [vmem:[#allocation26_spill] sm:$0xff] %v4829_v17  ;;  %v3756_v21 = vpop.f32.mrb[6].mxu0  ;;  %v4844_v24 = vadd.f32 %v667_v28, %v224_v12  ;;  %v433_v27 = vadd.f32 %v417_v18, %v224_v12  ;;  %v4846_v32 = vadd.f32 %v673_v35, %v224_v12  ;;  %v419_v12 = vrot.slane %v4725_v37, 5 }
 0x145   :  { %v234_v26 = vpop.f32.mrb[7].mxu0  ;;  %v4849_v52 = vadd.f32 %v3756_v21, %v673_v35  ;;  %v4852_v53 = vadd.f32 %v3756_v21, %v4719_v34  ;;  %v4855_v54 = vadd.f32 %v3756_v21, %v4714_v31  ;;  %v4858_v55 = vadd.f32 %v3756_v21, %v4711_v30 }
 0x146   :  { %5960 = vst [vmem:[#allocation27_spill] sm:$0xff] %v4844_v24  ;;  %5961 = vst [vmem:[#allocation28_spill] sm:$0xff] %v4846_v32  ;;  %v4861_v28 = vadd.f32 %v3756_v21, %v4723_v36  ;;  %v436_v60 = vadd.f32 %v3756_v21, %v420_v41  ;;  %v4864_v8 = vadd.f32 %v3756_v21, %v4704_v25  ;;  %v414_v32 = vrot.slane %v4725_v37, 7 }
 0x147   :  { %5962 = vst [vmem:[#allocation29_spill] sm:$0xff] %v4858_v55  ;;  %v4868_v35 = vadd.f32 %v4719_v34, %v234_v26  ;;  %v4871_v18 = vadd.f32 %v4714_v31, %v234_v26  ;;  %v4874_v1 = vadd.f32 %v4711_v30, %v234_v26  ;;  %v4877_v0 = vadd.f32 %v4723_v36, %v234_v26 }
 0x148   :  { %5963 = vst [vmem:[#allocation30_spill] sm:$0xff] %v4861_v28  ;;  %5964 = vst [vmem:[#allocation31_spill] sm:$0xff] %v4864_v8  ;;  %v4880_v17 = vadd.f32 %v4704_v25, %v234_v26  ;;  %v435_v41 = vadd.f32 %v419_v12, %v234_v26  ;;  %v4883_v21 = vadd.f32 %v4708_v29, %v234_v26  ;;  %v3612_v12 = vmul.f32 -1.442695, %v4787_v61 }
 0x149   :  { %5965 = vst [vmem:[#allocation32_spill] sm:$0xff] %v4877_v0  ;;  %v430_v34 = vadd.f32 %v4716_v33, %v4725_v37  ;;  %v429_v31 = vadd.f32 %v414_v32, %v4738_v42 }
 0x14a   :  { %5966 = vst [vmem:[#allocation33_spill] sm:$0xff] %v4880_v17  ;;  %5967 = vst [vmem:[#allocation34_spill] sm:$0xff] %v4883_v21 }
 0x14b   :  { %3932 = vtanh.f32 %v430_v34  ;;  %v3610_v32 = vmul.f32 -1.442695, %v430_v34 }
 0x14c   :  { %3934 = vtanh.f32 %v4787_v61 }
 0x14d   :  { %3936 = vtanh.f32 %v4812_v10 }
 0x14e   :  { %3938 = vtanh.f32 %v429_v31 }
 0x14f   :  { %3940 = vtanh.f32 %v4794_v2 }
 0x150   :  { %3942 = vtanh.f32 %v436_v60 }
 0x151   :  { %3944 = vtanh.f32 %v433_v27 }
 0x152   :  { %3946 = vtanh.f32 %v435_v41 }
 0x153   :  { %3948 = vpow2.f32 %v3610_v32 }
 0x154   :  { %3950 = vpow2.f32 %v3612_v12 }
 0x155   :  { %v3933_v25 = vpop.eup %3932 }
 0x156   :  { %511 = vrot.lane.b32.xlu1 %v3933_v25, %s4530_s7  ;;  %v3935_v29 = vpop.eup %3934  ;;  %v3609_v25 = vmul.f32 -1.442695, %v429_v31 }
 0x157   :  { %v3937_v30 = vpop.eup %3936 }
 0x158   :  { %v3939_v33 = vpop.eup %3938  ;;  %3952 = vpow2.f32 %v3609_v25 }
 0x159   :  { %509 = vrot.lane.b32.xlu0 %v3939_v33, %s4530_s7  ;;  %v3941_v36 = vpop.eup %3940 }
 0x15a   :  { %515 = vrot.lane.b32.xlu1 %v3935_v29, %s4530_s7  ;;  %v3943_v37 = vpop.eup %3942  ;;  %v3611_v29 = vmul.f32 -1.442695, %v4794_v2 }
 0x15b   :  { %v3945_v42 = vpop.eup %3944 }
 0x15c   :  { %v3947_v26 = vpop.eup %3946  ;;  %3954 = vpow2.f32 %v3611_v29 }
 0x15d   :  { %513 = vrot.lane.b32.xlu0 %v3941_v36, %s4530_s7  ;;  %v3949_v33 = vpop.eup %3948  ;;  %v3613_v36 = vmul.f32 -1.442695, %v433_v27 }
 0x15e   :  { %519 = vrot.lane.b32.xlu1 %v3937_v30, %s4530_s7  ;;  %v3614_v30 = vmul.f32 -1.442695, %v4812_v10  ;;  %v3951_v21 = vpop.eup %3950 }
 0x15f   :  { %v464_v61 = vadd.f32 1.0, %v3951_v21 }
 0x160   :  { %3956 = vpow2.f32 %v3614_v30 }
 0x161   :  { %517 = vrot.lane.b32.xlu0 %v3945_v42, %s4530_s7  ;;  %v462_v42 = vadd.f32 1.0, %v3949_v33  ;;  %3958 = vpow2.f32 %v3613_v36 }
 0x162   :  { %523 = vrot.lane.b32.xlu1 %v3943_v37, %s4530_s7  ;;  %v3616_v37 = vmul.f32 -1.442695, %v436_v60  ;;  %v3953_v34 = vpop.eup %3952 }
 0x163   :  { %v461_v31 = vadd.f32 1.0, %v3953_v34 }
 0x164   :  { %3960 = vpow2.f32 %v3616_v37 }
 0x165   :  { %521 = vrot.lane.b32.xlu0 %v3947_v26, %s4530_s7  ;;  %v3615_v26 = vmul.f32 -1.442695, %v435_v41  ;;  %3962 = vrcp.f32 %v462_v42 }
 0x166   :  { %v3955_v32 = vpop.eup %3954 }
 0x167   :  { %3964 = vpow2.f32 %v3615_v26  ;;  %v463_v12 = vadd.f32 1.0, %v3955_v32 }
 0x168   :  { %3966 = vrcp.f32 %v464_v61 }
 0x169   :  { %3968 = vrcp.f32 %v461_v31 }
 0x16a   :  { %v3957_v2 = vpop.eup %3956  ;;  %3970 = vrcp.f32 %v463_v12 }
 0x16b   :  { %v3959_v10 = vpop.eup %3958  ;;  %v466_v27 = vadd.f32 1.0, %v3957_v2 }
 0x16c   :  { %v465_v29 = vadd.f32 1.0, %v3959_v10 }
 0x16d   :  { %3972 = vrcp.f32 %v466_v27 }
 0x16e   :  { %v3961_v25 = vpop.eup %3960  ;;  %3974 = vrcp.f32 %v465_v29 }
 0x16f   :  { %v4903_v60 = vpop.eup %3962  ;;  %v468_v21 = vadd.f32 1.0, %v3961_v25 }
 0x171   :  { %v3965_v41 = vpop.eup %3964  ;;  %3976 = vrcp.f32 %v468_v21 }
 0x172   :  { %v4907_v36 = vpop.eup %3966  ;;  %v467_v37 = vadd.f32 1.0, %v3965_v41 }
 0x173   :  { %v4910_v34 = vpop.eup %3968 }
 0x174   :  { %3978 = vrcp.f32 %v467_v37  ;;  %v4915_v32 = vpop.eup %3970 }
 0x177   :  { %v4918_v25 = vpop.eup %3972 }
 0x178   :  { %v4921_v27 = vpop.eup %3974 }
 0x17b   :  { %v4925_v21 = vpop.eup %3976 }
 0x17e   :  { %v4929_v37 = vpop.eup %3978 }
 0x1c8   :  { %v512_v30 = vpop.permute.xlu1 %511 }
 0x1c9   :  { %v534_v33 = vmul.f32 %v4903_v60, %v512_v30 }
 0x1cb   :  { %551 = vrot.lane.b32.xlu0 %v534_v33, %s4531_s8  ;;  %v510_v61 = vpop.permute.xlu0 %509 }
 0x1cc   :  { %v516_v42 = vpop.permute.xlu1 %515  ;;  %v533_v31 = vmul.f32 %v4910_v34, %v510_v61 }
 0x1cd   :  { %v536_v26 = vmul.f32 %v4907_v36, %v516_v42 }
 0x1cf   :  { %555 = vrot.lane.b32.xlu1 %v536_v26, %s4531_s8  ;;  %549 = vrot.lane.b32.xlu0 %v533_v31, %s4531_s8  ;;  %v514_v2 = vpop.permute.xlu0 %513  ;;  %v494_v31 = vmul.f32 0.0, %v4903_v60 }
 0x1d0   :  { %v520_v12 = vpop.permute.xlu1 %519  ;;  %v535_v10 = vmul.f32 %v4915_v32, %v514_v2 }
 0x1d1   :  { %v538_v30 = vmul.f32 %v4918_v25, %v520_v12 }
 0x1d3   :  { %553 = vrot.lane.b32.xlu1 %v535_v10, %s4531_s8  ;;  %v518_v29 = vpop.permute.xlu0 %517  ;;  %v496_v10 = vmul.f32 0.0, %v4907_v36 }
 0x1d4   :  { %v537_v41 = vmul.f32 %v4921_v27, %v518_v29  ;;  %v524_v33 = vpop.permute.xlu1 %523 }
 0x1d5   :  { %v540_v26 = vmul.f32 %v4925_v21, %v524_v33 }
 0x1d6   :  { %557 = vrot.lane.b32.xlu0 %v537_v41, %s4531_s8  ;;  %v493_v41 = vmul.f32 0.0, %v4910_v34 }
 0x1d7   :  { %559 = vrot.lane.b32.xlu1 %v538_v30, %s4531_s8  ;;  %v522_v42 = vpop.permute.xlu0 %521 }
 0x1d8   :  { %v539_v61 = vmul.f32 %v4929_v37, %v522_v42 }
 0x1da   :  { %561 = vrot.lane.b32.xlu0 %v539_v61, %s4531_s8 }
 0x1db   :  { %563 = vrot.lane.b32.xlu1 %v540_v26, %s4531_s8  ;;  %v495_v26 = vmul.f32 0.0, %v4915_v32 }
 0x23d   :  { %v552_v2 = vpop.permute.xlu0 %551 }
 0x23e   :  { %v4936_v12 = vadd.f32 %v552_v2, %v494_v31 }
 0x240   :  { %3980 = vtanh.f32 %v4936_v12 }
 0x241   :  { %v556_v29 = vpop.permute.xlu1 %555  ;;  %v550_v33 = vpop.permute.xlu0 %549 }
 0x242   :  { %v4940_v30 = vadd.f32 %v556_v29, %v496_v10  ;;  %v4944_v42 = vadd.f32 %v550_v33, %v493_v41  ;;  %v497_v10 = vmul.f32 0.0, %v4921_v27  ;;  %v498_v29 = vmul.f32 0.0, %v4918_v25 }
 0x244   :  { %3982 = vtanh.f32 %v4940_v30 }
 0x245   :  { %3984 = vtanh.f32 %v4944_v42  ;;  %v554_v61 = vpop.permute.xlu1 %553 }
 0x246   :  { %v4948_v31 = vadd.f32 %v554_v61, %v495_v26  ;;  %v499_v26 = vmul.f32 0.0, %v4929_v37  ;;  %v500_v61 = vmul.f32 0.0, %v4925_v21 }
 0x248   :  { %3986 = vtanh.f32 %v4948_v31  ;;  %v558_v63 = vpop.permute.xlu0 %557 }
 0x249   :  { %v560_v9 = vpop.permute.xlu1 %559  ;;  %v4954_v41 = vadd.f32 %v558_v63, %v497_v10  ;;  %v691_v10 = vld [vmem:[#allocation11 + $0x8] sm:$0xff] }
 0x24a   :  { %v3981_v2 = vpop.eup %3980  ;;  %v4956_v33 = vadd.f32 %v560_v9, %v498_v29  ;;  %v692_v29 = vld [vmem:[#allocation11 + $0x10] sm:$0xff] }
 0x24b   :  { %599 = vrot.lane.b32.xlu0 %v3981_v2, %s4530_s7  ;;  %3988 = vtanh.f32 %v4954_v41  ;;  %v690_v2 = vld [vmem:[#allocation11] sm:$0xff] }
 0x24c   :  { %3990 = vtanh.f32 %v4956_v33  ;;  %v562_v51 = vpop.permute.xlu0 %561  ;;  %v4971_v24 = vpack.c.bf16 %v691_v10, %v690_v2 }
 0x24d   :  { %v564_v8 = vpop.permute.xlu1 %563  ;;  %v4963_v16 = vadd.f32 %v562_v51, %v499_v26 }
 0x24e   :  { %v3983_v45 = vpop.eup %3982  ;;  %v4965_v63 = vadd.f32 %v564_v8, %v500_v61  ;;  %3877 = vmatpush3.bf16.msra.mxu0 %v4971_v24  ;;  %v5968_v8 = vmov 0.0|0.0   ;;  %3889 = vmatpush3.bf16.msra.mxu1 %v4971_v24 }
 0x24f   :  { %603 = vrot.lane.b32.xlu1 %v3983_v45, %s4530_s7  ;;  %v3985_v28 = vpop.eup %3984  ;;  %3992 = vtanh.f32 %v4963_v16  ;;  %v693_v45 = vld [vmem:[#allocation11 + $0x18] sm:$0xff]  ;;  %3878 = vmatprep.subr.bf16.mxu0 %v5968_v8 }
 0x250   :  { %597 = vrot.lane.b32.xlu0 %v3985_v28, %s4530_s7  ;;  %3994 = vtanh.f32 %v4965_v63  ;;  %v4975_v28 = vpack.c.bf16 %v693_v45, %v692_v29  ;;  %3890 = vmatprep.subr.bf16.mxu1 %v5968_v8 }
 0x252   :  { %v3987_v9 = vpop.eup %3986  ;;  %3880 = vmatpush3.bf16.msra.mxu0 %v4975_v28  ;;  %3892 = vmatpush3.bf16.msra.mxu1 %v4975_v28 }
 0x253   :  { %601 = vrot.lane.b32.xlu1 %v3987_v9, %s4530_s7  ;;  %3881 = vmatprep.subr.bf16.mxu0 %v5968_v8 }
 0x254   :  { %3899 = vmatprep.subr.bf16.mxu1 %v5968_v8 }
 0x255   :  { %v3989_v62 = vpop.eup %3988 }
 0x256   :  { %v3991_v51 = vpop.eup %3990  ;;  %605 = vrot.lane.b32.xlu0 %v3989_v62, %s4530_s7 }
 0x257   :  { %607 = vrot.lane.b32.xlu1 %v3991_v51, %s4530_s7 }
 0x259   :  { %v3993_v26 = vpop.eup %3992 }
 0x25a   :  { %v3995_v61 = vpop.eup %3994  ;;  %609 = vrot.lane.b32.xlu0 %v3993_v26, %s4530_s7 }
 0x25b   :  { %611 = vrot.lane.b32.xlu1 %v3995_v61, %s4530_s7 }
 0x2bd   :  { %v600_v62 = vpop.permute.xlu0 %599 }
 0x2be   :  { %v622_v9 = vmul.f32 %v4903_v60, %v600_v62 }
 0x2c0   :  { %v637_v29 = vrot.slane %v622_v9, 7 }
 0x2c1   :  { %v604_v2 = vpop.permute.xlu1 %603 }
 0x2c2   :  { %v598_v10 = vpop.permute.xlu0 %597  ;;  %v624_v26 = vmul.f32 %v4907_v36, %v604_v2 }
 0x2c3   :  { %v621_v45 = vmul.f32 %v4910_v34, %v598_v10 }
 0x2c4   :  { %v643_v60 = vrot.slane %v624_v26, 5  ;;  %v699_v62 = vrot.slane %v624_v26, 6 }
 0x2c5   :  { %v639_v51 = vsel %vm638_vm4, %v637_v29, %v621_v45  ;;  %v694_v61 = vrot.slane %v621_v45, 1  ;;  %v602_v7 = vpop.permute.xlu1 %601 }
 0x2c6   :  { %v623_v40 = vmul.f32 %v4915_v32, %v602_v7 }
 0x2c7   :  { %v696_v55 = vsel %vm695_vm5, %v622_v9, %v694_v61 }
 0x2c8   :  { %v640_v50 = vrot.slane %v623_v40, 6  ;;  %v697_v17 = vrot.slane %v623_v40, 7  ;;  %v606_v0 = vpop.permute.xlu0 %605 }
 0x2c9   :  { %v625_v36 = vmul.f32 %v4921_v27, %v606_v0  ;;  %v608_v2 = vpop.permute.xlu1 %607 }
 0x2ca   :  { %v642_v34 = vsel %vm641_vm6, %v640_v50, %v639_v51  ;;  %v698_v10 = vsel %vm638_vm4, %v697_v17, %v696_v55  ;;  %v626_v7 = vmul.f32 %v4918_v25, %v608_v2  ;;  %v5969_v2 = vmov 0.0  }
 0x2cb   :  { %v700_v29 = vsel %vm641_vm6, %v699_v62, %v698_v10  ;;  %v645_v40 = vsel %vm644_vm7, %v643_v60, %v642_v34  ;;  %v646_v32 = vrot.slane %v625_v36, 4  ;;  %v701_v45 = vrot.slane %v625_v36, 5 }
 0x2cc   :  { %v649_v26 = vrot.slane %v626_v7, 3  ;;  %v703_v9 = vrot.slane %v626_v7, 4  ;;  %v610_v61 = vpop.permute.xlu0 %609 }
 0x2cd   :  { %v702_v50 = vsel %vm644_vm7, %v701_v45, %v700_v29  ;;  %v627_v17 = vmul.f32 %v4929_v37, %v610_v61  ;;  %v612_v55 = vpop.permute.xlu1 %611  ;;  %v648_v0 = vsel %vm647_vm8, %v646_v32, %v645_v40 }
 0x2ce   :  { %v5003_v27 = vmul.f32 %v4925_v21, %v612_v55  ;;  %v704_v25 = vsel %vm647_vm8, %v703_v9, %v702_v50  ;;  %v651_v51 = vsel %vm650_vm9, %v649_v26, %v648_v0 }
 0x2cf   :  { %v652_v60 = vrot.slane %v627_v17, 2  ;;  %v705_v62 = vrot.slane %v627_v17, 3 }
 0x2d0   :  { %v707_v34 = vrot.slane %v5003_v27, 2 }
 0x2d1   :  { %v706_v10 = vsel %vm650_vm9, %v705_v62, %v704_v25  ;;  %v5010_v36 = vsel %vm653_vm10, %v652_v60, %v651_v51 }
 0x2d2   :  { %v708_v37 = vsel %vm653_vm10, %v707_v34, %v706_v10 }
 0x2d3   :  { %709 = vrot.lane.b32.xlu0 %v708_v37, %s4531_s8 }
 0x345   :  { %v710_v21 = vpop.permute.xlu0 %709 }
 0x346   :  { %3778 = vmatmul.mubr.msk.f32.vlgmr.msra.gmra.mrb[8].mxu0 %vm113_vm1, %v710_v21 }
 0x347   :  { %3883 = vmatpush3.bf16.msra.mxu0 %v4971_v24  ;;  %3788 = vmatprep.mubr.msk.f32.mxu0 %vm4528_vm0, %v5969_v2 }
 0x348   :  { %3884 = vmatprep.subr.bf16.mxu0 %v5968_v8 }
 0x34b   :  { %3886 = vmatpush3.bf16.msra.mxu0 %v4975_v28 }
 0x34c   :  { %3893 = vmatprep.subr.bf16.mxu0 %v5968_v8 }
 0x419   :  { %v779_v29 = vpop.f32.mrb[8].mxu0 }
 0x41a   :  { %v784_v7 = vrot.slane %v779_v29, 6  ;;  %v785_v40 = vrot.slane %v779_v29, 7  ;;  %v786_v32 = vrot.slane %v779_v29, 1  ;;  %v787_v45 = vrot.slane %v779_v29, 2  ;;  %v3779_v26 = vpop.f32.mrb[9].mxu0 }
 0x41b   :  { %v788_v9 = vrot.slane %v779_v29, 3  ;;  %v789_v61 = vrot.slane %v779_v29, 4  ;;  %v790_v50 = vrot.slane %v779_v29, 5  ;;  %v801_v24 = vadd.f32 %v779_v29, %v4797_v3 }
 0x41c   :  { %v799_v17 = vadd.f32 %v784_v7, %v4752_v46  ;;  %v800_v55 = vadd.f32 %v785_v40, %v4729_v38  ;;  %v802_v0 = vadd.f32 %v786_v32, %v4777_v56  ;;  %v803_v28 = vadd.f32 %v787_v45, %v4833_v19 }
 0x41d   :  { %v804_v25 = vadd.f32 %v788_v9, %v4815_v11  ;;  %v805_v51 = vadd.f32 %v789_v61, %v4868_v35  ;;  %v806_v60 = vadd.f32 %v790_v50, %v4849_v52  ;;  %v3620_v34 = vmul.f32 -1.442695, %v801_v24 }
 0x41e   :  { %3996 = vtanh.f32 %v799_v17  ;;  %v3618_v35 = vmul.f32 -1.442695, %v799_v17  ;;  %v3621_v10 = vmul.f32 -1.442695, %v802_v0  ;;  %v3619_v21 = vmul.f32 -1.442695, %v800_v55 }
 0x41f   :  { %3998 = vtanh.f32 %v801_v24  ;;  %v3622_v29 = vmul.f32 -1.442695, %v803_v28  ;;  %v3623_v40 = vmul.f32 -1.442695, %v804_v25  ;;  %v3624_v32 = vmul.f32 -1.442695, %v805_v51 }
 0x420   :  { %4000 = vtanh.f32 %v802_v0  ;;  %v3625_v45 = vmul.f32 -1.442695, %v806_v60 }
 0x421   :  { %4002 = vtanh.f32 %v800_v55 }
 0x422   :  { %4004 = vtanh.f32 %v803_v28 }
 0x423   :  { %4006 = vtanh.f32 %v804_v25 }
 0x424   :  { %4008 = vtanh.f32 %v805_v51 }
 0x425   :  { %4010 = vtanh.f32 %v806_v60 }
 0x426   :  { %4012 = vpow2.f32 %v3618_v35 }
 0x427   :  { %4014 = vpow2.f32 %v3620_v34 }
 0x428   :  { %v3997_v62 = vpop.eup %3996  ;;  %4016 = vpow2.f32 %v3621_v10 }
 0x429   :  { %903 = vrot.lane.b32.xlu1 %v3997_v62, %s4530_s7  ;;  %v3999_v38 = vpop.eup %3998  ;;  %4018 = vpow2.f32 %v3619_v21 }
 0x42a   :  { %v4001_v46 = vpop.eup %4000  ;;  %907 = vrot.lane.b32.xlu0 %v3999_v38, %s4530_s7  ;;  %4020 = vpow2.f32 %v3622_v29 }
 0x42b   :  { %v4003_v56 = vpop.eup %4002 }
 0x42c   :  { %v4005_v3 = vpop.eup %4004 }
 0x42d   :  { %909 = vrot.lane.b32.xlu1 %v4001_v46, %s4530_s7  ;;  %v4007_v11 = vpop.eup %4006 }
 0x42e   :  { %905 = vrot.lane.b32.xlu0 %v4003_v56, %s4530_s7  ;;  %v4009_v19 = vpop.eup %4008 }
 0x42f   :  { %v4011_v52 = vpop.eup %4010 }
 0x430   :  { %v4013_v37 = vpop.eup %4012 }
 0x431   :  { %911 = vrot.lane.b32.xlu1 %v4005_v3, %s4530_s7  ;;  %v831_v7 = vadd.f32 1.0, %v4013_v37  ;;  %v4015_v26 = vpop.eup %4014 }
 0x432   :  { %913 = vrot.lane.b32.xlu0 %v4007_v11, %s4530_s7  ;;  %v4017_v9 = vpop.eup %4016  ;;  %v833_v61 = vadd.f32 1.0, %v4015_v26 }
 0x433   :  { %4022 = vrcp.f32 %v831_v7  ;;  %v4019_v50 = vpop.eup %4018  ;;  %v834_v24 = vadd.f32 1.0, %v4017_v9 }
 0x434   :  { %4024 = vpow2.f32 %v3623_v40  ;;  %v4021_v17 = vpop.eup %4020  ;;  %v832_v28 = vadd.f32 1.0, %v4019_v50 }
 0x435   :  { %915 = vrot.lane.b32.xlu1 %v4009_v19, %s4530_s7  ;;  %4026 = vpow2.f32 %v3624_v32  ;;  %v835_v51 = vadd.f32 1.0, %v4021_v17 }
 0x436   :  { %917 = vrot.lane.b32.xlu0 %v4011_v52, %s4530_s7  ;;  %4028 = vpow2.f32 %v3625_v45 }
 0x437   :  { %4030 = vrcp.f32 %v833_v61 }
 0x438   :  { %4032 = vrcp.f32 %v834_v24 }
 0x439   :  { %4034 = vrcp.f32 %v832_v28 }
 0x43a   :  { %4036 = vrcp.f32 %v835_v51 }
 0x43d   :  { %v5037_v55 = vpop.eup %4022 }
 0x43e   :  { %v4025_v62 = vpop.eup %4024 }
 0x43f   :  { %v4027_v38 = vpop.eup %4026  ;;  %v836_v60 = vadd.f32 1.0, %v4025_v62  ;;  %v871_v62 = vrot.slane %v4944_v42, 7 }
 0x440   :  { %v4029_v46 = vpop.eup %4028  ;;  %v837_v56 = vadd.f32 1.0, %v4027_v38 }
 0x441   :  { %4038 = vrcp.f32 %v836_v60  ;;  %v838_v3 = vadd.f32 1.0, %v4029_v46  ;;  %v5041_v11 = vpop.eup %4030  ;;  %v873_v60 = vrot.slane %v4948_v31, 7  ;;  %v874_v46 = vrot.slane %v4940_v30, 7 }
 0x442   :  { %4040 = vrcp.f32 %v837_v56  ;;  %v5043_v52 = vpop.eup %4032 }
 0x443   :  { %4042 = vrcp.f32 %v838_v3  ;;  %v5048_v37 = vpop.eup %4034  ;;  %v889_v56 = vmul.f32 %v5041_v11, %v873_v60 }
 0x444   :  { %v5051_v29 = vpop.eup %4036 }
 0x44b   :  { %v5056_v45 = vpop.eup %4038 }
 0x44c   :  { %v5059_v9 = vpop.eup %4040 }
 0x44d   :  { %v5064_v17 = vpop.eup %4042 }
 0x49b   :  { %v904_v0 = vpop.permute.xlu1 %903 }
 0x49c   :  { %v927_v25 = vmul.f32 %v5037_v55, %v904_v0  ;;  %v908_v19 = vpop.permute.xlu0 %907 }
 0x49d   :  { %v929_v35 = vmul.f32 %v5041_v11, %v908_v19  ;;  %v890_v19 = vmul.f32 %v5043_v52, %v874_v46 }
 0x49e   :  { %943 = vrot.lane.b32.xlu1 %v927_v25, %s4531_s8  ;;  %v887_v25 = vmul.f32 %v5037_v55, %v871_v62 }
 0x49f   :  { %v910_v34 = vpop.permute.xlu1 %909  ;;  %947 = vrot.lane.b32.xlu0 %v929_v35, %s4531_s8  ;;  %v872_v35 = vrot.slane %v4936_v12, 7  ;;  %v876_v12 = vrot.slane %v4956_v33, 7 }
 0x4a0   :  { %v930_v10 = vmul.f32 %v5043_v52, %v910_v34  ;;  %v906_v21 = vpop.permute.xlu0 %905 }
 0x4a1   :  { %v928_v7 = vmul.f32 %v5048_v37, %v906_v21  ;;  %v888_v31 = vmul.f32 %v5048_v37, %v872_v35 }
 0x4a2   :  { %949 = vrot.lane.b32.xlu1 %v930_v10, %s4531_s8  ;;  %v875_v10 = vrot.slane %v4954_v41, 7  ;;  %v877_v41 = vrot.slane %v4963_v16, 7 }
 0x4a3   :  { %v912_v40 = vpop.permute.xlu1 %911  ;;  %945 = vrot.lane.b32.xlu0 %v928_v7, %s4531_s8 }
 0x4a4   :  { %v931_v32 = vmul.f32 %v5051_v29, %v912_v40  ;;  %v914_v26 = vpop.permute.xlu0 %913  ;;  %v891_v40 = vmul.f32 %v5051_v29, %v875_v10 }
 0x4a5   :  { %v932_v61 = vmul.f32 %v5056_v45, %v914_v26 }
 0x4a6   :  { %951 = vrot.lane.b32.xlu1 %v931_v32, %s4531_s8 }
 0x4a7   :  { %v916_v50 = vpop.permute.xlu1 %915  ;;  %953 = vrot.lane.b32.xlu0 %v932_v61, %s4531_s8 }
 0x4a8   :  { %v933_v24 = vmul.f32 %v5059_v9, %v916_v50  ;;  %v918_v0 = vpop.permute.xlu0 %917  ;;  %v892_v50 = vmul.f32 %v5056_v45, %v876_v12 }
 0x4a9   :  { %v934_v28 = vmul.f32 %v5064_v17, %v918_v0  ;;  %v893_v0 = vmul.f32 %v5059_v9, %v877_v41 }
 0x4aa   :  { %955 = vrot.lane.b32.xlu1 %v933_v24, %s4531_s8 }
 0x4ab   :  { %957 = vrot.lane.b32.xlu0 %v934_v28, %s4531_s8  ;;  %v878_v28 = vrot.slane %v4965_v63, 7 }
 0x4ad   :  { %v894_v16 = vmul.f32 %v5064_v17, %v878_v28 }
 0x510   :  { %v944_v51 = vpop.permute.xlu1 %943 }
 0x511   :  { %v5071_v38 = vadd.f32 %v944_v51, %v887_v25  ;;  %v948_v3 = vpop.permute.xlu0 %947 }
 0x512   :  { %v5079_v34 = vadd.f32 %v948_v3, %v889_v56 }
 0x513   :  { %4044 = vtanh.f32 %v5071_v38 }
 0x514   :  { %v950_v42 = vpop.permute.xlu1 %949  ;;  %4046 = vtanh.f32 %v5079_v34 }
 0x515   :  { %v5082_v21 = vadd.f32 %v950_v42, %v890_v19  ;;  %v946_v30 = vpop.permute.xlu0 %945 }
 0x516   :  { %v5090_v32 = vadd.f32 %v946_v30, %v888_v31 }
 0x517   :  { %4048 = vtanh.f32 %v5082_v21 }
 0x518   :  { %v952_v26 = vpop.permute.xlu1 %951  ;;  %4050 = vtanh.f32 %v5090_v32 }
 0x519   :  { %v5093_v61 = vadd.f32 %v952_v26, %v891_v40  ;;  %v954_v24 = vpop.permute.xlu0 %953 }
 0x51a   :  { %v5100_v62 = vadd.f32 %v954_v24, %v892_v50 }
 0x51b   :  { %4052 = vtanh.f32 %v5093_v61 }
 0x51c   :  { %v956_v33 = vpop.permute.xlu1 %955  ;;  %4054 = vtanh.f32 %v5100_v62 }
 0x51d   :  { %v4045_v7 = vpop.eup %4044  ;;  %v5102_v25 = vadd.f32 %v956_v33, %v893_v0  ;;  %v958_v51 = vpop.permute.xlu0 %957 }
 0x51e   :  { %991 = vrot.lane.b32.xlu1 %v4045_v7, %s4530_s7  ;;  %v4047_v60 = vpop.eup %4046  ;;  %v5107_v46 = vadd.f32 %v958_v51, %v894_v16 }
 0x51f   :  { %4056 = vtanh.f32 %v5102_v25  ;;  %995 = vrot.lane.b32.xlu0 %v4047_v60, %s4530_s7 }
 0x520   :  { %4058 = vtanh.f32 %v5107_v46 }
 0x521   :  { %v4049_v56 = vpop.eup %4048 }
 0x522   :  { %997 = vrot.lane.b32.xlu1 %v4049_v56, %s4530_s7  ;;  %v4051_v63 = vpop.eup %4050 }
 0x523   :  { %993 = vrot.lane.b32.xlu0 %v4051_v63, %s4530_s7 }
 0x525   :  { %v4053_v3 = vpop.eup %4052 }
 0x526   :  { %999 = vrot.lane.b32.xlu1 %v4053_v3, %s4530_s7  ;;  %v4055_v19 = vpop.eup %4054 }
 0x527   :  { %1001 = vrot.lane.b32.xlu0 %v4055_v19, %s4530_s7 }
 0x529   :  { %v4057_v35 = vpop.eup %4056 }
 0x52a   :  { %1003 = vrot.lane.b32.xlu1 %v4057_v35, %s4530_s7  ;;  %v4059_v42 = vpop.eup %4058 }
 0x52b   :  { %1005 = vrot.lane.b32.xlu0 %v4059_v42, %s4530_s7 }
 0x590   :  { %v992_v10 = vpop.permute.xlu1 %991 }
 0x591   :  { %v996_v7 = vpop.permute.xlu0 %995  ;;  %v1015_v30 = vmul.f32 %v5037_v55, %v992_v10 }
 0x592   :  { %v1017_v12 = vmul.f32 %v5041_v11, %v996_v7 }
 0x593   :  { %v1066_v24 = vrot.slane %v1015_v30, 2 }
 0x594   :  { %v998_v31 = vpop.permute.xlu1 %997  ;;  %v1033_v60 = vrot.slane %v1017_v12, 6 }
 0x595   :  { %v1018_v40 = vmul.f32 %v5043_v52, %v998_v31  ;;  %v994_v26 = vpop.permute.xlu0 %993 }
 0x596   :  { %v1016_v41 = vmul.f32 %v5048_v37, %v994_v26 }
 0x597   :  { %v1035_v16 = vrot.slane %v1018_v40, 5  ;;  %v1070_v51 = vrot.slane %v1018_v40, 7 }
 0x598   :  { %v1000_v50 = vpop.permute.xlu1 %999  ;;  %v1031_v28 = vrot.slane %v1016_v41, 7  ;;  %v1067_v33 = vrot.slane %v1016_v41, 1 }
 0x599   :  { %v1019_v0 = vmul.f32 %v5051_v29, %v1000_v50  ;;  %v1002_v56 = vpop.permute.xlu0 %1001 }
 0x59a   :  { %v1032_v55 = vsel %vm641_vm6, %v1031_v28, %v1015_v30  ;;  %v1068_v52 = vsel %vm695_vm5, %v1067_v33, %v1066_v24  ;;  %v1020_v11 = vmul.f32 %v5056_v45, %v1002_v56 }
 0x59b   :  { %v1037_v63 = vrot.slane %v1019_v0, 4  ;;  %v1072_v3 = vrot.slane %v1019_v0, 6  ;;  %v1069_v37 = vsel %vm638_vm4, %v1017_v12, %v1068_v52  ;;  %v1034_v29 = vsel %vm644_vm7, %v1033_v60, %v1032_v55 }
 0x59c   :  { %v1004_v19 = vpop.permute.xlu1 %1003  ;;  %v1071_v42 = vsel %vm641_vm6, %v1070_v51, %v1069_v37  ;;  %v1039_v10 = vrot.slane %v1020_v11, 3  ;;  %v1074_v7 = vrot.slane %v1020_v11, 5  ;;  %v1036_v31 = vsel %vm647_vm8, %v1035_v16, %v1034_v29 }
 0x59d   :  { %v1021_v35 = vmul.f32 %v5059_v9, %v1004_v19  ;;  %v1073_v40 = vsel %vm644_vm7, %v1072_v3, %v1071_v42  ;;  %v1006_v30 = vpop.permute.xlu0 %1005  ;;  %v1038_v41 = vsel %vm650_vm9, %v1037_v63, %v1036_v31 }
 0x59e   :  { %v1022_v45 = vmul.f32 %v5064_v17, %v1006_v30  ;;  %v1075_v12 = vsel %vm647_vm8, %v1074_v7, %v1073_v40  ;;  %v5135_v9 = vsel %vm653_vm10, %v1039_v10, %v1038_v41 }
 0x59f   :  { %v1076_v26 = vrot.slane %v1021_v35, 4  ;;  %v1041_v50 = vrot.slane %v1021_v35, 2 }
 0x5a0   :  { %v1042_v0 = vrot.slane %v1022_v45, 1  ;;  %v1078_v28 = vrot.slane %v1022_v45, 3 }
 0x5a1   :  { %v1077_v24 = vsel %vm650_vm9, %v1076_v26, %v1075_v12 }
 0x5a2   :  { %v1079_v33 = vsel %vm653_vm10, %v1078_v28, %v1077_v24  ;;  %v5140_v16 = vsel %vm695_vm5, %v1042_v0, %v1041_v50 }
 0x5a3   :  { %1080 = vrot.lane.b32.xlu1 %v1079_v33, %s4531_s8 }
 0x615   :  { %v1081_v51 = vpop.permute.xlu1 %1080 }
 0x616   :  { %3789 = vmatmul.mubr.msk.f32.vlgmr.msra.gmra.mrb[10].mxu0 %vm113_vm1, %v1081_v51 }
 0x617   :  { %3810 = vmatprep.mubr.msk.f32.mxu0 %vm4528_vm0, %v5969_v2 }
 0x6e9   :  { %v1150_v17 = vpop.f32.mrb[10].mxu0 }
 0x6ea   :  { %v1155_v60 = vrot.slane %v1150_v17, 5  ;;  %v1156_v56 = vrot.slane %v1150_v17, 6  ;;  %v1157_v63 = vrot.slane %v1150_v17, 7  ;;  %v1158_v3 = vrot.slane %v1150_v17, 1  ;;  %v3790_v55 = vpop.f32.mrb[11].mxu0 }
 0x6eb   :  { %v1159_v52 = vrot.slane %v1150_v17, 2  ;;  %v1160_v11 = vrot.slane %v1150_v17, 3  ;;  %v1161_v19 = vrot.slane %v1150_v17, 4  ;;  %v1173_v37 = vadd.f32 %v1150_v17, %v4780_v57 }
 0x6ec   :  { %v1170_v35 = vadd.f32 %v1155_v60, %v4755_v47  ;;  %v1171_v29 = vadd.f32 %v1156_v56, %v4732_v39  ;;  %v1172_v42 = vadd.f32 %v1157_v63, %v4800_v4  ;;  %v1174_v10 = vadd.f32 %v1158_v3, %v4836_v20 }
 0x6ed   :  { %v1175_v7 = vadd.f32 %v1159_v52, %v4818_v13  ;;  %v1176_v31 = vadd.f32 %v1160_v11, %v4871_v18  ;;  %v1177_v40 = vadd.f32 %v1161_v19, %v4852_v53  ;;  %v3630_v26 = vmul.f32 -1.442695, %v1173_v37 }
 0x6ee   :  { %4060 = vtanh.f32 %v1171_v29  ;;  %v3628_v30 = vmul.f32 -1.442695, %v1171_v29  ;;  %v3631_v41 = vmul.f32 -1.442695, %v1174_v10  ;;  %v3627_v45 = vmul.f32 -1.442695, %v1170_v35 }
 0x6ef   :  { %4062 = vtanh.f32 %v1173_v37  ;;  %v3632_v50 = vmul.f32 -1.442695, %v1175_v7  ;;  %v3629_v12 = vmul.f32 -1.442695, %v1172_v42  ;;  %v3634_v24 = vmul.f32 -1.442695, %v1177_v40 }
 0x6f0   :  { %4064 = vtanh.f32 %v1174_v10  ;;  %v3633_v28 = vmul.f32 -1.442695, %v1176_v31 }
 0x6f1   :  { %4066 = vtanh.f32 %v1170_v35 }
 0x6f2   :  { %4068 = vtanh.f32 %v1175_v7 }
 0x6f3   :  { %4070 = vtanh.f32 %v1172_v42 }
 0x6f4   :  { %4072 = vtanh.f32 %v1177_v40 }
 0x6f5   :  { %4074 = vtanh.f32 %v1176_v31 }
 0x6f6   :  { %4076 = vpow2.f32 %v3628_v30 }
 0x6f7   :  { %4078 = vpow2.f32 %v3630_v26 }
 0x6f8   :  { %v4061_v57 = vpop.eup %4060  ;;  %4080 = vpow2.f32 %v3631_v41 }
 0x6f9   :  { %1276 = vrot.lane.b32.xlu1 %v4061_v57, %s4530_s7  ;;  %v4063_v39 = vpop.eup %4062  ;;  %4082 = vpow2.f32 %v3627_v45 }
 0x6fa   :  { %1280 = vrot.lane.b32.xlu0 %v4063_v39, %s4530_s7  ;;  %v4065_v47 = vpop.eup %4064  ;;  %4084 = vpow2.f32 %v3632_v50 }
 0x6fb   :  { %v4067_v4 = vpop.eup %4066  ;;  %4086 = vpow2.f32 %v3629_v12 }
 0x6fc   :  { %v4069_v13 = vpop.eup %4068  ;;  %4088 = vpow2.f32 %v3634_v24 }
 0x6fd   :  { %1282 = vrot.lane.b32.xlu1 %v4065_v47, %s4530_s7  ;;  %v4071_v20 = vpop.eup %4070  ;;  %4090 = vpow2.f32 %v3633_v28 }
 0x6fe   :  { %1274 = vrot.lane.b32.xlu0 %v4067_v4, %s4530_s7  ;;  %v4073_v53 = vpop.eup %4072 }
 0x6ff   :  { %v4075_v18 = vpop.eup %4074 }
 0x700   :  { %v4077_v0 = vpop.eup %4076 }
 0x701   :  { %1284 = vrot.lane.b32.xlu1 %v4069_v13, %s4530_s7  ;;  %v4079_v33 = vpop.eup %4078  ;;  %v1203_v51 = vadd.f32 1.0, %v4077_v0 }
 0x702   :  { %1278 = vrot.lane.b32.xlu0 %v4071_v20, %s4530_s7  ;;  %v4081_v17 = vpop.eup %4080  ;;  %v1205_v60 = vadd.f32 1.0, %v4079_v33 }
 0x703   :  { %v4083_v56 = vpop.eup %4082  ;;  %4092 = vrcp.f32 %v1203_v51  ;;  %v1206_v63 = vadd.f32 1.0, %v4081_v17 }
 0x704   :  { %v4085_v3 = vpop.eup %4084  ;;  %4094 = vrcp.f32 %v1205_v60  ;;  %v1202_v55 = vadd.f32 1.0, %v4083_v56  ;;  %v1243_v60 = vrot.slane %v5090_v32, 7  ;;  %v1245_v56 = vrot.slane %v5082_v21, 7 }
 0x705   :  { %1288 = vrot.lane.b32.xlu1 %v4073_v53, %s4530_s7  ;;  %v4087_v52 = vpop.eup %4086  ;;  %4096 = vrcp.f32 %v1206_v63  ;;  %v1207_v11 = vadd.f32 1.0, %v4085_v3  ;;  %v1247_v21 = vrot.slane %v5100_v62, 7 }
 0x706   :  { %1286 = vrot.lane.b32.xlu0 %v4075_v18, %s4530_s7  ;;  %v4089_v19 = vpop.eup %4088  ;;  %4098 = vrcp.f32 %v1202_v55  ;;  %v1204_v37 = vadd.f32 1.0, %v4087_v52  ;;  %v1246_v55 = vrot.slane %v5093_v61, 7 }
 0x707   :  { %v4091_v35 = vpop.eup %4090  ;;  %4100 = vrcp.f32 %v1207_v11  ;;  %v1209_v29 = vadd.f32 1.0, %v4089_v19 }
 0x708   :  { %4102 = vrcp.f32 %v1204_v37  ;;  %v1208_v7 = vadd.f32 1.0, %v4091_v35  ;;  %v1242_v37 = vrot.slane %v5071_v38, 7 }
 0x709   :  { %4104 = vrcp.f32 %v1209_v29 }
 0x70a   :  { %4106 = vrcp.f32 %v1208_v7 }
 0x70d   :  { %v5162_v42 = vpop.eup %4092 }
 0x70e   :  { %v5165_v40 = vpop.eup %4094  ;;  %v1259_v63 = vmul.f32 %v5162_v42, %v1243_v60 }
 0x70f   :  { %v5169_v47 = vpop.eup %4096  ;;  %v1261_v52 = vmul.f32 %v5165_v40, %v1245_v56 }
 0x710   :  { %v5173_v20 = vpop.eup %4098  ;;  %v1262_v32 = vmul.f32 %v5169_v47, %v1246_v55 }
 0x711   :  { %v5177_v30 = vpop.eup %4100  ;;  %v1258_v61 = vmul.f32 %v5173_v20, %v1242_v37 }
 0x712   :  { %v5181_v45 = vpop.eup %4102  ;;  %v1263_v38 = vmul.f32 %v5177_v30, %v1247_v21 }
 0x713   :  { %v5185_v24 = vpop.eup %4104 }
 0x714   :  { %v5189_v33 = vpop.eup %4106 }
 0x76b   :  { %v1277_v10 = vpop.permute.xlu1 %1276 }
 0x76c   :  { %v1299_v31 = vmul.f32 %v5162_v42, %v1277_v10  ;;  %v1281_v57 = vpop.permute.xlu0 %1280 }
 0x76d   :  { %v1301_v39 = vmul.f32 %v5165_v40, %v1281_v57 }
 0x76e   :  { %1316 = vrot.lane.b32.xlu1 %v1299_v31, %s4531_s8  ;;  %v1244_v31 = vrot.slane %v5079_v34, 7 }
 0x76f   :  { %v1283_v4 = vpop.permute.xlu1 %1282  ;;  %1320 = vrot.lane.b32.xlu0 %v1301_v39, %s4531_s8 }
 0x770   :  { %v1302_v13 = vmul.f32 %v5169_v47, %v1283_v4  ;;  %v1275_v53 = vpop.permute.xlu0 %1274  ;;  %v1249_v4 = vrot.slane %v5107_v46, 7  ;;  %v1260_v62 = vmul.f32 %v5181_v45, %v1244_v31 }
 0x771   :  { %v1298_v18 = vmul.f32 %v5173_v20, %v1275_v53 }
 0x772   :  { %1322 = vrot.lane.b32.xlu1 %v1302_v13, %s4531_s8  ;;  %v1265_v34 = vmul.f32 %v5185_v24, %v1249_v4 }
 0x773   :  { %v1285_v26 = vpop.permute.xlu1 %1284  ;;  %1314 = vrot.lane.b32.xlu0 %v1298_v18, %s4531_s8  ;;  %v1248_v18 = vrot.slane %v5102_v25, 7 }
 0x774   :  { %v1303_v41 = vmul.f32 %v5177_v30, %v1285_v26  ;;  %v1279_v50 = vpop.permute.xlu0 %1278 }
 0x775   :  { %v1300_v12 = vmul.f32 %v5181_v45, %v1279_v50  ;;  %v1264_v46 = vmul.f32 %v5189_v33, %v1248_v18 }
 0x776   :  { %1324 = vrot.lane.b32.xlu1 %v1303_v41, %s4531_s8 }
 0x777   :  { %v1289_v0 = vpop.permute.xlu1 %1288  ;;  %1318 = vrot.lane.b32.xlu0 %v1300_v12, %s4531_s8 }
 0x778   :  { %v1305_v28 = vmul.f32 %v5185_v24, %v1289_v0  ;;  %v1287_v51 = vpop.permute.xlu0 %1286 }
 0x779   :  { %v1304_v17 = vmul.f32 %v5189_v33, %v1287_v51 }
 0x77a   :  { %1328 = vrot.lane.b32.xlu1 %v1305_v28, %s4531_s8 }
 0x77b   :  { %1326 = vrot.lane.b32.xlu0 %v1304_v17, %s4531_s8 }
 0x7e0   :  { %v1317_v3 = vpop.permute.xlu1 %1316 }
 0x7e1   :  { %v5199_v11 = vadd.f32 %v1317_v3, %v1259_v63  ;;  %v1321_v19 = vpop.permute.xlu0 %1320 }
 0x7e2   :  { %v5202_v35 = vadd.f32 %v1321_v19, %v1261_v52 }
 0x7e3   :  { %4108 = vtanh.f32 %v5199_v11 }
 0x7e4   :  { %v1323_v29 = vpop.permute.xlu1 %1322  ;;  %4110 = vtanh.f32 %v5202_v35 }
 0x7e5   :  { %v5209_v10 = vadd.f32 %v1323_v29, %v1262_v32  ;;  %v1315_v7 = vpop.permute.xlu0 %1314 }
 0x7e6   :  { %v5212_v57 = vadd.f32 %v1315_v7, %v1258_v61 }
 0x7e7   :  { %4112 = vtanh.f32 %v5209_v10 }
 0x7e8   :  { %v1325_v39 = vpop.permute.xlu1 %1324  ;;  %4114 = vtanh.f32 %v5212_v57 }
 0x7e9   :  { %v5219_v13 = vadd.f32 %v1325_v39, %v1263_v38  ;;  %v1319_v53 = vpop.permute.xlu0 %1318 }
 0x7ea   :  { %v5222_v26 = vadd.f32 %v1319_v53, %v1260_v62 }
 0x7eb   :  { %4116 = vtanh.f32 %v5219_v13 }
 0x7ec   :  { %v1329_v41 = vpop.permute.xlu1 %1328  ;;  %4118 = vtanh.f32 %v5222_v26 }
 0x7ed   :  { %v4109_v50 = vpop.eup %4108  ;;  %v5228_v12 = vadd.f32 %v1329_v41, %v1265_v34  ;;  %v1327_v0 = vpop.permute.xlu0 %1326 }
 0x7ee   :  { %1364 = vrot.lane.b32.xlu1 %v4109_v50, %s4530_s7  ;;  %v4111_v28 = vpop.eup %4110  ;;  %v5231_v51 = vadd.f32 %v1327_v0, %v1264_v46 }
 0x7ef   :  { %4120 = vtanh.f32 %v5228_v12  ;;  %1368 = vrot.lane.b32.xlu0 %v4111_v28, %s4530_s7 }
 0x7f0   :  { %4122 = vtanh.f32 %v5231_v51 }
 0x7f1   :  { %v4113_v25 = vpop.eup %4112 }
 0x7f2   :  { %1370 = vrot.lane.b32.xlu1 %v4113_v25, %s4530_s7  ;;  %v4115_v17 = vpop.eup %4114 }
 0x7f3   :  { %1362 = vrot.lane.b32.xlu0 %v4115_v17, %s4530_s7 }
 0x7f5   :  { %v4117_v60 = vpop.eup %4116 }
 0x7f6   :  { %1372 = vrot.lane.b32.xlu1 %v4117_v60, %s4530_s7  ;;  %v4119_v56 = vpop.eup %4118 }
 0x7f7   :  { %1366 = vrot.lane.b32.xlu0 %v4119_v56, %s4530_s7 }
 0x7f9   :  { %v4121_v63 = vpop.eup %4120 }
 0x7fa   :  { %1376 = vrot.lane.b32.xlu1 %v4121_v63, %s4530_s7  ;;  %v4123_v3 = vpop.eup %4122 }
 0x7fb   :  { %1374 = vrot.lane.b32.xlu0 %v4123_v3, %s4530_s7 }
 0x860   :  { %v1365_v55 = vpop.permute.xlu1 %1364 }
 0x861   :  { %v1387_v52 = vmul.f32 %v5162_v42, %v1365_v55  ;;  %v1369_v19 = vpop.permute.xlu0 %1368 }
 0x862   :  { %v1389_v31 = vmul.f32 %v5165_v40, %v1369_v19 }
 0x863   :  { %v1402_v32 = vrot.slane %v1387_v52, 7  ;;  %v1438_v42 = vrot.slane %v1387_v52, 2 }
 0x864   :  { %v1371_v37 = vpop.permute.xlu1 %1370 }
 0x865   :  { %v1363_v29 = vpop.permute.xlu0 %1362  ;;  %v1390_v39 = vmul.f32 %v5169_v47, %v1371_v37 }
 0x866   :  { %v1386_v21 = vmul.f32 %v5173_v20, %v1363_v29  ;;  %v1406_v20 = vrot.slane %v1389_v31, 5 }
 0x867   :  { %v1408_v0 = vrot.slane %v1390_v39, 4  ;;  %v1443_v25 = vrot.slane %v1390_v39, 7 }
 0x868   :  { %v1373_v61 = vpop.permute.xlu1 %1372  ;;  %v1403_v7 = vsel %vm644_vm7, %v1402_v32, %v1386_v21  ;;  %v1437_v38 = vrot.slane %v1386_v21, 3 }
 0x869   :  { %v1367_v4 = vpop.permute.xlu0 %1366  ;;  %v1391_v62 = vmul.f32 %v5177_v30, %v1373_v61 }
 0x86a   :  { %v1388_v53 = vmul.f32 %v5181_v45, %v1367_v4  ;;  %v1439_v46 = vsel %vm695_vm5, %v1438_v42, %v1437_v38 }
 0x86b   :  { %v1445_v28 = vrot.slane %v1391_v62, 6  ;;  %v1410_v17 = vrot.slane %v1391_v62, 3 }
 0x86c   :  { %v1377_v18 = vpop.permute.xlu1 %1376  ;;  %v1404_v34 = vrot.slane %v1388_v53, 6  ;;  %v1440_v41 = vrot.slane %v1388_v53, 1 }
 0x86d   :  { %v1393_v50 = vmul.f32 %v5185_v24, %v1377_v18  ;;  %v1375_v40 = vpop.permute.xlu0 %1374 }
 0x86e   :  { %v1441_v47 = vsel %vm638_vm4, %v1440_v41, %v1439_v46  ;;  %v1392_v30 = vmul.f32 %v5189_v33, %v1375_v40  ;;  %v1405_v63 = vsel %vm647_vm8, %v1404_v34, %v1403_v7 }
 0x86f   :  { %v1442_v45 = vsel %vm641_vm6, %v1389_v31, %v1441_v47  ;;  %v1413_v60 = vrot.slane %v1393_v50, 1  ;;  %v1449_v56 = vrot.slane %v1393_v50, 4  ;;  %v1407_v52 = vsel %vm650_vm9, %v1406_v20, %v1405_v63 }
 0x870   :  { %v1411_v3 = vrot.slane %v1392_v30, 2  ;;  %v1447_v24 = vrot.slane %v1392_v30, 5  ;;  %v1444_v55 = vsel %vm644_vm7, %v1443_v25, %v1442_v45  ;;  %v5259_v37 = vsel %vm653_vm10, %v1408_v0, %v1407_v52 }
 0x871   :  { %v1446_v19 = vsel %vm647_vm8, %v1445_v28, %v1444_v55 }
 0x872   :  { %v1448_v32 = vsel %vm650_vm9, %v1447_v24, %v1446_v19  ;;  %v1412_v33 = vsel %vm695_vm5, %v1411_v3, %v1410_v17 }
 0x873   :  { %v1450_v29 = vsel %vm653_vm10, %v1449_v56, %v1448_v32  ;;  %v5265_v21 = vsel %vm638_vm4, %v1413_v60, %v1412_v33 }
 0x874   :  { %1451 = vrot.lane.b32.xlu0 %v1450_v29, %s4531_s8 }
 0x8e6   :  { %v1452_v61 = vpop.permute.xlu0 %1451 }
 0x8e7   :  { %3800 = vmatmul.mubr.msk.f32.vlgmr.msra.gmra.mrb[4].mxu1 %vm113_vm1, %v1452_v61 }
 0x8e8   :  { %3821 = vmatprep.mubr.msk.f32.mxu1 %vm4528_vm0, %v5969_v2 }
 0x9ba   :  { %v1521_v7 = vpop.f32.mrb[4].mxu1 }
 0x9bb   :  { %v1526_v31 = vrot.slane %v1521_v7, 4  ;;  %v1527_v38 = vrot.slane %v1521_v7, 5  ;;  %v1528_v39 = vrot.slane %v1521_v7, 6  ;;  %v1529_v4 = vrot.slane %v1521_v7, 7  ;;  %v3801_v62 = vpop.f32.mrb[5].mxu1 }
 0x9bc   :  { %v1530_v53 = vrot.slane %v1521_v7, 1  ;;  %v1531_v42 = vrot.slane %v1521_v7, 2  ;;  %v1532_v18 = vrot.slane %v1521_v7, 3  ;;  %v1545_v34 = vadd.f32 %v1521_v7, %v4839_v22 }
 0x9bd   :  { %v1541_v41 = vadd.f32 %v1526_v31, %v4759_v48  ;;  %v1542_v50 = vadd.f32 %v1527_v38, %v4741_v43  ;;  %v1543_v20 = vadd.f32 %v1528_v39, %v4802_v5  ;;  %v1544_v46 = vadd.f32 %v1529_v4, %v4783_v58 }
 0x9be   :  { %v1546_v0 = vadd.f32 %v1530_v53, %v4821_v14  ;;  %v1547_v28 = vadd.f32 %v1531_v42, %v4874_v1  ;;  %v1548_v40 = vadd.f32 %v1532_v18, %v4855_v54  ;;  %v3640_v17 = vmul.f32 -1.442695, %v1545_v34 }
 0x9bf   :  { %4124 = vtanh.f32 %v1541_v41  ;;  %v3636_v54 = vmul.f32 -1.442695, %v1541_v41  ;;  %v3638_v47 = vmul.f32 -1.442695, %v1543_v20  ;;  %v3637_v60 = vmul.f32 -1.442695, %v1542_v50 }
 0x9c0   :  { %4126 = vtanh.f32 %v1543_v20  ;;  %v3641_v45 = vmul.f32 -1.442695, %v1546_v0  ;;  %v3642_v63 = vmul.f32 -1.442695, %v1547_v28  ;;  %v3639_v3 = vmul.f32 -1.442695, %v1544_v46 }
 0x9c1   :  { %4128 = vtanh.f32 %v1545_v34  ;;  %v3643_v55 = vmul.f32 -1.442695, %v1548_v40 }
 0x9c2   :  { %4130 = vtanh.f32 %v1546_v0 }
 0x9c3   :  { %4132 = vtanh.f32 %v1542_v50 }
 0x9c4   :  { %4134 = vtanh.f32 %v1547_v28 }
 0x9c5   :  { %4136 = vtanh.f32 %v1544_v46 }
 0x9c6   :  { %4138 = vtanh.f32 %v1548_v40 }
 0x9c7   :  { %4140 = vpow2.f32 %v3636_v54 }
 0x9c8   :  { %4142 = vpow2.f32 %v3638_v47 }
 0x9c9   :  { %v4125_v25 = vpop.eup %4124  ;;  %4144 = vpow2.f32 %v3640_v17 }
 0x9ca   :  { %1645 = vrot.lane.b32.xlu1 %v4125_v25, %s4530_s7  ;;  %v4127_v43 = vpop.eup %4126  ;;  %4146 = vpow2.f32 %v3641_v45 }
 0x9cb   :  { %v4129_v48 = vpop.eup %4128  ;;  %4148 = vpow2.f32 %v3637_v60 }
 0x9cc   :  { %1653 = vrot.lane.b32.xlu0 %v4129_v48, %s4530_s7  ;;  %v4131_v58 = vpop.eup %4130 }
 0x9cd   :  { %v4133_v1 = vpop.eup %4132 }
 0x9ce   :  { %1649 = vrot.lane.b32.xlu1 %v4127_v43, %s4530_s7  ;;  %v4135_v5 = vpop.eup %4134 }
 0x9cf   :  { %v4137_v14 = vpop.eup %4136 }
 0x9d0   :  { %1647 = vrot.lane.b32.xlu0 %v4133_v1, %s4530_s7  ;;  %v4139_v22 = vpop.eup %4138 }
 0x9d1   :  { %v4141_v30 = vpop.eup %4140 }
 0x9d2   :  { %1655 = vrot.lane.b32.xlu1 %v4131_v58, %s4530_s7  ;;  %v1573_v56 = vadd.f32 1.0, %v4141_v30  ;;  %v4143_v24 = vpop.eup %4142 }
 0x9d3   :  { %v4145_v52 = vpop.eup %4144  ;;  %v1575_v19 = vadd.f32 1.0, %v4143_v24 }
 0x9d4   :  { %1651 = vrot.lane.b32.xlu0 %v4137_v14, %s4530_s7  ;;  %4150 = vrcp.f32 %v1573_v56  ;;  %v4147_v32 = vpop.eup %4146  ;;  %v1577_v33 = vadd.f32 1.0, %v4145_v52  ;;  %v1613_v56 = vrot.slane %v5212_v57, 7  ;;  %v1617_v52 = vrot.slane %v5209_v10, 7 }
 0x9d5   :  { %4152 = vpow2.f32 %v3642_v63  ;;  %v4149_v29 = vpop.eup %4148  ;;  %v1578_v31 = vadd.f32 1.0, %v4147_v32 }
 0x9d6   :  { %1657 = vrot.lane.b32.xlu1 %v4135_v5, %s4530_s7  ;;  %4154 = vpow2.f32 %v3639_v3  ;;  %v1574_v4 = vadd.f32 1.0, %v4149_v29 }
 0x9d7   :  { %4156 = vpow2.f32 %v3643_v55  ;;  %v1615_v55 = vrot.slane %v5222_v26, 7 }
 0x9d8   :  { %1659 = vrot.lane.b32.xlu0 %v4139_v22, %s4530_s7  ;;  %4158 = vrcp.f32 %v1575_v19 }
 0x9d9   :  { %4160 = vrcp.f32 %v1577_v33  ;;  %v1618_v33 = vrot.slane %v5219_v13, 7 }
 0x9da   :  { %4162 = vrcp.f32 %v1578_v31 }
 0x9db   :  { %4164 = vrcp.f32 %v1574_v4  ;;  %v1619_v4 = vrot.slane %v5231_v51, 7 }
 0x9de   :  { %v5287_v61 = vpop.eup %4150 }
 0x9df   :  { %v4153_v38 = vpop.eup %4152  ;;  %v1629_v63 = vmul.f32 %v5287_v61, %v1613_v56  ;;  %v1807_v56 = vld [vmem:[#allocation11 + $0x18] sm:$0xff] }
 0x9e0   :  { %v4155_v62 = vpop.eup %4154  ;;  %v1579_v53 = vadd.f32 1.0, %v4153_v38  ;;  %v1614_v38 = vrot.slane %v5199_v11, 7  ;;  %v1616_v11 = vrot.slane %v5202_v35, 7 }
 0x9e1   :  { %v1576_v42 = vadd.f32 1.0, %v4155_v62  ;;  %v4157_v18 = vpop.eup %4156 }
 0x9e2   :  { %4166 = vrcp.f32 %v1579_v53  ;;  %v5291_v34 = vpop.eup %4158  ;;  %v1580_v50 = vadd.f32 1.0, %v4157_v18 }
 0x9e3   :  { %4168 = vrcp.f32 %v1576_v42  ;;  %v5294_v46 = vpop.eup %4160  ;;  %v1631_v19 = vmul.f32 %v5291_v34, %v1615_v55 }
 0x9e4   :  { %v5298_v40 = vpop.eup %4162  ;;  %4170 = vrcp.f32 %v1580_v50  ;;  %v1633_v29 = vmul.f32 %v5294_v46, %v1617_v52 }
 0x9e5   :  { %v5302_v48 = vpop.eup %4164  ;;  %v1634_v26 = vmul.f32 %v5298_v40, %v1618_v33 }
 0x9e6   :  { %v1630_v13 = vmul.f32 %v5302_v48, %v1614_v38 }
 0x9ec   :  { %v5306_v5 = vpop.eup %4166 }
 0x9ed   :  { %v5310_v54 = vpop.eup %4168  ;;  %v1635_v18 = vmul.f32 %v5306_v5, %v1619_v4 }
 0x9ee   :  { %v5315_v30 = vpop.eup %4170  ;;  %v1632_v51 = vmul.f32 %v5310_v54, %v1616_v11 }
 0xa3c   :  { %v1646_v7 = vpop.permute.xlu1 %1645 }
 0xa3d   :  { %v1669_v39 = vmul.f32 %v5287_v61, %v1646_v7 }
 0xa3e   :  { %v1654_v0 = vpop.permute.xlu0 %1653 }
 0xa3f   :  { %1685 = vrot.lane.b32.xlu1 %v1669_v39, %s4531_s8  ;;  %v1673_v28 = vmul.f32 %v5294_v46, %v1654_v0  ;;  %v1620_v0 = vrot.slane %v5228_v12, 7 }
 0xa40   :  { %v1650_v41 = vpop.permute.xlu1 %1649 }
 0xa41   :  { %v1671_v20 = vmul.f32 %v5291_v34, %v1650_v41  ;;  %1693 = vrot.lane.b32.xlu0 %v1673_v28, %s4531_s8 }
 0xa42   :  { %v1648_v58 = vpop.permute.xlu0 %1647 }
 0xa43   :  { %1689 = vrot.lane.b32.xlu1 %v1671_v20, %s4531_s8  ;;  %v1670_v1 = vmul.f32 %v5302_v48, %v1648_v58 }
 0xa44   :  { %v1656_v25 = vpop.permute.xlu1 %1655 }
 0xa45   :  { %v1674_v43 = vmul.f32 %v5298_v40, %v1656_v25  ;;  %1687 = vrot.lane.b32.xlu0 %v1670_v1, %s4531_s8  ;;  %v1636_v25 = vmul.f32 %v5315_v30, %v1620_v0 }
 0xa46   :  { %v1652_v47 = vpop.permute.xlu0 %1651 }
 0xa47   :  { %1695 = vrot.lane.b32.xlu1 %v1674_v43, %s4531_s8  ;;  %v1672_v17 = vmul.f32 %v5310_v54, %v1652_v47  ;;  %v1805_v47 = vld [vmem:[#allocation11 + $0x8] sm:$0xff] }
 0xa48   :  { %v1658_v14 = vpop.permute.xlu1 %1657 }
 0xa49   :  { %v1675_v22 = vmul.f32 %v5306_v5, %v1658_v14  ;;  %1691 = vrot.lane.b32.xlu0 %v1672_v17, %s4531_s8  ;;  %v1806_v17 = vld [vmem:[#allocation11 + $0x10] sm:$0xff] }
 0xa4a   :  { %v1660_v45 = vpop.permute.xlu0 %1659 }
 0xa4b   :  { %1697 = vrot.lane.b32.xlu1 %v1675_v22, %s4531_s8  ;;  %v1676_v60 = vmul.f32 %v5315_v30, %v1660_v45  ;;  %v1804_v22 = vld [vmem:[#allocation11] sm:$0xff] }
 0xa4d   :  { %1699 = vrot.lane.b32.xlu0 %v1676_v60, %s4531_s8  ;;  %v3894_v60 = vpack.c.bf16 %v1805_v47, %v1804_v22 }
 0xa4f   :  { %3895 = vmatpush3.bf16.msra.mxu0 %v3894_v60  ;;  %3901 = vmatpush3.bf16.msra.mxu1 %v3894_v60 }
 0xa50   :  { %3896 = vmatprep.subr.bf16.mxu0 %v5968_v8  ;;  %3902 = vmatprep.subr.bf16.mxu1 %v5968_v8 }
 0xab1   :  { %v1686_v3 = vpop.permute.xlu1 %1685 }
 0xab2   :  { %v5321_v24 = vadd.f32 %v1686_v3, %v1629_v63  ;;  %v3897_v3 = vpack.c.bf16 %v1807_v56, %v1806_v17 }
 0xab3   :  { %v1694_v57 = vpop.permute.xlu0 %1693 }
 0xab4   :  { %4172 = vtanh.f32 %v5321_v24  ;;  %v5332_v39 = vadd.f32 %v1694_v57, %v1633_v29  ;;  %3898 = vmatpush3.bf16.msra.mxu0 %v3897_v3  ;;  %3904 = vmatpush3.bf16.msra.mxu1 %v3897_v3 }
 0xab5   :  { %v1690_v32 = vpop.permute.xlu1 %1689  ;;  %3905 = vmatprep.subr.bf16.mxu0 %v5968_v8  ;;  %3911 = vmatprep.subr.bf16.mxu1 %v5968_v8 }
 0xab6   :  { %v5329_v7 = vadd.f32 %v1690_v32, %v1631_v19 }
 0xab7   :  { %v1688_v53 = vpop.permute.xlu0 %1687 }
 0xab8   :  { %4174 = vtanh.f32 %v5329_v7  ;;  %v5343_v42 = vadd.f32 %v1688_v53, %v1630_v13 }
 0xab9   :  { %v1696_v10 = vpop.permute.xlu1 %1695  ;;  %4176 = vtanh.f32 %v5332_v39 }
 0xaba   :  { %v5340_v62 = vadd.f32 %v1696_v10, %v1634_v26 }
 0xabb   :  { %v1692_v20 = vpop.permute.xlu0 %1691 }
 0xabc   :  { %4178 = vtanh.f32 %v5340_v62  ;;  %v5352_v28 = vadd.f32 %v1692_v20, %v1632_v51 }
 0xabd   :  { %v1698_v41 = vpop.permute.xlu1 %1697  ;;  %4180 = vtanh.f32 %v5343_v42 }
 0xabe   :  { %v4173_v31 = vpop.eup %4172  ;;  %v5349_v50 = vadd.f32 %v1698_v41, %v1635_v18 }
 0xabf   :  { %1733 = vrot.lane.b32.xlu1 %v4173_v31, %s4530_s7  ;;  %v1700_v43 = vpop.permute.xlu0 %1699 }
 0xac0   :  { %4182 = vtanh.f32 %v5349_v50  ;;  %v5358_v1 = vadd.f32 %v1700_v43, %v1636_v25 }
 0xac1   :  { %4184 = vtanh.f32 %v5352_v28 }
 0xac2   :  { %v4175_v35 = vpop.eup %4174  ;;  %4186 = vtanh.f32 %v5358_v1 }
 0xac3   :  { %1737 = vrot.lane.b32.xlu1 %v4175_v35, %s4530_s7  ;;  %v4177_v58 = vpop.eup %4176 }
 0xac4   :  { %1741 = vrot.lane.b32.xlu0 %v4177_v58, %s4530_s7 }
 0xac6   :  { %v4179_v14 = vpop.eup %4178 }
 0xac7   :  { %1743 = vrot.lane.b32.xlu1 %v4179_v14, %s4530_s7  ;;  %v4181_v12 = vpop.eup %4180 }
 0xac8   :  { %1735 = vrot.lane.b32.xlu0 %v4181_v12, %s4530_s7 }
 0xaca   :  { %v4183_v45 = vpop.eup %4182 }
 0xacb   :  { %1745 = vrot.lane.b32.xlu1 %v4183_v45, %s4530_s7  ;;  %v4185_v63 = vpop.eup %4184 }
 0xacc   :  { %1739 = vrot.lane.b32.xlu0 %v4185_v63, %s4530_s7  ;;  %v4187_v55 = vpop.eup %4186 }
 0xad0   :  { %1747 = vrot.lane.b32.xlu0 %v4187_v55, %s4530_s7 }
 0xb31   :  { %v1734_v52 = vpop.permute.xlu1 %1733 }
 0xb32   :  { %v1757_v29 = vmul.f32 %v5287_v61, %v1734_v52 }
 0xb34   :  { %v1808_v53 = vrot.slane %v1757_v29, 4 }
 0xb35   :  { %v1738_v19 = vpop.permute.xlu1 %1737 }
 0xb36   :  { %v1742_v32 = vpop.permute.xlu0 %1741  ;;  %v1759_v57 = vmul.f32 %v5291_v34, %v1738_v19 }
 0xb37   :  { %v1761_v33 = vmul.f32 %v5294_v46, %v1742_v32 }
 0xb38   :  { %v1775_v11 = vrot.slane %v1759_v57, 6  ;;  %v1811_v18 = vrot.slane %v1759_v57, 2 }
 0xb39   :  { %v1744_v31 = vpop.permute.xlu1 %1743  ;;  %v1779_v10 = vrot.slane %v1761_v33, 4 }
 0xb3a   :  { %v1762_v38 = vmul.f32 %v5298_v40, %v1744_v31  ;;  %v1736_v26 = vpop.permute.xlu0 %1735 }
 0xb3b   :  { %v1758_v4 = vmul.f32 %v5302_v48, %v1736_v26 }
 0xb3c   :  { %v1780_v13 = vrot.slane %v1762_v38, 3  ;;  %v1816_v12 = vrot.slane %v1762_v38, 7 }
 0xb3d   :  { %v1746_v41 = vpop.permute.xlu1 %1745  ;;  %v1773_v51 = vrot.slane %v1758_v4, 7  ;;  %v1809_v20 = vrot.slane %v1758_v4, 3 }
 0xb3e   :  { %v1781_v46 = vsel %vm695_vm5, %v1780_v13, %v1779_v10  ;;  %v1763_v61 = vmul.f32 %v5306_v5, %v1746_v41  ;;  %v1740_v0 = vpop.permute.xlu0 %1739 }
 0xb3f   :  { %v1774_v34 = vsel %vm647_vm8, %v1773_v51, %v1757_v29  ;;  %v1810_v40 = vsel %vm695_vm5, %v1809_v20, %v1808_v53  ;;  %v1760_v35 = vmul.f32 %v5310_v54, %v1740_v0  ;;  %v5970_v20 = vld [vmem:[#allocation32_spill] sm:$0xff] }
 0xb40   :  { %v1782_v25 = vrot.slane %v1763_v61, 2  ;;  %v1812_v48 = vsel %vm638_vm4, %v1811_v18, %v1810_v40  ;;  %v1776_v43 = vsel %vm650_vm9, %v1775_v11, %v1774_v34  ;;  %v1818_v17 = vrot.slane %v1763_v61, 6  ;;  %v5971_v61 = vld [vmem:[#allocation29_spill] sm:$0xff] }
 0xb41   :  { %v1777_v58 = vrot.slane %v1760_v35, 5  ;;  %v1813_v14 = vrot.slane %v1760_v35, 1 }
 0xb42   :  { %v1783_v22 = vsel %vm638_vm4, %v1782_v25, %v1781_v46  ;;  %v1748_v47 = vpop.permute.xlu0 %1747 }
 0xb43   :  { %v1814_v5 = vsel %vm641_vm6, %v1813_v14, %v1812_v48  ;;  %v1764_v45 = vmul.f32 %v5315_v30, %v1748_v47  ;;  %v5387_v56 = vsel %vm653_vm10, %v1777_v58, %v1776_v43 }
 0xb44   :  { %v1815_v54 = vsel %vm644_vm7, %v1761_v33, %v1814_v5 }
 0xb45   :  { %v1817_v63 = vsel %vm647_vm8, %v1816_v12, %v1815_v54  ;;  %v1784_v55 = vrot.slane %v1764_v45, 1  ;;  %v1820_v52 = vrot.slane %v1764_v45, 5 }
 0xb46   :  { %v1819_v19 = vsel %vm650_vm9, %v1818_v17, %v1817_v63 }
 0xb47   :  { %v1821_v32 = vsel %vm653_vm10, %v1820_v52, %v1819_v19  ;;  %v5394_v29 = vsel %vm641_vm6, %v1784_v55, %v1783_v22 }
 0xb48   :  { %1822 = vrot.lane.b32.xlu1 %v1821_v32, %s4531_s8 }
 0xbba   :  { %v1823_v57 = vpop.permute.xlu1 %1822 }
 0xbbb   :  { %3811 = vmatmul.mubr.msk.f32.vlgmr.msra.gmra.mrb[12].mxu0 %vm113_vm1, %v1823_v57 }
 0xbbc   :  { %3907 = vmatpush3.bf16.msra.mxu0 %v3894_v60  ;;  %3832 = vmatprep.mubr.msk.f32.mxu0 %vm4528_vm0, %v5969_v2 }
 0xbbd   :  { %3908 = vmatprep.subr.bf16.mxu0 %v5968_v8 }
 0xbc0   :  { %3910 = vmatpush3.bf16.msra.mxu0 %v3897_v3 }
 0xc8e   :  { %v1892_v30 = vpop.f32.mrb[12].mxu0 }
 0xc8f   :  { %v1897_v33 = vrot.slane %v1892_v30, 3  ;;  %v1898_v31 = vrot.slane %v1892_v30, 4  ;;  %v1899_v38 = vrot.slane %v1892_v30, 5  ;;  %v1900_v26 = vrot.slane %v1892_v30, 6  ;;  %v3812_v10 = vpop.f32.mrb[13].mxu0 }
 0xc90   :  { %v1901_v4 = vrot.slane %v1892_v30, 7  ;;  %v1902_v13 = vrot.slane %v1892_v30, 1  ;;  %v1903_v53 = vrot.slane %v1892_v30, 2  ;;  %v1917_v11 = vadd.f32 %v1892_v30, %v4824_v15 }
 0xc91   :  { %v1912_v18 = vadd.f32 %v1897_v33, %v4763_v49  ;;  %v1913_v60 = vadd.f32 %v1898_v31, %v4745_v44  ;;  %v1914_v41 = vadd.f32 %v1899_v38, %v4804_v6  ;;  %v1915_v51 = vadd.f32 %v1900_v26, %v4785_v59 }
 0xc92   :  { %v1916_v3 = vadd.f32 %v1901_v4, %v4842_v23  ;;  %v1918_v46 = vadd.f32 %v1902_v13, %v5970_v20  ;;  %v1919_v0 = vadd.f32 %v1903_v53, %v5971_v61  ;;  %v3650_v47 = vmul.f32 -1.442695, %v1917_v11 }
 0xc93   :  { %4188 = vtanh.f32 %v1912_v18  ;;  %v3645_v35 = vmul.f32 -1.442695, %v1912_v18  ;;  %v3646_v25 = vmul.f32 -1.442695, %v1913_v60  ;;  %v3647_v48 = vmul.f32 -1.442695, %v1914_v41 }
 0xc94   :  { %4190 = vtanh.f32 %v1913_v60  ;;  %v3648_v43 = vmul.f32 -1.442695, %v1915_v51  ;;  %v3649_v14 = vmul.f32 -1.442695, %v1916_v3  ;;  %v3651_v12 = vmul.f32 -1.442695, %v1918_v46 }
 0xc95   :  { %4192 = vtanh.f32 %v1914_v41  ;;  %v3652_v17 = vmul.f32 -1.442695, %v1919_v0 }
 0xc96   :  { %4194 = vtanh.f32 %v1915_v51 }
 0xc97   :  { %4196 = vtanh.f32 %v1916_v3 }
 0xc98   :  { %4198 = vtanh.f32 %v1918_v46 }
 0xc99   :  { %4200 = vtanh.f32 %v1917_v11 }
 0xc9a   :  { %4202 = vtanh.f32 %v1919_v0 }
 0xc9b   :  { %4204 = vpow2.f32 %v3645_v35 }
 0xc9c   :  { %4206 = vpow2.f32 %v3646_v25 }
 0xc9d   :  { %v4189_v34 = vpop.eup %4188  ;;  %4208 = vpow2.f32 %v3647_v48  ;;  %v1984_v48 = vrot.slane %v5321_v24, 7 }
 0xc9e   :  { %2016 = vrot.lane.b32.xlu0 %v4189_v34, %s4530_s7  ;;  %v4191_v44 = vpop.eup %4190  ;;  %4210 = vpow2.f32 %v3648_v43 }
 0xc9f   :  { %v4193_v49 = vpop.eup %4192  ;;  %2018 = vrot.lane.b32.xlu1 %v4191_v44, %s4530_s7  ;;  %4212 = vpow2.f32 %v3649_v14 }
 0xca0   :  { %v4195_v59 = vpop.eup %4194  ;;  %4214 = vpow2.f32 %v3651_v12  ;;  %v1985_v12 = vrot.slane %v5343_v42, 7 }
 0xca1   :  { %v4197_v6 = vpop.eup %4196 }
 0xca2   :  { %2020 = vrot.lane.b32.xlu0 %v4193_v49, %s4530_s7  ;;  %v4199_v15 = vpop.eup %4198 }
 0xca3   :  { %2022 = vrot.lane.b32.xlu1 %v4195_v59, %s4530_s7  ;;  %v4201_v23 = vpop.eup %4200 }
 0xca4   :  { %v4203_v40 = vpop.eup %4202 }
 0xca5   :  { %v4205_v58 = vpop.eup %4204 }
 0xca6   :  { %2024 = vrot.lane.b32.xlu0 %v4197_v6, %s4530_s7  ;;  %v1944_v22 = vadd.f32 1.0, %v4205_v58  ;;  %v4207_v5 = vpop.eup %4206 }
 0xca7   :  { %2028 = vrot.lane.b32.xlu1 %v4199_v15, %s4530_s7  ;;  %v4209_v45 = vpop.eup %4208  ;;  %v1945_v54 = vadd.f32 1.0, %v4207_v5 }
 0xca8   :  { %4216 = vrcp.f32 %v1944_v22  ;;  %v4211_v63 = vpop.eup %4210  ;;  %v1946_v55 = vadd.f32 1.0, %v4209_v45  ;;  %v1986_v22 = vrot.slane %v5329_v7, 7  ;;  %v1987_v45 = vrot.slane %v5352_v28, 7 }
 0xca9   :  { %4218 = vpow2.f32 %v3650_v47  ;;  %v4213_v52 = vpop.eup %4212  ;;  %v1947_v32 = vadd.f32 1.0, %v4211_v63  ;;  %v1988_v63 = vrot.slane %v5332_v39, 7  ;;  %v1989_v39 = vrot.slane %v5340_v62, 7 }
 0xcaa   :  { %2026 = vrot.lane.b32.xlu0 %v4201_v23, %s4530_s7  ;;  %4220 = vpow2.f32 %v3652_v17  ;;  %v4215_v19 = vpop.eup %4214  ;;  %v1948_v33 = vadd.f32 1.0, %v4213_v52 }
 0xcab   :  { %2030 = vrot.lane.b32.xlu1 %v4203_v40, %s4530_s7  ;;  %4222 = vrcp.f32 %v1945_v54  ;;  %v1950_v26 = vadd.f32 1.0, %v4215_v19 }
 0xcac   :  { %4224 = vrcp.f32 %v1946_v55 }
 0xcad   :  { %4226 = vrcp.f32 %v1947_v32  ;;  %v1990_v32 = vrot.slane %v5349_v50, 7  ;;  %v1991_v50 = vrot.slane %v5358_v1, 7 }
 0xcae   :  { %4228 = vrcp.f32 %v1948_v33 }
 0xcaf   :  { %4230 = vrcp.f32 %v1950_v26 }
 0xcb2   :  { %v5417_v57 = vpop.eup %4216 }
 0xcb3   :  { %v4219_v31 = vpop.eup %4218  ;;  %v2000_v43 = vmul.f32 %v5417_v57, %v1984_v48 }
 0xcb4   :  { %v4221_v10 = vpop.eup %4220  ;;  %v1949_v4 = vadd.f32 1.0, %v4219_v31 }
 0xcb5   :  { %v1951_v13 = vadd.f32 1.0, %v4221_v10  ;;  %v5421_v53 = vpop.eup %4222 }
 0xcb6   :  { %4232 = vrcp.f32 %v1949_v4  ;;  %v5423_v18 = vpop.eup %4224  ;;  %v2001_v47 = vmul.f32 %v5421_v53, %v1985_v12 }
 0xcb7   :  { %4234 = vrcp.f32 %v1951_v13  ;;  %v5428_v3 = vpop.eup %4226  ;;  %v2002_v5 = vmul.f32 %v5423_v18, %v1986_v22 }
 0xcb8   :  { %v5431_v46 = vpop.eup %4228  ;;  %v2003_v42 = vmul.f32 %v5428_v3, %v1987_v45 }
 0xcb9   :  { %v5436_v44 = vpop.eup %4230  ;;  %v2004_v19 = vmul.f32 %v5431_v46, %v1988_v63 }
 0xcba   :  { %v2006_v31 = vmul.f32 %v5436_v44, %v1990_v32 }
 0xcc0   :  { %v5439_v59 = vpop.eup %4232 }
 0xcc1   :  { %v5444_v40 = vpop.eup %4234  ;;  %v2005_v26 = vmul.f32 %v5439_v59, %v1989_v39 }
 0xcc2   :  { %v2007_v62 = vmul.f32 %v5444_v40, %v1991_v50 }
 0xd10   :  { %v2017_v30 = vpop.permute.xlu0 %2016 }
 0xd11   :  { %v2040_v38 = vmul.f32 %v5417_v57, %v2017_v30  ;;  %v2019_v11 = vpop.permute.xlu1 %2018 }
 0xd12   :  { %v2041_v60 = vmul.f32 %v5421_v53, %v2019_v11 }
 0xd13   :  { %2056 = vrot.lane.b32.xlu0 %v2040_v38, %s4531_s8 }
 0xd14   :  { %v2021_v41 = vpop.permute.xlu0 %2020  ;;  %2058 = vrot.lane.b32.xlu1 %v2041_v60, %s4531_s8 }
 0xd15   :  { %v2042_v51 = vmul.f32 %v5423_v18, %v2021_v41  ;;  %v2023_v20 = vpop.permute.xlu1 %2022 }
 0xd16   :  { %v2043_v61 = vmul.f32 %v5428_v3, %v2023_v20 }
 0xd17   :  { %2060 = vrot.lane.b32.xlu0 %v2042_v51, %s4531_s8 }
 0xd18   :  { %v2025_v0 = vpop.permute.xlu0 %2024  ;;  %2062 = vrot.lane.b32.xlu1 %v2043_v61, %s4531_s8 }
 0xd19   :  { %v2044_v34 = vmul.f32 %v5431_v46, %v2025_v0  ;;  %v2029_v49 = vpop.permute.xlu1 %2028 }
 0xd1a   :  { %v2046_v6 = vmul.f32 %v5436_v44, %v2029_v49 }
 0xd1b   :  { %2064 = vrot.lane.b32.xlu0 %v2044_v34, %s4531_s8 }
 0xd1c   :  { %v2027_v15 = vpop.permute.xlu0 %2026  ;;  %2068 = vrot.lane.b32.xlu1 %v2046_v6, %s4531_s8 }
 0xd1d   :  { %v2045_v23 = vmul.f32 %v5439_v59, %v2027_v15  ;;  %v2031_v35 = vpop.permute.xlu1 %2030 }
 0xd1e   :  { %v2047_v25 = vmul.f32 %v5444_v40, %v2031_v35 }
 0xd1f   :  { %2066 = vrot.lane.b32.xlu0 %v2045_v23, %s4531_s8 }
 0xd20   :  { %2070 = vrot.lane.b32.xlu1 %v2047_v25, %s4531_s8 }
 0xd85   :  { %v2057_v58 = vpop.permute.xlu0 %2056 }
 0xd86   :  { %v5451_v14 = vadd.f32 %v2057_v58, %v2000_v43  ;;  %v2059_v17 = vpop.permute.xlu1 %2058 }
 0xd87   :  { %v5459_v54 = vadd.f32 %v2059_v17, %v2001_v47 }
 0xd88   :  { %4236 = vtanh.f32 %v5451_v14 }
 0xd89   :  { %v2061_v24 = vpop.permute.xlu0 %2060  ;;  %4238 = vtanh.f32 %v5459_v54 }
 0xd8a   :  { %v5462_v55 = vadd.f32 %v2061_v24, %v2002_v5  ;;  %v2063_v7 = vpop.permute.xlu1 %2062 }
 0xd8b   :  { %v5469_v28 = vadd.f32 %v2063_v7, %v2003_v42 }
 0xd8c   :  { %4240 = vtanh.f32 %v5462_v55 }
 0xd8d   :  { %v2065_v30 = vpop.permute.xlu0 %2064  ;;  %4242 = vtanh.f32 %v5469_v28 }
 0xd8e   :  { %v5473_v33 = vadd.f32 %v2065_v30, %v2004_v19  ;;  %v2069_v38 = vpop.permute.xlu1 %2068 }
 0xd8f   :  { %v5480_v10 = vadd.f32 %v2069_v38, %v2006_v31 }
 0xd90   :  { %4244 = vtanh.f32 %v5473_v33 }
 0xd91   :  { %v2067_v4 = vpop.permute.xlu0 %2066  ;;  %4246 = vtanh.f32 %v5480_v10 }
 0xd92   :  { %v4237_v52 = vpop.eup %4236  ;;  %v5482_v13 = vadd.f32 %v2067_v4, %v2005_v26  ;;  %v2071_v11 = vpop.permute.xlu1 %2070 }
 0xd93   :  { %2104 = vrot.lane.b32.xlu0 %v4237_v52, %s4530_s7  ;;  %v4239_v60 = vpop.eup %4238  ;;  %v5487_v41 = vadd.f32 %v2071_v11, %v2007_v62 }
 0xd94   :  { %4248 = vtanh.f32 %v5482_v13  ;;  %2106 = vrot.lane.b32.xlu1 %v4239_v60, %s4530_s7 }
 0xd95   :  { %4250 = vtanh.f32 %v5487_v41 }
 0xd96   :  { %v4241_v51 = vpop.eup %4240 }
 0xd97   :  { %2108 = vrot.lane.b32.xlu0 %v4241_v51, %s4530_s7  ;;  %v4243_v1 = vpop.eup %4242 }
 0xd98   :  { %2110 = vrot.lane.b32.xlu1 %v4243_v1, %s4530_s7 }
 0xd9a   :  { %v4245_v20 = vpop.eup %4244 }
 0xd9b   :  { %2112 = vrot.lane.b32.xlu0 %v4245_v20, %s4530_s7  ;;  %v4247_v61 = vpop.eup %4246 }
 0xd9c   :  { %2116 = vrot.lane.b32.xlu1 %v4247_v61, %s4530_s7 }
 0xd9e   :  { %v4249_v0 = vpop.eup %4248 }
 0xd9f   :  { %2114 = vrot.lane.b32.xlu0 %v4249_v0, %s4530_s7  ;;  %v4251_v34 = vpop.eup %4250 }
 0xda0   :  { %2118 = vrot.lane.b32.xlu1 %v4251_v34, %s4530_s7 }
 0xe05   :  { %v2105_v49 = vpop.permute.xlu0 %2104 }
 0xe06   :  { %v2128_v6 = vmul.f32 %v5417_v57, %v2105_v49  ;;  %v2107_v15 = vpop.permute.xlu1 %2106 }
 0xe07   :  { %v2129_v23 = vmul.f32 %v5421_v53, %v2107_v15 }
 0xe08   :  { %v2179_v35 = vrot.slane %v2128_v6, 5 }
 0xe09   :  { %v2109_v25 = vpop.permute.xlu0 %2108  ;;  %v2144_v43 = vrot.slane %v2129_v23, 7  ;;  %v2180_v58 = vrot.slane %v2129_v23, 4 }
 0xe0a   :  { %v2130_v48 = vmul.f32 %v5423_v18, %v2109_v25  ;;  %v2111_v12 = vpop.permute.xlu1 %2110 }
 0xe0b   :  { %v2145_v17 = vsel %vm650_vm9, %v2144_v43, %v2128_v6  ;;  %v2181_v5 = vsel %vm695_vm5, %v2180_v58, %v2179_v35  ;;  %v2131_v45 = vmul.f32 %v5428_v3, %v2111_v12  ;;  %v5972_v43 = vld [vmem:[#allocation33_spill] sm:$0xff]  ;;  %v5973_v12 = vld [vmem:[#allocation19_spill] sm:$0xff] }
 0xe0c   :  { %v2146_v22 = vrot.slane %v2130_v48, 6  ;;  %v2182_v47 = vrot.slane %v2130_v48, 3 }
 0xe0d   :  { %v2113_v24 = vpop.permute.xlu0 %2112  ;;  %v2184_v18 = vrot.slane %v2131_v45, 2  ;;  %v2148_v42 = vrot.slane %v2131_v45, 5 }
 0xe0e   :  { %v2183_v57 = vsel %vm638_vm4, %v2182_v47, %v2181_v5  ;;  %v2132_v53 = vmul.f32 %v5431_v46, %v2113_v24  ;;  %v5506_v63 = vsel %vm653_vm10, %v2146_v22, %v2145_v17  ;;  %v2117_v52 = vpop.permute.xlu1 %2116  ;;  %v5974_v47 = vld [vmem:[#allocation17_spill] sm:$0xff]  ;;  %v5975_v5 = vld [vmem:[#allocation23_spill] sm:$0xff] }
 0xe0f   :  { %v2134_v32 = vmul.f32 %v5436_v44, %v2117_v52  ;;  %v2185_v30 = vsel %vm641_vm6, %v2184_v18, %v2183_v57  ;;  %v5976_v24 = vld [vmem:[#allocation21_spill] sm:$0xff] }
 0xe10   :  { %v2149_v7 = vrot.slane %v2132_v53, 4  ;;  %v2186_v19 = vrot.slane %v2132_v53, 1  ;;  %v5977_v53 = vld [vmem:[#allocation27_spill] sm:$0xff] }
 0xe11   :  { %v2115_v39 = vpop.permute.xlu0 %2114  ;;  %v2189_v46 = vrot.slane %v2134_v32, 7  ;;  %v2153_v62 = vrot.slane %v2134_v32, 2 }
 0xe12   :  { %v2150_v3 = vsel %vm695_vm5, %v2149_v7, %v2148_v42  ;;  %v2187_v31 = vsel %vm644_vm7, %v2186_v19, %v2185_v30  ;;  %v2133_v38 = vmul.f32 %v5439_v59, %v2115_v39  ;;  %v2119_v26 = vpop.permute.xlu1 %2118  ;;  %v5978_v42 = vld [vmem:[#allocation25_spill] sm:$0xff]  ;;  %v5979_v7 = vld [vmem:[#allocation30_spill] sm:$0xff] }
 0xe13   :  { %v2135_v11 = vmul.f32 %v5444_v40, %v2119_v26 }
 0xe14   :  { %v2151_v50 = vrot.slane %v2133_v38, 3  ;;  %v2188_v4 = vsel %vm647_vm8, %v2133_v38, %v2187_v31 }
 0xe15   :  { %v2190_v44 = vsel %vm650_vm9, %v2189_v46, %v2188_v4  ;;  %v2155_v51 = vrot.slane %v2135_v11, 1  ;;  %v2191_v1 = vrot.slane %v2135_v11, 6 }
 0xe16   :  { %v2152_v60 = vsel %vm638_vm4, %v2151_v50, %v2150_v3 }
 0xe17   :  { %v2154_v20 = vsel %vm641_vm6, %v2153_v62, %v2152_v60  ;;  %v2192_v61 = vsel %vm653_vm10, %v2191_v1, %v2190_v44 }
 0xe18   :  { %v5520_v59 = vsel %vm644_vm7, %v2155_v51, %v2154_v20  ;;  %2193 = vrot.lane.b32.xlu0 %v2192_v61, %s4531_s8 }
 0xe8a   :  { %v2194_v0 = vpop.permute.xlu0 %2193 }
 0xe8b   :  { %3822 = vmatmul.mubr.msk.f32.vlgmr.msra.gmra.mrb[6].mxu1 %vm113_vm1, %v2194_v0 }
 0xe8c   :  { %3843 = vmatprep.mubr.msk.f32.mxu1 %vm4528_vm0, %v5969_v2 }
 0xf5e   :  { %v2263_v40 = vpop.f32.mrb[6].mxu1 }
 0xf5f   :  { %v2268_v34 = vrot.slane %v2263_v40, 2  ;;  %v2269_v49 = vrot.slane %v2263_v40, 3  ;;  %v2270_v6 = vrot.slane %v2263_v40, 4  ;;  %v2271_v15 = vrot.slane %v2263_v40, 5  ;;  %v3823_v23 = vpop.f32.mrb[7].mxu1 }
 0xf60   :  { %v2272_v35 = vrot.slane %v2263_v40, 6  ;;  %v2273_v25 = vrot.slane %v2263_v40, 7  ;;  %v2274_v48 = vrot.slane %v2263_v40, 1  ;;  %v2289_v58 = vadd.f32 %v2263_v40, %v5972_v43 }
 0xf61   :  { %v2283_v22 = vadd.f32 %v2268_v34, %v5973_v12  ;;  %v2284_v17 = vadd.f32 %v2269_v49, %v5974_v47  ;;  %v2285_v45 = vadd.f32 %v2270_v6, %v5975_v5  ;;  %v2286_v57 = vadd.f32 %v2271_v15, %v5976_v24 }
 0xf62   :  { %v2287_v18 = vadd.f32 %v2272_v35, %v5977_v53  ;;  %v2288_v52 = vadd.f32 %v2273_v25, %v5978_v42  ;;  %v2290_v19 = vadd.f32 %v2274_v48, %v5979_v7  ;;  %v3660_v61 = vmul.f32 -1.442695, %v2289_v58 }
 0xf63   :  { %4252 = vtanh.f32 %v2283_v22  ;;  %v3654_v50 = vmul.f32 -1.442695, %v2283_v22  ;;  %v3655_v4 = vmul.f32 -1.442695, %v2284_v17  ;;  %v3656_v62 = vmul.f32 -1.442695, %v2285_v45 }
 0xf64   :  { %4254 = vtanh.f32 %v2284_v17  ;;  %v3657_v11 = vmul.f32 -1.442695, %v2286_v57  ;;  %v3658_v44 = vmul.f32 -1.442695, %v2287_v18  ;;  %v3659_v51 = vmul.f32 -1.442695, %v2288_v52 }
 0xf65   :  { %4256 = vtanh.f32 %v2285_v45  ;;  %v3661_v20 = vmul.f32 -1.442695, %v2290_v19 }
 0xf66   :  { %4258 = vtanh.f32 %v2286_v57 }
 0xf67   :  { %4260 = vtanh.f32 %v2287_v18 }
 0xf68   :  { %4262 = vtanh.f32 %v2288_v52 }
 0xf69   :  { %4264 = vtanh.f32 %v2290_v19 }
 0xf6a   :  { %4266 = vtanh.f32 %v2289_v58 }
 0xf6b   :  { %4268 = vpow2.f32 %v3654_v50 }
 0xf6c   :  { %4270 = vpow2.f32 %v3655_v4 }
 0xf6d   :  { %v4253_v32 = vpop.eup %4252  ;;  %4272 = vpow2.f32 %v3656_v62 }
 0xf6e   :  { %2387 = vrot.lane.b32.xlu1 %v4253_v32, %s4530_s7  ;;  %v4255_v30 = vpop.eup %4254  ;;  %4274 = vpow2.f32 %v3657_v11 }
 0xf6f   :  { %v4257_v39 = vpop.eup %4256  ;;  %2389 = vrot.lane.b32.xlu0 %v4255_v30, %s4530_s7  ;;  %4276 = vpow2.f32 %v3658_v44 }
 0xf70   :  { %v4259_v3 = vpop.eup %4258  ;;  %4278 = vpow2.f32 %v3659_v51 }
 0xf71   :  { %v4261_v31 = vpop.eup %4260 }
 0xf72   :  { %2391 = vrot.lane.b32.xlu1 %v4257_v39, %s4530_s7  ;;  %v4263_v38 = vpop.eup %4262 }
 0xf73   :  { %2393 = vrot.lane.b32.xlu0 %v4259_v3, %s4530_s7  ;;  %v4265_v46 = vpop.eup %4264 }
 0xf74   :  { %v4267_v26 = vpop.eup %4266 }
 0xf75   :  { %v4269_v60 = vpop.eup %4268 }
 0xf76   :  { %2395 = vrot.lane.b32.xlu1 %v4261_v31, %s4530_s7  ;;  %v2315_v1 = vadd.f32 1.0, %v4269_v60  ;;  %v4271_v0 = vpop.eup %4270  ;;  %v2355_v60 = vrot.slane %v5451_v14, 7 }
 0xf77   :  { %2397 = vrot.lane.b32.xlu0 %v4263_v38, %s4530_s7  ;;  %v4273_v40 = vpop.eup %4272  ;;  %v2316_v34 = vadd.f32 1.0, %v4271_v0 }
 0xf78   :  { %4280 = vrcp.f32 %v2315_v1  ;;  %v4275_v49 = vpop.eup %4274  ;;  %v2317_v6 = vadd.f32 1.0, %v4273_v40 }
 0xf79   :  { %4282 = vpow2.f32 %v3661_v20  ;;  %v4277_v15 = vpop.eup %4276  ;;  %v2318_v35 = vadd.f32 1.0, %v4275_v49  ;;  %v2356_v20 = vrot.slane %v5459_v54, 7  ;;  %v2358_v49 = vrot.slane %v5469_v28, 7 }
 0xf7a   :  { %2401 = vrot.lane.b32.xlu1 %v4265_v46, %s4530_s7  ;;  %4284 = vpow2.f32 %v3660_v61  ;;  %v4279_v23 = vpop.eup %4278  ;;  %v2319_v43 = vadd.f32 1.0, %v4277_v15  ;;  %v2357_v61 = vrot.slane %v5462_v55, 7  ;;  %v2359_v15 = vrot.slane %v5473_v33, 7 }
 0xf7b   :  { %2399 = vrot.lane.b32.xlu0 %v4267_v26, %s4530_s7  ;;  %4286 = vrcp.f32 %v2316_v34  ;;  %v2320_v22 = vadd.f32 1.0, %v4279_v23  ;;  %v2362_v33 = vrot.slane %v5487_v41, 7 }
 0xf7c   :  { %4288 = vrcp.f32 %v2317_v6 }
 0xf7d   :  { %4290 = vrcp.f32 %v2318_v35 }
 0xf7e   :  { %4292 = vrcp.f32 %v2319_v43  ;;  %v2360_v43 = vrot.slane %v5482_v13, 7  ;;  %v2361_v13 = vrot.slane %v5480_v10, 7 }
 0xf7f   :  { %4294 = vrcp.f32 %v2320_v22 }
 0xf82   :  { %v5542_v25 = vpop.eup %4280 }
 0xf83   :  { %v4283_v12 = vpop.eup %4282  ;;  %v2371_v44 = vmul.f32 %v5542_v25, %v2355_v60 }
 0xf84   :  { %v4285_v47 = vpop.eup %4284  ;;  %v2322_v17 = vadd.f32 1.0, %v4283_v12 }
 0xf85   :  { %v2321_v5 = vadd.f32 1.0, %v4285_v47  ;;  %v5546_v45 = vpop.eup %4286 }
 0xf86   :  { %4296 = vrcp.f32 %v2322_v17  ;;  %v5548_v57 = vpop.eup %4288  ;;  %v2372_v0 = vmul.f32 %v5546_v45, %v2356_v20 }
 0xf87   :  { %4298 = vrcp.f32 %v2321_v5  ;;  %v5553_v52 = vpop.eup %4290  ;;  %v2373_v34 = vmul.f32 %v5548_v57, %v2357_v61 }
 0xf88   :  { %v5556_v19 = vpop.eup %4292  ;;  %v2374_v54 = vmul.f32 %v5553_v52, %v2358_v49 }
 0xf89   :  { %v5561_v3 = vpop.eup %4294 }
 0xf8a   :  { %v2376_v22 = vmul.f32 %v5561_v3, %v2360_v43 }
 0xf90   :  { %v5564_v38 = vpop.eup %4296 }
 0xf91   :  { %v5569_v4 = vpop.eup %4298  ;;  %v2378_v17 = vmul.f32 %v5564_v38, %v2362_v33 }
 0xf92   :  { %v2377_v41 = vmul.f32 %v5569_v4, %v2361_v13 }
 0xfe0   :  { %v2388_v48 = vpop.permute.xlu1 %2387 }
 0xfe1   :  { %v2411_v58 = vmul.f32 %v5542_v25, %v2388_v48  ;;  %v2390_v24 = vpop.permute.xlu0 %2389  ;;  %v2375_v48 = vmul.f32 %v5556_v19, %v2359_v15 }
 0xfe2   :  { %v2412_v53 = vmul.f32 %v5546_v45, %v2390_v24 }
 0xfe3   :  { %2427 = vrot.lane.b32.xlu1 %v2411_v58, %s4531_s8 }
 0xfe4   :  { %v2392_v18 = vpop.permute.xlu1 %2391  ;;  %2429 = vrot.lane.b32.xlu0 %v2412_v53, %s4531_s8 }
 0xfe5   :  { %v2413_v42 = vmul.f32 %v5548_v57, %v2392_v18  ;;  %v2394_v7 = vpop.permute.xlu0 %2393 }
 0xfe6   :  { %v2414_v32 = vmul.f32 %v5553_v52, %v2394_v7 }
 0xfe7   :  { %2431 = vrot.lane.b32.xlu1 %v2413_v42, %s4531_s8 }
 0xfe8   :  { %v2396_v30 = vpop.permute.xlu1 %2395  ;;  %2433 = vrot.lane.b32.xlu0 %v2414_v32, %s4531_s8 }
 0xfe9   :  { %v2415_v39 = vmul.f32 %v5556_v19, %v2396_v30  ;;  %v2398_v31 = vpop.permute.xlu0 %2397 }
 0xfea   :  { %v2416_v46 = vmul.f32 %v5561_v3, %v2398_v31 }
 0xfeb   :  { %2435 = vrot.lane.b32.xlu1 %v2415_v39, %s4531_s8 }
 0xfec   :  { %v2402_v26 = vpop.permute.xlu1 %2401  ;;  %2437 = vrot.lane.b32.xlu0 %v2416_v46, %s4531_s8 }
 0xfed   :  { %v2418_v50 = vmul.f32 %v5564_v38, %v2402_v26  ;;  %v2400_v62 = vpop.permute.xlu0 %2399 }
 0xfee   :  { %v2417_v11 = vmul.f32 %v5569_v4, %v2400_v62 }
 0xfef   :  { %2441 = vrot.lane.b32.xlu1 %v2418_v50, %s4531_s8 }
 0xff0   :  { %2439 = vrot.lane.b32.xlu0 %v2417_v11, %s4531_s8 }
0x1055   :  { %v2428_v51 = vpop.permute.xlu1 %2427 }
0x1056   :  { %v5576_v1 = vadd.f32 %v2428_v51, %v2371_v44  ;;  %v2430_v40 = vpop.permute.xlu0 %2429 }
0x1057   :  { %v5584_v6 = vadd.f32 %v2430_v40, %v2372_v0 }
0x1058   :  { %4300 = vtanh.f32 %v5576_v1 }
0x1059   :  { %v2432_v14 = vpop.permute.xlu1 %2431  ;;  %4302 = vtanh.f32 %v5584_v6 }
0x105a   :  { %v5587_v23 = vadd.f32 %v2432_v14, %v2373_v34  ;;  %v2434_v55 = vpop.permute.xlu0 %2433 }
0x105b   :  { %v5594_v28 = vadd.f32 %v2434_v55, %v2374_v54 }
0x105c   :  { %4304 = vtanh.f32 %v5587_v23 }
0x105d   :  { %v2436_v12 = vpop.permute.xlu1 %2435  ;;  %4306 = vtanh.f32 %v5594_v28 }
0x105e   :  { %v5598_v58 = vadd.f32 %v2436_v12, %v2375_v48  ;;  %v2438_v47 = vpop.permute.xlu0 %2437 }
0x105f   :  { %v5605_v5 = vadd.f32 %v2438_v47, %v2376_v22 }
0x1060   :  { %4308 = vtanh.f32 %v5598_v58 }
0x1061   :  { %v2442_v24 = vpop.permute.xlu1 %2441  ;;  %4310 = vtanh.f32 %v5605_v5 }
0x1062   :  { %v4301_v35 = vpop.eup %4300  ;;  %v5607_v53 = vadd.f32 %v2442_v24, %v2378_v17  ;;  %v2440_v18 = vpop.permute.xlu0 %2439 }
0x1063   :  { %2475 = vrot.lane.b32.xlu1 %v4301_v35, %s4530_s7  ;;  %v4303_v42 = vpop.eup %4302  ;;  %v5612_v7 = vadd.f32 %v2440_v18, %v2377_v41 }
0x1064   :  { %4312 = vtanh.f32 %v5607_v53  ;;  %2477 = vrot.lane.b32.xlu0 %v4303_v42, %s4530_s7 }
0x1065   :  { %4314 = vtanh.f32 %v5612_v7 }
0x1066   :  { %v4305_v32 = vpop.eup %4304 }
0x1067   :  { %2479 = vrot.lane.b32.xlu1 %v4305_v32, %s4530_s7  ;;  %v4307_v10 = vpop.eup %4306 }
0x1068   :  { %2481 = vrot.lane.b32.xlu0 %v4307_v10, %s4530_s7 }
0x106a   :  { %v4309_v30 = vpop.eup %4308 }
0x106b   :  { %2483 = vrot.lane.b32.xlu1 %v4309_v30, %s4530_s7  ;;  %v4311_v39 = vpop.eup %4310 }
0x106c   :  { %2485 = vrot.lane.b32.xlu0 %v4311_v39, %s4530_s7 }
0x106e   :  { %v4313_v31 = vpop.eup %4312 }
0x106f   :  { %2489 = vrot.lane.b32.xlu1 %v4313_v31, %s4530_s7  ;;  %v4315_v46 = vpop.eup %4314 }
0x1070   :  { %2487 = vrot.lane.b32.xlu0 %v4315_v46, %s4530_s7 }
0x10d5   :  { %v2476_v26 = vpop.permute.xlu1 %2475 }
0x10d6   :  { %v2499_v50 = vmul.f32 %v5542_v25, %v2476_v26  ;;  %v2478_v62 = vpop.permute.xlu0 %2477 }
0x10d7   :  { %v2500_v11 = vmul.f32 %v5546_v45, %v2478_v62 }
0x10d8   :  { %v2550_v60 = vrot.slane %v2499_v50, 6 }
0x10d9   :  { %v2480_v44 = vpop.permute.xlu1 %2479  ;;  %v2515_v20 = vrot.slane %v2500_v11, 7  ;;  %v2551_v61 = vrot.slane %v2500_v11, 5 }
0x10da   :  { %v2501_v51 = vmul.f32 %v5548_v57, %v2480_v44  ;;  %v2482_v0 = vpop.permute.xlu0 %2481 }
0x10db   :  { %v2552_v34 = vsel %vm695_vm5, %v2551_v61, %v2550_v60  ;;  %v2502_v49 = vmul.f32 %v5553_v52, %v2482_v0  ;;  %v5628_v54 = vsel %vm653_vm10, %v2515_v20, %v2499_v50  ;;  %v5980_v0 = vld [vmem:[#allocation31_spill] sm:$0xff] }
0x10dc   :  { %v2553_v40 = vrot.slane %v2501_v51, 4  ;;  %v2517_v14 = vrot.slane %v2501_v51, 6 }
0x10dd   :  { %v2484_v15 = vpop.permute.xlu1 %2483  ;;  %v2518_v35 = vrot.slane %v2502_v49, 5  ;;  %v2555_v55 = vrot.slane %v2502_v49, 3 }
0x10de   :  { %v2554_v25 = vsel %vm638_vm4, %v2553_v40, %v2552_v34  ;;  %v2503_v45 = vmul.f32 %v5556_v19, %v2484_v15  ;;  %v2486_v57 = vpop.permute.xlu0 %2485  ;;  %v5981_v34 = vld [vmem:[#allocation20_spill] sm:$0xff] }
0x10df   :  { %v2519_v12 = vsel %vm695_vm5, %v2518_v35, %v2517_v14  ;;  %v2504_v33 = vmul.f32 %v5561_v3, %v2486_v57  ;;  %v2556_v52 = vsel %vm641_vm6, %v2555_v55, %v2554_v25  ;;  %v5982_v14 = vld [vmem:[#allocation18_spill] sm:$0xff]  ;;  %v5983_v25 = vld [vmem:[#allocation24_spill] sm:$0xff] }
0x10e0   :  { %v2520_v48 = vrot.slane %v2503_v45, 4  ;;  %v2557_v43 = vrot.slane %v2503_v45, 2  ;;  %v5984_v35 = vld [vmem:[#allocation22_spill] sm:$0xff]  ;;  %v5985_v57 = vld [vmem:[#allocation28_spill] sm:$0xff] }
0x10e1   :  { %v2490_v22 = vpop.permute.xlu1 %2489  ;;  %v2522_v24 = vrot.slane %v2504_v33, 3  ;;  %v2559_v19 = vrot.slane %v2504_v33, 1  ;;  %v5987_v33 = vld [vmem:[#allocation34_spill] sm:$0xff] }
0x10e2   :  { %v2521_v47 = vsel %vm638_vm4, %v2520_v48, %v2519_v12  ;;  %v2558_v17 = vsel %vm644_vm7, %v2557_v43, %v2556_v52  ;;  %v2506_v13 = vmul.f32 %v5564_v38, %v2490_v22  ;;  %v2488_v41 = vpop.permute.xlu0 %2487  ;;  %v5986_v43 = vld [vmem:[#allocation26_spill] sm:$0xff] }
0x10e3   :  { %v2505_v42 = vmul.f32 %v5569_v4, %v2488_v41  ;;  %v2560_v32 = vsel %vm647_vm8, %v2559_v19, %v2558_v17  ;;  %v2523_v10 = vsel %vm641_vm6, %v2522_v24, %v2521_v47 }
0x10e4   :  { %v2562_v18 = vrot.slane %v2506_v13, 7  ;;  %v2526_v3 = vrot.slane %v2506_v13, 1 }
0x10e5   :  { %v2524_v30 = vrot.slane %v2505_v42, 2  ;;  %v2561_v39 = vsel %vm650_vm9, %v2505_v42, %v2560_v32 }
0x10e6   :  { %v2563_v31 = vsel %vm653_vm10, %v2562_v18, %v2561_v39  ;;  %vm2907_vm10 = vcmask 260096  }
0x10e7   :  { %2564 = vrot.lane.b32.xlu1 %v2563_v31, %s4531_s8  ;;  %v2525_v38 = vsel %vm644_vm7, %v2524_v30, %v2523_v10 }
0x10e8   :  { %v5646_v46 = vsel %vm647_vm8, %v2526_v3, %v2525_v38 }
0x1159   :  { %v2565_v26 = vpop.permute.xlu1 %2564 }
0x115a   :  { %3833 = vmatmul.mubr.msk.f32.vlgmr.msra.gmra.mrb[14].mxu0 %vm113_vm1, %v2565_v26 }
0x122d   :  { %v2634_v4 = vpop.f32.mrb[14].mxu0 }
0x122e   :  { %v2639_v50 = vrot.slane %v2634_v4, 1  ;;  %v2640_v62 = vrot.slane %v2634_v4, 2  ;;  %v2641_v11 = vrot.slane %v2634_v4, 3  ;;  %v2642_v60 = vrot.slane %v2634_v4, 4  ;;  %v3834_v44 = vpop.f32.mrb[15].mxu0 }
0x122f   :  { %v2643_v51 = vrot.slane %v2634_v4, 5  ;;  %v2644_v20 = vrot.slane %v2634_v4, 6  ;;  %v2645_v61 = vrot.slane %v2634_v4, 7  ;;  %v2661_v40 = vadd.f32 %v2634_v4, %v5980_v0 }
0x1230   :  { %v2654_v49 = vadd.f32 %v2639_v50, %v5981_v34  ;;  %v2655_v15 = vadd.f32 %v2640_v62, %v5982_v14  ;;  %v2656_v45 = vadd.f32 %v2641_v11, %v5983_v25  ;;  %v2657_v55 = vadd.f32 %v2642_v60, %v5984_v35 }
0x1231   :  { %v2658_v48 = vadd.f32 %v2643_v51, %v5985_v57  ;;  %v2659_v12 = vadd.f32 %v2644_v20, %v5986_v43  ;;  %v2660_v52 = vadd.f32 %v2645_v61, %v5987_v33  ;;  %v3670_v31 = vmul.f32 -1.442695, %v2661_v40 }
0x1232   :  { %4316 = vtanh.f32 %v2655_v15  ;;  %v3664_v42 = vmul.f32 -1.442695, %v2655_v15  ;;  %v3665_v32 = vmul.f32 -1.442695, %v2656_v45  ;;  %v3666_v10 = vmul.f32 -1.442695, %v2657_v55 }
0x1233   :  { %4318 = vtanh.f32 %v2656_v45  ;;  %v3667_v3 = vmul.f32 -1.442695, %v2658_v48  ;;  %v3668_v30 = vmul.f32 -1.442695, %v2659_v12  ;;  %v3669_v39 = vmul.f32 -1.442695, %v2660_v52 }
0x1234   :  { %4320 = vtanh.f32 %v2657_v55  ;;  %v3663_v38 = vmul.f32 -1.442695, %v2654_v49 }
0x1235   :  { %4322 = vtanh.f32 %v2658_v48 }
0x1236   :  { %4324 = vtanh.f32 %v2659_v12 }
0x1237   :  { %4326 = vtanh.f32 %v2660_v52 }
0x1238   :  { %4328 = vtanh.f32 %v2661_v40 }
0x1239   :  { %4330 = vtanh.f32 %v2654_v49 }
0x123a   :  { %4332 = vpow2.f32 %v3664_v42 }
0x123b   :  { %4334 = vpow2.f32 %v3665_v32 }
0x123c   :  { %v4317_v22 = vpop.eup %4316  ;;  %4336 = vpow2.f32 %v3666_v10 }
0x123d   :  { %v4319_v47 = vpop.eup %4318  ;;  %2760 = vrot.lane.b32.xlu0 %v4317_v22, %s4530_s7  ;;  %4338 = vpow2.f32 %v3667_v3 }
0x123e   :  { %2762 = vrot.lane.b32.xlu1 %v4319_v47, %s4530_s7  ;;  %v4321_v17 = vpop.eup %4320  ;;  %4340 = vpow2.f32 %v3668_v30 }
0x123f   :  { %v4323_v13 = vpop.eup %4322  ;;  %4342 = vpow2.f32 %v3669_v39 }
0x1240   :  { %v4325_v24 = vpop.eup %4324  ;;  %4344 = vpow2.f32 %v3670_v31  ;;  %v2727_v31 = vrot.slane %v5584_v6, 7 }
0x1241   :  { %2764 = vrot.lane.b32.xlu0 %v4321_v17, %s4530_s7  ;;  %v4327_v19 = vpop.eup %4326  ;;  %4346 = vpow2.f32 %v3663_v38  ;;  %v2728_v38 = vrot.slane %v5587_v23, 7  ;;  %v2731_v23 = vrot.slane %v5605_v5, 7 }
0x1242   :  { %2766 = vrot.lane.b32.xlu1 %v4323_v13, %s4530_s7  ;;  %v4329_v41 = vpop.eup %4328 }
0x1243   :  { %v4331_v18 = vpop.eup %4330 }
0x1244   :  { %v4333_v26 = vpop.eup %4332 }
0x1245   :  { %2768 = vrot.lane.b32.xlu0 %v4325_v24, %s4530_s7  ;;  %v4335_v4 = vpop.eup %4334  ;;  %v2687_v50 = vadd.f32 1.0, %v4333_v26 }
0x1246   :  { %2770 = vrot.lane.b32.xlu1 %v4327_v19, %s4530_s7  ;;  %v4337_v62 = vpop.eup %4336  ;;  %v2688_v11 = vadd.f32 1.0, %v4335_v4 }
0x1247   :  { %v4339_v60 = vpop.eup %4338  ;;  %4348 = vrcp.f32 %v2687_v50  ;;  %v2689_v44 = vadd.f32 1.0, %v4337_v62  ;;  %v2729_v62 = vrot.slane %v5594_v28, 7 }
0x1248   :  { %v4341_v51 = vpop.eup %4340  ;;  %4350 = vrcp.f32 %v2688_v11  ;;  %v2690_v20 = vadd.f32 1.0, %v4339_v60 }
0x1249   :  { %2772 = vrot.lane.b32.xlu0 %v4329_v41, %s4530_s7  ;;  %v4343_v61 = vpop.eup %4342  ;;  %4352 = vrcp.f32 %v2689_v44  ;;  %v2691_v0 = vadd.f32 1.0, %v4341_v51  ;;  %v2730_v44 = vrot.slane %v5598_v58, 7 }
0x124a   :  { %2758 = vrot.lane.b32.xlu1 %v4331_v18, %s4530_s7  ;;  %v4345_v34 = vpop.eup %4344  ;;  %4354 = vrcp.f32 %v2690_v20  ;;  %v2692_v40 = vadd.f32 1.0, %v4343_v61 }
0x124b   :  { %v4347_v49 = vpop.eup %4346  ;;  %v2693_v14 = vadd.f32 1.0, %v4345_v34  ;;  %4356 = vrcp.f32 %v2691_v0 }
0x124c   :  { %4358 = vrcp.f32 %v2692_v40  ;;  %v2686_v15 = vadd.f32 1.0, %v4347_v49  ;;  %v2732_v40 = vrot.slane %v5612_v7, 7 }
0x124d   :  { %4360 = vrcp.f32 %v2693_v14 }
0x124e   :  { %4362 = vrcp.f32 %v2686_v15  ;;  %v2733_v15 = vrot.slane %v5607_v53, 7 }
0x1251   :  { %v5665_v25 = vpop.eup %4348 }
0x1252   :  { %v5667_v35 = vpop.eup %4350  ;;  %v2743_v26 = vmul.f32 %v5665_v25, %v2727_v31  ;;  %v2919_v31 = vld [vmem:[%s5943_s9 + $0x18] sm:$0xff] }
0x1253   :  { %v5672_v43 = vpop.eup %4352  ;;  %v2744_v50 = vmul.f32 %v5667_v35, %v2728_v38 }
0x1254   :  { %v5675_v33 = vpop.eup %4354  ;;  %v2745_v20 = vmul.f32 %v5672_v43, %v2729_v62 }
0x1255   :  { %v5680_v17 = vpop.eup %4356  ;;  %v2746_v6 = vmul.f32 %v5675_v33, %v2730_v44 }
0x1256   :  { %v5683_v24 = vpop.eup %4358  ;;  %v2747_v28 = vmul.f32 %v5680_v17, %v2731_v23 }
0x1257   :  { %v5688_v42 = vpop.eup %4360  ;;  %v2748_v14 = vmul.f32 %v5683_v24, %v2732_v40 }
0x1258   :  { %v5691_v10 = vpop.eup %4362  ;;  %v2749_v5 = vmul.f32 %v5688_v42, %v2733_v15 }
0x12af   :  { %v2761_v45 = vpop.permute.xlu0 %2760 }
0x12b0   :  { %v2763_v55 = vpop.permute.xlu1 %2762  ;;  %v2783_v57 = vmul.f32 %v5665_v25, %v2761_v45 }
0x12b1   :  { %v2784_v48 = vmul.f32 %v5667_v35, %v2763_v55 }
0x12b2   :  { %2800 = vrot.lane.b32.xlu0 %v2783_v57, %s4531_s8  ;;  %v2726_v57 = vrot.slane %v5576_v1, 7 }
0x12b3   :  { %2802 = vrot.lane.b32.xlu1 %v2784_v48, %s4531_s8  ;;  %v2765_v12 = vpop.permute.xlu0 %2764 }
0x12b4   :  { %v2767_v52 = vpop.permute.xlu1 %2766  ;;  %v2785_v22 = vmul.f32 %v5672_v43, %v2765_v12  ;;  %v2742_v12 = vmul.f32 %v5691_v10, %v2726_v57 }
0x12b5   :  { %v2786_v47 = vmul.f32 %v5675_v33, %v2767_v52 }
0x12b6   :  { %2804 = vrot.lane.b32.xlu0 %v2785_v22, %s4531_s8 }
0x12b7   :  { %2806 = vrot.lane.b32.xlu1 %v2786_v47, %s4531_s8  ;;  %v2769_v13 = vpop.permute.xlu0 %2768 }
0x12b8   :  { %v2771_v19 = vpop.permute.xlu1 %2770  ;;  %v2787_v41 = vmul.f32 %v5680_v17, %v2769_v13 }
0x12b9   :  { %v2788_v18 = vmul.f32 %v5683_v24, %v2771_v19 }
0x12ba   :  { %2808 = vrot.lane.b32.xlu0 %v2787_v41, %s4531_s8  ;;  %v2916_v41 = vld [vmem:[%s5943_s9] sm:$0xff] }
0x12bb   :  { %2810 = vrot.lane.b32.xlu1 %v2788_v18, %s4531_s8  ;;  %v2773_v32 = vpop.permute.xlu0 %2772  ;;  %v2917_v18 = vld [vmem:[%s5943_s9 + $0x8] sm:$0xff] }
0x12bc   :  { %v2789_v3 = vmul.f32 %v5688_v42, %v2773_v32  ;;  %v2759_v30 = vpop.permute.xlu1 %2758  ;;  %v3912_v32 = vpack.c.bf16 %v2917_v18, %v2916_v41  ;;  %v3054_v41 = vlaneseq }
0x12bd   :  { %v2782_v39 = vmul.f32 %v5691_v10, %v2759_v30 }
0x12be   :  { %2812 = vrot.lane.b32.xlu0 %v2789_v3, %s4531_s8  ;;  %3913 = vmatpush3.bf16.msra.mxu1 %v3912_v32  ;;  %v3055_v32 = vshrl.u32 %v3054_v41, 7 }
0x12bf   :  { %2798 = vrot.lane.b32.xlu1 %v2782_v39, %s4531_s8  ;;  %3914 = vmatprep.subr.bf16.mxu1 %v5968_v8  ;;  %v2918_v39 = vld [vmem:[%s5943_s9 + $0x10] sm:$0xff]  ;;  %v655_v8 = vrot.slane %v5003_v27, 1 }
0x12c0   :  { %v3915_v38 = vpack.c.bf16 %v2919_v31, %v2918_v39 }
0x12c2   :  { %3916 = vmatpush3.bf16.msra.mxu1 %v3915_v38 }
0x1324   :  { %v2801_v4 = vpop.permute.xlu0 %2800 }
0x1325   :  { %v2823_v11 = vadd.f32 %v2801_v4, %v2743_v26  ;;  %v2803_v60 = vpop.permute.xlu1 %2802 }
0x1326   :  { %v2824_v51 = vadd.f32 %v2803_v60, %v2744_v50 }
0x1327   :  { %4364 = vtanh.f32 %v2823_v11 }
0x1328   :  { %4366 = vtanh.f32 %v2824_v51  ;;  %v2805_v61 = vpop.permute.xlu0 %2804 }
0x1329   :  { %v2825_v0 = vadd.f32 %v2805_v61, %v2745_v20  ;;  %v2807_v34 = vpop.permute.xlu1 %2806 }
0x132a   :  { %v2826_v49 = vadd.f32 %v2807_v34, %v2746_v6 }
0x132b   :  { %4368 = vtanh.f32 %v2825_v0 }
0x132c   :  { %4370 = vtanh.f32 %v2826_v49  ;;  %v2809_v58 = vpop.permute.xlu0 %2808 }
0x132d   :  { %v2827_v45 = vadd.f32 %v2809_v58, %v2747_v28  ;;  %v2811_v55 = vpop.permute.xlu1 %2810 }
0x132e   :  { %v2828_v48 = vadd.f32 %v2811_v55, %v2748_v14 }
0x132f   :  { %4372 = vtanh.f32 %v2827_v45 }
0x1330   :  { %4374 = vtanh.f32 %v2828_v48  ;;  %v2813_v7 = vpop.permute.xlu0 %2812 }
0x1331   :  { %v4365_v52 = vpop.eup %4364  ;;  %v2829_v22 = vadd.f32 %v2813_v7, %v2749_v5  ;;  %v2799_v47 = vpop.permute.xlu1 %2798 }
0x1332   :  { %v4367_v13 = vpop.eup %4366  ;;  %v2822_v19 = vadd.f32 %v2799_v47, %v2742_v12  ;;  %2848 = vrot.lane.b32.xlu0 %v4365_v52, %s4530_s7 }
0x1333   :  { %4376 = vtanh.f32 %v2829_v22  ;;  %2850 = vrot.lane.b32.xlu1 %v4367_v13, %s4530_s7 }
0x1334   :  { %4378 = vtanh.f32 %v2822_v19 }
0x1335   :  { %v4369_v1 = vpop.eup %4368 }
0x1336   :  { %v4371_v53 = vpop.eup %4370  ;;  %2852 = vrot.lane.b32.xlu0 %v4369_v1, %s4530_s7  ;;  %v4532_v1 = vmov 1966171168  }
0x1337   :  { %2854 = vrot.lane.b32.xlu1 %v4371_v53, %s4530_s7  ;;  %v3052_v53 = vunpack.c.l.s4 %v4532_v1 }
0x1339   :  { %v4373_v3 = vpop.eup %4372  ;;  %v3053_v18 = vunpack.c.0.s8 %v3052_v53 }
0x133a   :  { %v4375_v30 = vpop.eup %4374  ;;  %2856 = vrot.lane.b32.xlu0 %v4373_v3, %s4530_s7  ;;  %v3048_v3 = vld [vmem:[#allocation8] sm:$0xff] }
0x133b   :  { %2858 = vrot.lane.b32.xlu1 %v4375_v30, %s4530_s7  ;;  %v5796_v30 = vld [vmem:[%s5944_s10] ss:$0 sm:$0xff]  ;;  %v3050_v39 = vcombine.high %v3048_v3, %v3048_v3  ;;  %s4533_s10 = smov [#allocation12]  }
0x133c   :  { %s3583_s1 = sshll.u32 %s4533_s10, 4  ;;  %s3584_s1 = int_to_ptr.vmem [resolvable:$true] %s3583_s1 }
0x133d   :  { %v4377_v26 = vpop.eup %4376  ;;  %s4490_s18 = scalar_lea.vmem %s3584_s1, 1024  ;;  %p4495_p13 = scmp.lt.s32.totalorder %s3584_s1, %s3584_s1 }
0x133e   :  { %v4379_v4 = vpop.eup %4378  ;;  %2860 = vrot.lane.b32.xlu0 %v4377_v26, %s4530_s7  ;;  %p4491_p12 = scmp.ne.s32.totalorder %s3584_s1, %s4490_s18  ;;  %p4496_p0 = scmp.lt.s32.totalorder %s4490_s18, %s4490_s18 }
0x133f   :  { %2846 = vrot.lane.b32.xlu1 %v4379_v4, %s4530_s7 }
0x1340   :  { %p4497_p1 = por %p4496_p0, %p4495_p13 }
0x1342   :  { %656 = vrot.lane.b32.xlu0 %v5010_v36, %s4531_s8  ;;  %p4498_p2 = pnand %p4497_p1, %p4491_p12 }
0x1343   :  { %658 = vrot.lane.b32.xlu1 %v655_v8, %s4531_s8 }
0x1346   :  { %1044 = vrot.lane.b32.xlu0 %v5135_v9, %s4531_s8 }
0x1347   :  { %1046 = vrot.lane.b32.xlu1 %v5140_v16, %s4531_s8 }
0x134a   :  { %1415 = vrot.lane.b32.xlu0 %v5259_v37, %s4531_s8 }
0x134b   :  { %1417 = vrot.lane.b32.xlu1 %v5265_v21, %s4531_s8 }
0x134e   :  { %1786 = vrot.lane.b32.xlu0 %v5387_v56, %s4531_s8 }
0x134f   :  { %1788 = vrot.lane.b32.xlu1 %v5394_v29, %s4531_s8 }
0x1352   :  { %2157 = vrot.lane.b32.xlu0 %v5506_v63, %s4531_s8 }
0x1353   :  { %2159 = vrot.lane.b32.xlu1 %v5520_v59, %s4531_s8 }
0x1356   :  { %2528 = vrot.lane.b32.xlu0 %v5628_v54, %s4531_s8 }
0x1357   :  { %2530 = vrot.lane.b32.xlu1 %v5646_v46, %s4531_s8 }
0x13a4   :  { %v2849_v27 = vpop.permute.xlu0 %2848 }
0x13a5   :  { %v2871_v36 = vmul.f32 %v5665_v25, %v2849_v27  ;;  %v2851_v9 = vpop.permute.xlu1 %2850 }
0x13a6   :  { %v2872_v16 = vmul.f32 %v5667_v35, %v2851_v9 }
0x13a7   :  { %v2886_v37 = vrot.slane %v2871_v36, 7 }
0x13a8   :  { %v2887_v21 = vrot.slane %v2872_v16, 6  ;;  %v2853_v56 = vpop.permute.xlu0 %2852 }
0x13a9   :  { %v2873_v29 = vmul.f32 %v5672_v43, %v2853_v56  ;;  %v2855_v63 = vpop.permute.xlu1 %2854 }
0x13aa   :  { %v2874_v59 = vmul.f32 %v5675_v33, %v2855_v63  ;;  %v2888_v54 = vsel %vm695_vm5, %v2887_v21, %v2886_v37  ;;  %vm2163_vm5 = vcmask 261125  }
0x13ab   :  { %v2889_v50 = vrot.slane %v2873_v29, 5 }
0x13ac   :  { %v2891_v62 = vrot.slane %v2874_v59, 4  ;;  %v2857_v11 = vpop.permute.xlu0 %2856 }
0x13ad   :  { %v2890_v46 = vsel %vm638_vm4, %v2889_v50, %v2888_v54  ;;  %v2875_v25 = vmul.f32 %v5680_v17, %v2857_v11  ;;  %v2859_v60 = vpop.permute.xlu1 %2858  ;;  %vm1794_vm4 = vcmask 257024  }
0x13ae   :  { %v2876_v35 = vmul.f32 %v5683_v24, %v2859_v60  ;;  %v2892_v51 = vsel %vm641_vm6, %v2891_v62, %v2890_v46  ;;  %vm2165_vm6 = vcmask 258048  }
0x13af   :  { %v2893_v44 = vrot.slane %v2875_v25, 3 }
0x13b0   :  { %v2895_v20 = vrot.slane %v2876_v35, 2  ;;  %v2861_v43 = vpop.permute.xlu0 %2860 }
0x13b1   :  { %v2894_v61 = vsel %vm644_vm7, %v2893_v44, %v2892_v51  ;;  %v2877_v33 = vmul.f32 %v5688_v42, %v2861_v43  ;;  %v2847_v6 = vpop.permute.xlu1 %2846  ;;  %vm2534_vm7 = vcmask 261126  }
0x13b2   :  { %v2870_v23 = vmul.f32 %v5691_v10, %v2847_v6  ;;  %v2896_v17 = vsel %vm647_vm8, %v2895_v20, %v2894_v61  ;;  %vm2536_vm8 = vcmask 259072  }
0x13b3   :  { %v2897_v0 = vrot.slane %v2877_v33, 1 }
0x13b4   :  { %2899 = vrot.lane.b32.xlu0 %v2870_v23, %s4531_s8  ;;  %v657_v24 = vpop.permute.xlu0 %656 }
0x13b5   :  { %v659_v34 = vpop.permute.xlu1 %658  ;;  %663 = vst.msk [vmem:[#allocation2 - $0x1] sm:$0xfe] %vm662_vm11, %v657_v24  ;;  %v2898_v40 = vsel %vm650_vm9, %v2897_v0, %v2896_v17  ;;  %vm2905_vm9 = vcmask 261127  }
0x13b6   :  { %665 = vst.msk [vmem:[#allocation2 + $0x7] sm:$0x1] %vm664_vm12, %v659_v34  ;;  %2901 = vrot.lane.b32.xlu1 %v2898_v40, %s4531_s8 }
0x13b8   :  { %v1045_v42 = vpop.permute.xlu0 %1044 }
0x13b9   :  { %v1047_v49 = vpop.permute.xlu1 %1046  ;;  %1051 = vst.msk [vmem:[#allocation2 + $0x6] sm:$0xfc] %vm1050_vm13, %v1045_v42 }
0x13ba   :  { %1053 = vst.msk [vmem:[#allocation2 + $0xe] sm:$0x3] %vm1052_vm14, %v1047_v49 }
0x13bc   :  { %v1416_v10 = vpop.permute.xlu0 %1415 }
0x13bd   :  { %v1418_v28 = vpop.permute.xlu1 %1417  ;;  %1422 = vst.msk [vmem:[#allocation2 + $0xd] sm:$0xf8] %vm1421_vm15, %v1416_v10  ;;  %v2909_v58 = vld [vmem:[#allocation2] sm:$0xff] }
0x13be   :  { %1424 = vst.msk [vmem:[#allocation2 + $0x15] sm:$0x7] %vm1423_vm2, %v1418_v28  ;;  %3844 = vmatmul.mubr.msk.f32.vlgmr.msra.gmra.mrb[8].mxu1 %vm113_vm1, %v2909_v58 }
0x13bf   :  { %3846 = vmatprep.mubr.msk.f32.mxu1 %vm4528_vm0, %v5969_v2 }
0x13c0   :  { %v1787_v14 = vpop.permute.xlu0 %1786 }
0x13c1   :  { %v1789_v15 = vpop.permute.xlu1 %1788  ;;  %1793 = vst.msk [vmem:[#allocation2 + $0x14] sm:$0xf0] %vm1792_vm3, %v1787_v14  ;;  %v2910_v45 = vld [vmem:[#allocation2 + $0x8] sm:$0xff] }
0x13c2   :  { %1795 = vst.msk [vmem:[#allocation2 + $0x1c] sm:$0xf] %vm1794_vm4, %v1789_v15  ;;  %3847 = vmatmul.mubr.msk.f32.gmra.mrb[10].mxu1 %vm113_vm1, %v2910_v45 }
0x13c3   :  { %3849 = vmatprep.mubr.msk.f32.mxu1 %vm4528_vm0, %v5969_v2 }
0x13c4   :  { %v2158_v55 = vpop.permute.xlu0 %2157 }
0x13c5   :  { %v2160_v57 = vpop.permute.xlu1 %2159  ;;  %2164 = vst.msk [vmem:[#allocation2 + $0x1b] sm:$0xe0] %vm2163_vm5, %v2158_v55  ;;  %v2911_v48 = vld [vmem:[#allocation2 + $0x10] sm:$0xff] }
0x13c6   :  { %2166 = vst.msk [vmem:[#allocation2 + $0x23] sm:$0x1f] %vm2165_vm6, %v2160_v57  ;;  %3850 = vmatmul.mubr.msk.f32.gmra.mrb[12].mxu1 %vm113_vm1, %v2911_v48 }
0x13c7   :  { %3852 = vmatprep.mubr.msk.f32.mxu1 %vm4528_vm0, %v5969_v2 }
0x13c8   :  { %v2529_v5 = vpop.permute.xlu0 %2528 }
0x13c9   :  { %v2531_v7 = vpop.permute.xlu1 %2530  ;;  %2535 = vst.msk [vmem:[#allocation2 + $0x22] sm:$0xc0] %vm2534_vm7, %v2529_v5  ;;  %v2912_v12 = vld [vmem:[#allocation2 + $0x18] sm:$0xff] }
0x13ca   :  { %2537 = vst.msk [vmem:[#allocation2 + $0x2a] sm:$0x3f] %vm2536_vm8, %v2531_v7  ;;  %3853 = vmatmul.mubr.msk.f32.gmra.mrb[14].mxu1 %vm113_vm1, %v2912_v12 }
0x13cb   :  { %3855 = vmatprep.mubr.msk.f32.mxu1 %vm4528_vm0, %v5969_v2 }
0x13cd   :  { %v2913_v52 = vld [vmem:[#allocation2 + $0x20] sm:$0xff] }
0x13ce   :  { %3856 = vmatmul.mubr.msk.f32.gmra.mrb[16].mxu1 %vm113_vm1, %v2913_v52 }
0x13cf   :  { %3858 = vmatprep.mubr.msk.f32.mxu1 %vm4528_vm0, %v5969_v2 }
0x13d1   :  { %v2914_v22 = vld [vmem:[#allocation2 + $0x28] sm:$0xff] }
0x13d2   :  { %3859 = vmatmul.mubr.msk.f32.gmra.mrb[18].mxu1 %vm113_vm1, %v2914_v22 }
0x13d3   :  { %3861 = vmatprep.mubr.msk.f32.mxu1 %vm4528_vm0, %v5969_v2  ;;  %v5798_v2 = vsub.s32 %v3053_v18, %v3055_v32  ;;  %vm3107_vm0 = vcmask 57344  }
0x13d5   :  { %v3057_v38 = vrot.slane %v3048_v3, %v5798_v2  ;;  %v3064_v26 = vrot.slane %v3050_v39, %v5798_v2 }
0x13d7   :  { %v3065_v27 = vcombine.high %v3057_v38, %v3057_v38  ;;  %v3066_v36 = vcombine.high %v3064_v26, %v3064_v26  ;;  %v3073_v9 = vrot.slane %v3057_v38, %v5798_v2  ;;  %v3080_v16 = vrot.slane %v3064_v26, %v5798_v2 }
0x13d9   :  { %v3087_v29 = vrot.slane %v3065_v27, %v5798_v2  ;;  %v3094_v63 = vrot.slane %v3066_v36, %v5798_v2  ;;  %v3095_v59 = vcombine.high %v3073_v9, %v3073_v9  ;;  %v3096_v50 = vcombine.high %v3080_v16, %v3080_v16  ;;  %3108 = vst.msk [vmem:[#allocation12] sm:$0x1] %vm3107_vm0, %v3073_v9 }
0x13da   :  { %3112 = vst.msk [vmem:[#allocation12 + $0x20] sm:$0x1] %vm3107_vm0, %v3080_v16 }
0x13db   :  { %v3097_v60 = vcombine.high %v3087_v29, %v3087_v29  ;;  %v3098_v35 = vcombine.high %v3094_v63, %v3094_v63  ;;  %3109 = vst.msk [vmem:[#allocation12 + $0x8] sm:$0x1] %vm3107_vm0, %v3087_v29  ;;  %3110 = vst.msk [vmem:[#allocation12 + $0x10] sm:$0x1] %vm3107_vm0, %v3095_v59 }
0x13dc   :  { %3113 = vst.msk [vmem:[#allocation12 + $0x28] sm:$0x1] %vm3107_vm0, %v3094_v63  ;;  %3114 = vst.msk [vmem:[#allocation12 + $0x30] sm:$0x1] %vm3107_vm0, %v3096_v50 }
0x13dd   :  { %3111 = vst.msk [vmem:[#allocation12 + $0x18] sm:$0x1] %vm3107_vm0, %v3097_v60  ;;  %3115 = vst.msk [vmem:[#allocation12 + $0x38] sm:$0x1] %vm3107_vm0, %v3098_v35 }
0x1426   :  { %v2900_v47 = vpop.permute.xlu0 %2899 }
0x1427   :  { %2906 = vst.msk [vmem:[#allocation2 + $0x29] sm:$0x80] %vm2905_vm9, %v2900_v47 }
0x1428   :  { %v2902_v13 = vpop.permute.xlu1 %2901 }
0x1429   :  { %2908 = vst.msk [vmem:[#allocation2 + $0x31] sm:$0x7f] %vm2907_vm10, %v2902_v13 }
0x1430   :  { %v2915_v19 = vld [vmem:[#allocation2 + $0x30] sm:$0xff] }
0x1431   :  { %3862 = vmatmul.mubr.msk.f32.gmra.mrb[20].mxu1 %vm113_vm1, %v2915_v19 }
0x1491   :  { %v3014_v31 = vpop.f32.mrb[8].mxu1 }
0x1492   :  { %v3015_v4 = vadd.f32 %v5796_v30, %v3014_v31  ;;  %v3845_v8 = vpop.f32.mrb[9].mxu1 }
0x1494   :  { %v3117_v37 = vcombine.high %v3015_v4, %v3015_v4  ;;  %v3124_v21 = vrot.slane %v3015_v4, %v5798_v2 }
0x1495   :  { %v3019_v56 = vpop.f32.mrb[10].mxu1 }
0x1496   :  { %v3131_v54 = vrot.slane %v3117_v37, %v5798_v2  ;;  %v3132_v62 = vcombine.high %v3124_v21, %v3124_v21  ;;  %v3140_v11 = vrot.slane %v3124_v21, %v5798_v2  ;;  %v3020_v46 = vadd.f32 %v5796_v30, %v3019_v56  ;;  %v3848_v25 = vpop.f32.mrb[11].mxu1 }
0x1498   :  { %v3133_v44 = vcombine.high %v3131_v54, %v3131_v54  ;;  %v3147_v51 = vrot.slane %v3131_v54, %v5798_v2  ;;  %v3154_v20 = vrot.slane %v3132_v62, %v5798_v2  ;;  %v3162_v43 = vcombine.high %v3140_v11, %v3140_v11  ;;  %3174 = vst.msk [vmem:[#allocation12 + $0x1] sm:$0x1] %vm3107_vm0, %v3140_v11 }
0x1499   :  { %v3183_v61 = vcombine.high %v3020_v46, %v3020_v46  ;;  %v3190_v33 = vrot.slane %v3020_v46, %v5798_v2  ;;  %v3024_v6 = vpop.f32.mrb[12].mxu1 }
0x149a   :  { %v3161_v23 = vrot.slane %v3133_v44, %v5798_v2  ;;  %v3163_v0 = vcombine.high %v3147_v51, %v3147_v51  ;;  %v3164_v17 = vcombine.high %v3154_v20, %v3154_v20  ;;  %3175 = vst.msk [vmem:[#allocation12 + $0x9] sm:$0x1] %vm3107_vm0, %v3154_v20  ;;  %3176 = vst.msk [vmem:[#allocation12 + $0x11] sm:$0x1] %vm3107_vm0, %v3162_v43  ;;  %v3851_v34 = vpop.f32.mrb[13].mxu1 }
0x149b   :  { %3178 = vst.msk [vmem:[#allocation12 + $0x21] sm:$0x1] %vm3107_vm0, %v3147_v51  ;;  %v3025_v24 = vadd.f32 %v5796_v30, %v3024_v6  ;;  %v3197_v40 = vrot.slane %v3183_v61, %v5798_v2  ;;  %v3198_v42 = vcombine.high %v3190_v33, %v3190_v33  ;;  %v3206_v49 = vrot.slane %v3190_v33, %v5798_v2 }
0x149c   :  { %v3165_v10 = vcombine.high %v3161_v23, %v3161_v23  ;;  %3177 = vst.msk [vmem:[#allocation12 + $0x19] sm:$0x1] %vm3107_vm0, %v3164_v17  ;;  %3179 = vst.msk [vmem:[#allocation12 + $0x29] sm:$0x1] %vm3107_vm0, %v3161_v23 }
0x149d   :  { %3180 = vst.msk [vmem:[#allocation12 + $0x31] sm:$0x1] %vm3107_vm0, %v3163_v0  ;;  %v3249_v28 = vcombine.high %v3025_v24, %v3025_v24  ;;  %v3256_v58 = vrot.slane %v3025_v24, %v5798_v2  ;;  %v3199_v14 = vcombine.high %v3197_v40, %v3197_v40  ;;  %v3213_v15 = vrot.slane %v3197_v40, %v5798_v2  ;;  %v3029_v57 = vpop.f32.mrb[14].mxu1 }
0x149e   :  { %v3220_v45 = vrot.slane %v3198_v42, %v5798_v2  ;;  %v3228_v55 = vcombine.high %v3206_v49, %v3206_v49  ;;  %3240 = vst.msk [vmem:[#allocation12 + $0x2] sm:$0x1] %vm3107_vm0, %v3206_v49  ;;  %3181 = vst.msk [vmem:[#allocation12 + $0x39] sm:$0x1] %vm3107_vm0, %v3165_v10  ;;  %v3030_v12 = vadd.f32 %v5796_v30, %v3029_v57  ;;  %v3854_v52 = vpop.f32.mrb[15].mxu1 }
0x149f   :  { %v3263_v48 = vrot.slane %v3249_v28, %v5798_v2  ;;  %v3264_v5 = vcombine.high %v3256_v58, %v3256_v58  ;;  %v3272_v7 = vrot.slane %v3256_v58, %v5798_v2  ;;  %v3227_v22 = vrot.slane %v3199_v14, %v5798_v2  ;;  %3244 = vst.msk [vmem:[#allocation12 + $0x22] sm:$0x1] %vm3107_vm0, %v3213_v15 }
0x14a0   :  { %v3229_v47 = vcombine.high %v3213_v15, %v3213_v15  ;;  %v3230_v13 = vcombine.high %v3220_v45, %v3220_v45  ;;  %3241 = vst.msk [vmem:[#allocation12 + $0xa] sm:$0x1] %vm3107_vm0, %v3220_v45  ;;  %3242 = vst.msk [vmem:[#allocation12 + $0x12] sm:$0x1] %vm3107_vm0, %v3228_v55  ;;  %v3315_v32 = vcombine.high %v3030_v12, %v3030_v12 }
0x14a1   :  { %v3265_v19 = vcombine.high %v3263_v48, %v3263_v48  ;;  %v3279_v1 = vrot.slane %v3263_v48, %v5798_v2  ;;  %v3286_v53 = vrot.slane %v3264_v5, %v5798_v2  ;;  %v3294_v41 = vcombine.high %v3272_v7, %v3272_v7  ;;  %3306 = vst.msk [vmem:[#allocation12 + $0x3] sm:$0x1] %vm3107_vm0, %v3272_v7  ;;  %v3034_v39 = vpop.f32.mrb[16].mxu1 }
0x14a2   :  { %v3231_v18 = vcombine.high %v3227_v22, %v3227_v22  ;;  %3243 = vst.msk [vmem:[#allocation12 + $0x1a] sm:$0x1] %vm3107_vm0, %v3230_v13  ;;  %3245 = vst.msk [vmem:[#allocation12 + $0x2a] sm:$0x1] %vm3107_vm0, %v3227_v22  ;;  %v3322_v3 = vrot.slane %v3030_v12, %v5798_v2  ;;  %v3035_v4 = vadd.f32 %v5796_v30, %v3034_v39  ;;  %v3857_v8 = vpop.f32.mrb[17].mxu1 }
0x14a3   :  { %3246 = vst.msk [vmem:[#allocation12 + $0x32] sm:$0x1] %vm3107_vm0, %v3229_v47  ;;  %v3293_v31 = vrot.slane %v3265_v19, %v5798_v2  ;;  %v3295_v38 = vcombine.high %v3279_v1, %v3279_v1  ;;  %v3296_v26 = vcombine.high %v3286_v53, %v3286_v53  ;;  %3307 = vst.msk [vmem:[#allocation12 + $0xb] sm:$0x1] %vm3107_vm0, %v3286_v53 }
0x14a4   :  { %3308 = vst.msk [vmem:[#allocation12 + $0x13] sm:$0x1] %vm3107_vm0, %v3294_v41  ;;  %3310 = vst.msk [vmem:[#allocation12 + $0x23] sm:$0x1] %vm3107_vm0, %v3279_v1  ;;  %v3329_v27 = vrot.slane %v3315_v32, %v5798_v2  ;;  %v3330_v36 = vcombine.high %v3322_v3, %v3322_v3  ;;  %v3338_v9 = vrot.slane %v3322_v3, %v5798_v2 }
0x14a5   :  { %3247 = vst.msk [vmem:[#allocation12 + $0x3a] sm:$0x1] %vm3107_vm0, %v3231_v18  ;;  %v3297_v16 = vcombine.high %v3293_v31, %v3293_v31  ;;  %3309 = vst.msk [vmem:[#allocation12 + $0x1b] sm:$0x1] %vm3107_vm0, %v3296_v26  ;;  %v3381_v37 = vcombine.high %v3035_v4, %v3035_v4  ;;  %v3388_v21 = vrot.slane %v3035_v4, %v5798_v2  ;;  %v3039_v50 = vpop.f32.mrb[18].mxu1 }
0x14a6   :  { %3311 = vst.msk [vmem:[#allocation12 + $0x2b] sm:$0x1] %vm3107_vm0, %v3293_v31  ;;  %3312 = vst.msk [vmem:[#allocation12 + $0x33] sm:$0x1] %vm3107_vm0, %v3295_v38  ;;  %v3331_v56 = vcombine.high %v3329_v27, %v3329_v27  ;;  %v3345_v29 = vrot.slane %v3329_v27, %v5798_v2  ;;  %v3352_v63 = vrot.slane %v3330_v36, %v5798_v2  ;;  %v3860_v25 = vpop.f32.mrb[19].mxu1 }
0x14a7   :  { %v3360_v59 = vcombine.high %v3338_v9, %v3338_v9  ;;  %3372 = vst.msk [vmem:[#allocation12 + $0x4] sm:$0x1] %vm3107_vm0, %v3338_v9  ;;  %3313 = vst.msk [vmem:[#allocation12 + $0x3b] sm:$0x1] %vm3107_vm0, %v3297_v16  ;;  %v3395_v54 = vrot.slane %v3381_v37, %v5798_v2  ;;  %v3396_v62 = vcombine.high %v3388_v21, %v3388_v21 }
0x14a8   :  { %v3404_v11 = vrot.slane %v3388_v21, %v5798_v2  ;;  %v3040_v46 = vadd.f32 %v5796_v30, %v3039_v50  ;;  %v3359_v60 = vrot.slane %v3331_v56, %v5798_v2  ;;  %v3361_v35 = vcombine.high %v3345_v29, %v3345_v29  ;;  %3373 = vst.msk [vmem:[#allocation12 + $0xc] sm:$0x1] %vm3107_vm0, %v3352_v63 }
0x14a9   :  { %v3362_v44 = vcombine.high %v3352_v63, %v3352_v63  ;;  %3374 = vst.msk [vmem:[#allocation12 + $0x14] sm:$0x1] %vm3107_vm0, %v3360_v59  ;;  %3376 = vst.msk [vmem:[#allocation12 + $0x24] sm:$0x1] %vm3107_vm0, %v3345_v29  ;;  %v3397_v51 = vcombine.high %v3395_v54, %v3395_v54  ;;  %v3411_v20 = vrot.slane %v3395_v54, %v5798_v2 }
0x14aa   :  { %v3418_v43 = vrot.slane %v3396_v62, %v5798_v2  ;;  %v3426_v61 = vcombine.high %v3404_v11, %v3404_v11  ;;  %3438 = vst.msk [vmem:[#allocation12 + $0x5] sm:$0x1] %vm3107_vm0, %v3404_v11  ;;  %v3363_v33 = vcombine.high %v3359_v60, %v3359_v60  ;;  %3377 = vst.msk [vmem:[#allocation12 + $0x2c] sm:$0x1] %vm3107_vm0, %v3359_v60 }
0x14ab   :  { %3375 = vst.msk [vmem:[#allocation12 + $0x1c] sm:$0x1] %vm3107_vm0, %v3362_v44  ;;  %3378 = vst.msk [vmem:[#allocation12 + $0x34] sm:$0x1] %vm3107_vm0, %v3361_v35  ;;  %v3447_v6 = vcombine.high %v3040_v46, %v3040_v46  ;;  %v3454_v23 = vrot.slane %v3040_v46, %v5798_v2  ;;  %v3425_v0 = vrot.slane %v3397_v51, %v5798_v2 }
0x14ac   :  { %v3427_v17 = vcombine.high %v3411_v20, %v3411_v20  ;;  %v3428_v24 = vcombine.high %v3418_v43, %v3418_v43  ;;  %3439 = vst.msk [vmem:[#allocation12 + $0xd] sm:$0x1] %vm3107_vm0, %v3418_v43  ;;  %3440 = vst.msk [vmem:[#allocation12 + $0x15] sm:$0x1] %vm3107_vm0, %v3426_v61 }
0x14ad   :  { %3442 = vst.msk [vmem:[#allocation12 + $0x25] sm:$0x1] %vm3107_vm0, %v3411_v20  ;;  %3379 = vst.msk [vmem:[#allocation12 + $0x3c] sm:$0x1] %vm3107_vm0, %v3363_v33  ;;  %v3461_v34 = vrot.slane %v3447_v6, %v5798_v2  ;;  %v3462_v40 = vcombine.high %v3454_v23, %v3454_v23  ;;  %v3470_v42 = vrot.slane %v3454_v23, %v5798_v2 }
0x14ae   :  { %v3429_v49 = vcombine.high %v3425_v0, %v3425_v0  ;;  %3441 = vst.msk [vmem:[#allocation12 + $0x1d] sm:$0x1] %vm3107_vm0, %v3428_v24  ;;  %3443 = vst.msk [vmem:[#allocation12 + $0x2d] sm:$0x1] %vm3107_vm0, %v3425_v0 }
0x14af   :  { %3444 = vst.msk [vmem:[#allocation12 + $0x35] sm:$0x1] %vm3107_vm0, %v3427_v17  ;;  %v3463_v10 = vcombine.high %v3461_v34, %v3461_v34  ;;  %v3477_v28 = vrot.slane %v3461_v34, %v5798_v2  ;;  %v3484_v58 = vrot.slane %v3462_v40, %v5798_v2  ;;  %v3492_v14 = vcombine.high %v3470_v42, %v3470_v42 }
0x14b0   :  { %3504 = vst.msk [vmem:[#allocation12 + $0x6] sm:$0x1] %vm3107_vm0, %v3470_v42  ;;  %3445 = vst.msk [vmem:[#allocation12 + $0x3d] sm:$0x1] %vm3107_vm0, %v3429_v49 }
0x14b1   :  { %v3491_v15 = vrot.slane %v3463_v10, %v5798_v2  ;;  %v3493_v45 = vcombine.high %v3477_v28, %v3477_v28  ;;  %v3494_v55 = vcombine.high %v3484_v58, %v3484_v58  ;;  %3505 = vst.msk [vmem:[#allocation12 + $0xe] sm:$0x1] %vm3107_vm0, %v3484_v58  ;;  %3506 = vst.msk [vmem:[#allocation12 + $0x16] sm:$0x1] %vm3107_vm0, %v3492_v14 }
0x14b2   :  { %3508 = vst.msk [vmem:[#allocation12 + $0x26] sm:$0x1] %vm3107_vm0, %v3477_v28 }
0x14b3   :  { %v3495_v57 = vcombine.high %v3491_v15, %v3491_v15  ;;  %3507 = vst.msk [vmem:[#allocation12 + $0x1e] sm:$0x1] %vm3107_vm0, %v3494_v55  ;;  %3509 = vst.msk [vmem:[#allocation12 + $0x2e] sm:$0x1] %vm3107_vm0, %v3491_v15 }
0x14b4   :  { %3510 = vst.msk [vmem:[#allocation12 + $0x36] sm:$0x1] %vm3107_vm0, %v3493_v45 }
0x14b5   :  { %3511 = vst.msk [vmem:[#allocation12 + $0x3e] sm:$0x1] %vm3107_vm0, %v3495_v57 }
0x1504   :  { %v3044_v48 = vpop.f32.mrb[20].mxu1 }
0x1505   :  { %v3045_v5 = vadd.f32 %v5796_v30, %v3044_v48  ;;  %v3863_v7 = vpop.f32.mrb[21].mxu1 }
0x1507   :  { %v3513_v12 = vcombine.high %v3045_v5, %v3045_v5  ;;  %v3520_v52 = vrot.slane %v3045_v5, %v5798_v2 }
0x1509   :  { %v3527_v22 = vrot.slane %v3513_v12, %v5798_v2  ;;  %v3528_v47 = vcombine.high %v3520_v52, %v3520_v52  ;;  %v3536_v13 = vrot.slane %v3520_v52, %v5798_v2 }
0x150b   :  { %v3529_v19 = vcombine.high %v3527_v22, %v3527_v22  ;;  %v3543_v1 = vrot.slane %v3527_v22, %v5798_v2  ;;  %v3550_v53 = vrot.slane %v3528_v47, %v5798_v2  ;;  %v3558_v41 = vcombine.high %v3536_v13, %v3536_v13  ;;  %3570 = vst.msk [vmem:[#allocation12 + $0x7] sm:$0x1] %vm3107_vm0, %v3536_v13 }
0x150d   :  { %v3557_v30 = vrot.slane %v3529_v19, %v5798_v2  ;;  %v3559_v18 = vcombine.high %v3543_v1, %v3543_v1  ;;  %v3560_v32 = vcombine.high %v3550_v53, %v3550_v53  ;;  %3571 = vst.msk [vmem:[#allocation12 + $0xf] sm:$0x1] %vm3107_vm0, %v3550_v53  ;;  %3572 = vst.msk [vmem:[#allocation12 + $0x17] sm:$0x1] %vm3107_vm0, %v3558_v41 }
0x150e   :  { %3574 = vst.msk [vmem:[#allocation12 + $0x27] sm:$0x1] %vm3107_vm0, %v3543_v1 }
0x150f   :  { %v3561_v3 = vcombine.high %v3557_v30, %v3557_v30  ;;  %3573 = vst.msk [vmem:[#allocation12 + $0x1f] sm:$0x1] %vm3107_vm0, %v3560_v32  ;;  %3575 = vst.msk [vmem:[#allocation12 + $0x2f] sm:$0x1] %vm3107_vm0, %v3557_v30 }
0x1510   :  { %3576 = vst.msk [vmem:[#allocation12 + $0x37] sm:$0x1] %vm3107_vm0, %v3559_v18 }
0x1511   :  { %3577 = vst.msk [vmem:[#allocation12 + $0x3f] sm:$0x1] %vm3107_vm0, %v3561_v3 }
0x1512   :  { %4501 = shalt.err (!%p4498_p2)
}
0x1513   :  { %s4502_s22 = scalar_lea.hbm %s5945_s11, 1024 }
0x1514   :  { %p4503_p3 = scmp.ne.s32.totalorder %s5945_s11, %s4502_s22  ;;  %p4506_p4 = scmp.lt.u32.totalorder %s4502_s22, %s5945_s11 }
0x1516   :  { %p4508_p5 = pnand %p4506_p4, %p4503_p3 }
0x1518   :  { %4511 = shalt.err (!%p4508_p5)
}
0x1519   :  { %3589 = dma.vmem_to_hbm [thread:$0]  %s3584_s1, 1024, %s5945_s11, [#allocation5], %s4523_s4, %s4523_s4, %s4524_s20  }
0x151a   :  { %4518 = dma.done.wait [#allocation5], 1024  }
0x151b   :  { %4519 = vsyncadd [#allocation5], 4294966272 }
0x151c   :  { %3593 = vsyncpa [#allocation4], 1 }
0x151d   :  { %3594 = vsyncpa [#allocation7], 1 }
0x151e   :  { %3595 = vsyncpa [#allocation10], 1 }
0x151f   :  { %3596 = vsyncpa [#allocation5], 1 }

</bundles_post_ra>
